<compile_context>
chip_gen: v5e
topology: v5e:2x2
jax: 0.10.0
libtpu: 0.0.40
codegen_flags: <defaults>
</compile_context>

<pallas_src>
import math

import jax
import jax.numpy as jnp
from jax.experimental import pallas as pl
from jax.experimental.pallas import tpu as pltpu

# Small-but-consistent hyperparameters (attn_embed_dim=768 / num_heads=8 in the
# module defaults; we keep num_heads=8 and shrink the embed dim for a small run).
EMBED_DIM = 128
NUM_HEADS = 8
HEAD_DIM = EMBED_DIM // NUM_HEADS
NUM_VIEWS = 25          # fc_layer = nn.Linear(25, 1)
S_IMG = 8               # image tokens produced by the CLIP stub
S_TXT = 8               # text tokens produced by the CLIP stub
VOCAB = 1000


# ---------------------------------------------------------------------------
# Small hardware-aware knobs (plain Python, safe fallbacks).
# ---------------------------------------------------------------------------
def _device_kind():
    try:
        return jax.devices()[0].device_kind.lower()
    except Exception:
        return ""


def _mxu_target_rows():
    """Rows of M worth feeding the MXU per block: 128 on v5e, 256 on v6e/v7x."""
    kind = _device_kind()
    if "v5 lite" in kind or "v5e" in kind or "v5lite" in kind:
        return 128
    return 256


def _fc25_max_tile():
    """Lane-tile cap for fc25: bigger on 128-MiB-VMEM parts, conservative on v7x."""
    kind = _device_kind()
    if "v5" in kind or "v6" in kind:
        return 8192
    return 4096


# ---------------------------------------------------------------------------
# Pallas kernel 1: fc_layer (Linear 25 -> 1) over the view axis.
# Input block (1, 25, T) with T on lanes; weights/bias are SMEM scalars.
# Rows are streamed straight from the ref (VPU mul-add per view, ~3 live vregs).
# Output block (1, 1, T): lane-dense stores.
# ---------------------------------------------------------------------------
def _fc25_kernel(w_ref, b_ref, x_ref, o_ref):
    acc = x_ref[0, 0:1, :] * w_ref[0]                 # (1, T)
    for v in range(1, NUM_VIEWS):                     # static unroll, row streamed
        acc = acc + x_ref[0, v:v + 1, :] * w_ref[v]   # direct VMEM row load
    o_ref[0] = acc + b_ref[0]


def _pick_spatial_tile(p, max_tile):
    """Largest multiple-of-128 divisor of p (p is already a multiple of 128)."""
    best = 128
    t = 128
    lim = min(p, max_tile)
    while t <= lim:
        if p % t == 0:
            best = t
        t += 128
    return best


def fc25(x_bvp, w, b):
    """Linear(25 -> 1) over the view axis.  x_bvp: (B, 25, P) f32 -> (B, P)."""
    B, V, P = x_bvp.shape
    # Pad the spatial axis to a multiple of 128 so the output is always
    # lane-dense and the block never silently falls back to the full extent.
    P_pad = ((P + 127) // 128) * 128
    if P_pad != P:
        x_bvp = jnp.pad(x_bvp, ((0, 0), (0, 0), (0, P_pad - P)))
    tile = _pick_spatial_tile(P_pad, _fc25_max_tile())
    grid = (B, P_pad // tile)

    # Explicit scoped-VMEM budget: 2 buffers x (25 + 1) rows x tile x 4 B + slack.
    vmem_limit = int(min(32 * 1024 * 1024,
                         max(8 * 1024 * 1024, 4 * (V + 1) * tile * 4)))

    out = pl.pallas_call(
        _fc25_kernel,
        grid=grid,
        in_specs=[
            pl.BlockSpec(memory_space=pltpu.MemorySpace.SMEM),   # w: (25,)
            pl.BlockSpec(memory_space=pltpu.MemorySpace.SMEM),   # b: (1,)
            pl.BlockSpec((1, V, tile), lambda i, j: (i, 0, j)),
        ],
        out_specs=pl.BlockSpec((1, 1, tile), lambda i, j: (i, 0, j)),
        out_shape=jax.ShapeDtypeStruct((B, 1, P_pad), jnp.float32),
        compiler_params=pltpu.CompilerParams(
            dimension_semantics=("parallel", "parallel"),
            vmem_limit_bytes=vmem_limit),
    )(w, b, x_bvp)
    out = out.reshape(B, P_pad)
    return out[:, :P] if P_pad != P else out


# ---------------------------------------------------------------------------
# Pallas kernel 2: fused dual-layer multi-head cross-attention.
#   layer 0 (visual): query = image tokens, key/value = text tokens
#   layer 1 (text)  : query = text tokens,  key/value = image tokens
# One pallas_call, grid = (layer, batch_block).  Per grid step:
#   * query rows and key/value rows are concatenated along M and pushed through
#     ONE fused (E, 3E) bf16 in-projection matmul (scale pre-folded into the Q
#     columns); the unused thirds of each row group are discarded by slicing.
#   * heads are folded into the batch dim; one bf16 QK^T einsum, one softmax,
#     one bf16 PV einsum serve all heads.
#   * the context is re-assembled lane-dense (128 lanes) in registers and fed
#     straight into the bf16 output-projection matmul (no VMEM scratch).
# ---------------------------------------------------------------------------
def _mha_kernel(q_ref, kv_ref, wqkv_ref, bqkv_ref, wo_ref, bo_ref, o_ref):
    _, b_blk, sq, e = q_ref.shape
    sk = kv_ref.shape[2]
    mq = b_blk * sq
    mk = b_blk * sk

    # Fold batch AND both token streams into M: rows [0, mq) are queries (only
    # the Q columns are kept), rows [mq, mq+mk) are key/value tokens (only the
    # K|V columns are kept).  Single bf16 MXU matmul, N = 3E.
    x = jnp.concatenate(
        [q_ref[0].reshape(mq, e), kv_ref[0].reshape(mk, e)], axis=0
    ).astype(jnp.bfloat16)                                           # (mq+mk, E)
    proj = (jnp.dot(x, wqkv_ref[0], preferred_element_type=jnp.float32)
            + bqkv_ref[0])                                           # f32 accum

    # 1/sqrt(head_dim) is pre-folded into the Q columns of w_qkv / b_qkv.
    qp = proj[:mq, :e]            # (mq, E)
    kp = proj[mq:, e:2 * e]       # (mk, E)
    vp = proj[mq:, 2 * e:]        # (mk, E)

    # Fold heads into the batch dim: (H * b_blk, S, HEAD_DIM), bf16 MXU inputs.
    def split_heads(t, s):
        return jnp.concatenate(
            [t[:, h * HEAD_DIM:(h + 1) * HEAD_DIM].reshape(b_blk, s, HEAD_DIM)
             for h in range(NUM_HEADS)], axis=0)

    qh = split_heads(qp, sq).astype(jnp.bfloat16)    # (H*b, sq, Dh)
    kh = split_heads(kp, sk).astype(jnp.bfloat16)    # (H*b, sk, Dh)
    vh = split_heads(vp, sk).astype(jnp.bfloat16)    # (H*b, sk, Dh)

    s = jnp.einsum("bqd,bkd->bqk", qh, kh,
                   preferred_element_type=jnp.float32)               # (H*b, sq, sk)
    s = s - jnp.max(s, axis=-1, keepdims=True)
    p = jnp.exp(s)
    inv = pl.reciprocal(jnp.sum(p, axis=-1, keepdims=True), approx=True)
    p = (p * inv).astype(jnp.bfloat16)
    ctx_h = jnp.einsum("bqk,bkd->bqd", p, vh,
                       preferred_element_type=jnp.float32)           # (H*b, sq, Dh)

    # Re-assemble a lane-dense (b_blk, sq, E) context entirely in registers.
    ctx = jnp.concatenate(
        [ctx_h[h * b_blk:(h + 1) * b_blk] for h in range(NUM_HEADS)], axis=-1)
    ctx2 = ctx.reshape(mq, e).astype(jnp.bfloat16)

    out = (jnp.dot(ctx2, wo_ref[0], preferred_element_type=jnp.float32)
           + bo_ref[0])
    o_ref[0] = out.reshape(b_blk, sq, e).astype(o_ref.dtype)


def _pick_batch_block(bt, rows_per_batch, target_rows):
    """Smallest divisor of bt whose folded M reaches target_rows (else bt)."""
    for d in range(1, bt + 1):
        if bt % d == 0 and d * rows_per_batch >= target_rows:
            return d
    return bt


def dual_cross_attention(q_stacked, kv_stacked, fp):
    """q_stacked/kv_stacked: (2, Bt, S, E) f32 -> (2, Bt, S, E) f32.

    Leading axis 0 selects the attention layer (0 = visual, 1 = text); its
    weight block is chosen by the grid's layer axis, so both layers run in one
    pallas_call and (on v7x) the grid always has >= 2 steps for the 2 cores.
    """
    L, Bt, Sq, E = q_stacked.shape
    Sk = kv_stacked.shape[2]
    b_blk = _pick_batch_block(Bt, Sq + Sk, _mxu_target_rows())
    grid = (L, Bt // b_blk)

    data_map = lambda l, i: (l, i, 0, 0)
    wmap = lambda l, i: (l, 0, 0)

    return pl.pallas_call(
        _mha_kernel,
        grid=grid,
        in_specs=[
            pl.BlockSpec((1, b_blk, Sq, E), data_map),
            pl.BlockSpec((1, b_blk, Sk, E), data_map),
            pl.BlockSpec((1, E, 3 * E), wmap),      # fused in-proj (bf16, Q pre-scaled)
            pl.BlockSpec((1, 1, 3 * E), wmap),      # fused in-proj bias (f32)
            pl.BlockSpec((1, E, E), wmap),          # out-proj weight (bf16)
            pl.BlockSpec((1, 1, E), wmap),          # out-proj bias (f32)
        ],
        out_specs=pl.BlockSpec((1, b_blk, Sq, E), data_map),
        out_shape=jax.ShapeDtypeStruct((L, Bt, Sq, E), jnp.float32),
        compiler_params=pltpu.CompilerParams(
            dimension_semantics=("parallel", "parallel")),
    )(q_stacked, kv_stacked, fp["w_qkv"], fp["b_qkv"], fp["wo"], fp["bo"])


# ---------------------------------------------------------------------------
# Parameter prep: fuse per-layer Q/K/V weights into one (E, 3E) in-projection
# with the 1/sqrt(head_dim) scale folded into the Q columns, and stack the two
# attention layers along a leading axis for the merged pallas_call.
# ---------------------------------------------------------------------------
def fuse_attention_params(visual, text):
    scale = 1.0 / math.sqrt(HEAD_DIM)

    def one(p):
        w_qkv = jnp.concatenate(
            [p["wq"].astype(jnp.float32) * scale,
             p["wk"].astype(jnp.float32),
             p["wv"].astype(jnp.float32)], axis=1).astype(jnp.bfloat16)     # (E, 3E)
        b_qkv = jnp.concatenate(
            [p["bq"] * scale, p["bk"], p["bv"]], axis=0).reshape(1, 3 * EMBED_DIM)
        return w_qkv, b_qkv, p["wo"], p["bo"].reshape(1, EMBED_DIM)

    wv_, bv_, wov, bov = one(visual)
    wt_, bt_, wot, bot = one(text)
    return {
        "w_qkv": jnp.stack([wv_, wt_], axis=0),     # (2, E, 3E) bf16
        "b_qkv": jnp.stack([bv_, bt_], axis=0),     # (2, 1, 3E) f32
        "wo": jnp.stack([wov, wot], axis=0),        # (2, E, E)  bf16
        "bo": jnp.stack([bov, bot], axis=0),        # (2, 1, E)  f32
    }


# ---------------------------------------------------------------------------
# Glue: deterministic stand-in for the external CLIP sub-models.
# TODO(synk): clip_model_satellite / clip_model_streetview are external modules
# passed into MGC.__init__; here they are stubbed with deterministic patch /
# token-embedding projections producing the dict interface MGC.forward uses.
# ---------------------------------------------------------------------------
def clip_stub(images, text_ids, p):
    B, C, H, W = images.shape
    patch_dim = (C * H * W) // S_IMG
    patches = images.reshape(B, S_IMG, patch_dim)
    image_tokens = patches @ p["img_proj"] + p["img_bias"]      # (B, S_IMG, E)
    text_tokens = p["tok_embed"][text_ids]                      # (B, S_TXT, E)
    return {"image_all_tokens": image_tokens, "text_all_tokens": text_tokens}


# ---------------------------------------------------------------------------
# MGC forward (matches the PyTorch control/data flow).
# ---------------------------------------------------------------------------
def mgc_forward(params, images, texts, streetview_images, streetview_texts):
    sat = dict(clip_stub(images, texts, params["clip_sat"]))

    # fc_layer over the 25-view axis WITHOUT the HBM transpose: keep
    # (B, V, C*H*W), reduce the view axis inside the kernel.
    B, V, C, H, W = streetview_images.shape
    x = streetview_images.reshape(B, V, C * H * W)
    sv_img = fc25(x, params["fc_w"], params["fc_b"]).reshape(B, C, H, W)

    street = dict(clip_stub(sv_img, streetview_texts, params["clip_street"]))

    # In-place add in the PyTorch code: satellite image tokens += streetview ones.
    sat["image_all_tokens"] = sat["image_all_tokens"] + street["image_all_tokens"]

    # Each attention layer serves two (query, key/value) pairs with identical
    # weights -> batch sat + street rows together (2B rows per layer), then
    # merge BOTH layers into a single pallas_call via a leading layer axis.
    img_tokens = jnp.concatenate(
        [sat["image_all_tokens"], street["image_all_tokens"]], axis=0)
    txt_tokens = jnp.concatenate(
        [sat["text_all_tokens"], street["text_all_tokens"]], axis=0)

    # TODO(synk): the merged dual-layer call assumes the image and text token
    # sequences have equal length (true for this CLIP stub); unequal lengths
    # would need two separate pallas_calls.
    assert img_tokens.shape[1] == txt_tokens.shape[1]

    q_stacked = jnp.stack([img_tokens, txt_tokens], axis=0)    # layer 0 / 1 query
    kv_stacked = jnp.stack([txt_tokens, img_tokens], axis=0)   # layer 0 / 1 key-value
    attn_out = dual_cross_attention(q_stacked, kv_stacked, params["attn_fused"])
    vis_out, txt_out = attn_out[0], attn_out[1]

    sat["satellite_visual_atten_output"] = vis_out[:B]
    street["streetview_visual_atten_output"] = vis_out[B:]
    sat["satellite_text_atten_output"] = txt_out[:B]
    street["streetview_text_atten_output"] = txt_out[B:]
    return sat, street


# ---------------------------------------------------------------------------
# Pure-JAX reference (f32) used only for a sanity check in __main__.
# ---------------------------------------------------------------------------
def _ref_mha(q, kv, p):
    wq = p["wq"].astype(jnp.float32)
    wk = p["wk"].astype(jnp.float32)
    wv = p["wv"].astype(jnp.float32)
    wo = p["wo"].astype(jnp.float32)
    Q = (q @ wq + p["bq"]) * (1.0 / math.sqrt(HEAD_DIM))
    K = kv @ wk + p["bk"]
    V = kv @ wv + p["bv"]
    Bt, Sq, _ = q.shape
    Sk = kv.shape[1]
    Qh = Q.reshape(Bt, Sq, NUM_HEADS, HEAD_DIM)
    Kh = K.reshape(Bt, Sk, NUM_HEADS, HEAD_DIM)
    Vh = V.reshape(Bt, Sk, NUM_HEADS, HEAD_DIM)
    s = jnp.einsum("bqhd,bkhd->bhqk", Qh, Kh)
    w = jax.nn.softmax(s, axis=-1)
    ctx = jnp.einsum("bhqk,bkhd->bqhd", w, Vh).reshape(Bt, Sq, EMBED_DIM)
    return ctx @ wo + p["bo"]


def mgc_forward_ref(params, images, texts, streetview_images, streetview_texts):
    sat = dict(clip_stub(images, texts, params["clip_sat"]))
    B, V, C, H, W = streetview_images.shape
    x = streetview_images.reshape(B, V, C * H * W)
    sv = jnp.einsum("bvp,v->bp", x, params["fc_w"]) + params["fc_b"][0]
    street = dict(clip_stub(sv.reshape(B, C, H, W), streetview_texts,
                            params["clip_street"]))
    sat["image_all_tokens"] = sat["image_all_tokens"] + street["image_all_tokens"]
    sat["satellite_visual_atten_output"] = _ref_mha(
        sat["image_all_tokens"], sat["text_all_tokens"], params["visual_attn"])
    sat["satellite_text_atten_output"] = _ref_mha(
        sat["text_all_tokens"], sat["image_all_tokens"], params["text_attn"])
    street["streetview_visual_atten_output"] = _ref_mha(
        street["image_all_tokens"], street["text_all_tokens"], params["visual_attn"])
    street["streetview_text_atten_output"] = _ref_mha(
        street["text_all_tokens"], street["image_all_tokens"], params["text_attn"])
    return sat, street


# ---------------------------------------------------------------------------
# Deterministic parameter initialization.
# ---------------------------------------------------------------------------
def init_params(key, patch_dim):
    keys = jax.random.split(key, 16)
    ki = iter(keys)
    s = 1.0 / math.sqrt(EMBED_DIM)

    def attn_params():
        def w():
            return (jax.random.normal(next(ki), (EMBED_DIM, EMBED_DIM),
                                      jnp.float32) * s).astype(jnp.bfloat16)
        return {
            "wq": w(), "wk": w(), "wv": w(), "wo": w(),
            "bq": jnp.full((EMBED_DIM,), 0.01, jnp.float32),
            "bk": jnp.full((EMBED_DIM,), -0.01, jnp.float32),
            "bv": jnp.full((EMBED_DIM,), 0.015, jnp.float32),
            "bo": jnp.full((EMBED_DIM,), 0.02, jnp.float32),
        }

    def clip_params():
        return {
            "img_proj": jax.random.normal(next(ki), (patch_dim, EMBED_DIM),
                                          jnp.float32) / math.sqrt(patch_dim),
            "img_bias": jnp.zeros((EMBED_DIM,), jnp.float32),
            "tok_embed": jax.random.normal(next(ki), (VOCAB, EMBED_DIM),
                                           jnp.float32) * 0.02,
        }

    visual = attn_params()
    text = attn_params()
    return {
        "fc_w": jax.random.normal(next(ki), (NUM_VIEWS,), jnp.float32)
        / math.sqrt(NUM_VIEWS),
        "fc_b": jnp.full((1,), 0.05, jnp.float32),
        "visual_attn": visual,
        "text_attn": text,
        "attn_fused": fuse_attention_params(visual, text),
        "clip_sat": clip_params(),
        "clip_street": clip_params(),
    }


if __name__ == "__main__":
    key = jax.random.PRNGKey(0)
    k_img, k_txt, k_sv, k_svtxt, k_par = jax.random.split(key, 5)

    B, C, H, W = 2, 3, 16, 16
    patch_dim = (C * H * W) // S_IMG

    images = jax.random.normal(k_img, (B, C, H, W), jnp.float32)
    texts = jax.random.randint(k_txt, (B, S_TXT), 0, VOCAB)
    streetview_images = jax.random.normal(k_sv, (B, NUM_VIEWS, C, H, W), jnp.float32)
    streetview_texts = jax.random.randint(k_svtxt, (B, S_TXT), 0, VOCAB)

    params = init_params(k_par, patch_dim)

    sat_out, street_out = jax.jit(mgc_forward)(
        params, images, texts, streetview_images, streetview_texts)
    jax.block_until_ready((sat_out, street_out))

    # Sanity checks against a pure-JAX reference.
    sat_ref, street_ref = mgc_forward_ref(
        params, images, texts, streetview_images, streetview_texts)

    # fc25 path is all-f32: tight tolerance.
    assert float(jnp.max(jnp.abs(street_out["image_all_tokens"]
                                 - street_ref["image_all_tokens"]))) < 1e-3
    # Attention matmuls run bf16 on the MXU: loose tolerance vs the f32 reference.
    for name in ("satellite_visual_atten_output", "satellite_text_atten_output"):
        assert float(jnp.max(jnp.abs(sat_out[name] - sat_ref[name]))) < 0.25, name
    for name in ("streetview_visual_atten_output", "streetview_text_atten_output"):
        assert float(jnp.max(jnp.abs(street_out[name] - street_ref[name]))) < 0.25, name

    assert sat_out["satellite_visual_atten_output"].shape == (B, S_IMG, EMBED_DIM)
    assert sat_out["satellite_text_atten_output"].shape == (B, S_TXT, EMBED_DIM)
    assert street_out["streetview_visual_atten_output"].shape == (B, S_IMG, EMBED_DIM)
    assert street_out["streetview_text_atten_output"].shape == (B, S_TXT, EMBED_DIM)
    print("KERNEL_OK")
</pallas_src>

<mosaic_0001>
module attributes {stable_mosaic.version = 11 : i64} {
  func.func @_fc25_kernel(%arg0: i32, %arg1: i32, %arg2: memref<25xf32, #tpu.memory_space<smem>>, %arg3: memref<1xf32, #tpu.memory_space<smem>>, %arg4: memref<1x25x768xf32, #tpu.memory_space<vmem>>, %arg5: memref<1x1x768xf32, #tpu.memory_space<vmem>>) attributes {dimension_semantics = [#tpu.dimension_semantics<parallel>, #tpu.dimension_semantics<parallel>], iteration_bounds = array<i64: 2, 1>, scalar_prefetch = 0 : i64, scratch_operands = 0 : i64, tpu.core_type = #tpu.core_type<tc>, window_params = [{transform_indices = @transform_0, window_bounds = array<i64: 25>}, {transform_indices = @transform_1, window_bounds = array<i64: 1>}, {transform_indices = @transform_2, window_bounds = array<i64: 1, 25, 768>}, {transform_indices = @transform_3, window_bounds = array<i64: 1, 1, 768>}]} {
    %c0 = arith.constant 0 : index
    %c0_0 = arith.constant 0 : index
    %c0_1 = arith.constant 0 : index
    %0 = vector.load %arg4[%c0, %c0_0, %c0_1] : memref<1x25x768xf32, #tpu.memory_space<vmem>>, vector<1x1x768xf32>
    %1 = vector.shape_cast %0 : vector<1x1x768xf32> to vector<1x768xf32>
    %c0_2 = arith.constant 0 : index
    %2 = memref.load %arg2[%c0_2] : memref<25xf32, #tpu.memory_space<smem>>
    %3 = vector.broadcast %2 : f32 to vector<1x768xf32>
    %4 = arith.mulf %1, %3 : vector<1x768xf32>
    %c0_3 = arith.constant 0 : index
    %c1 = arith.constant 1 : index
    %c0_4 = arith.constant 0 : index
    %5 = vector.load %arg4[%c0_3, %c1, %c0_4] : memref<1x25x768xf32, #tpu.memory_space<vmem>>, vector<1x1x768xf32>
    %6 = vector.shape_cast %5 : vector<1x1x768xf32> to vector<1x768xf32>
    %c1_5 = arith.constant 1 : index
    %7 = memref.load %arg2[%c1_5] : memref<25xf32, #tpu.memory_space<smem>>
    %8 = vector.broadcast %7 : f32 to vector<1x768xf32>
    %9 = arith.mulf %6, %8 : vector<1x768xf32>
    %10 = arith.addf %4, %9 : vector<1x768xf32>
    %c0_6 = arith.constant 0 : index
    %c2 = arith.constant 2 : index
    %c0_7 = arith.constant 0 : index
    %11 = vector.load %arg4[%c0_6, %c2, %c0_7] : memref<1x25x768xf32, #tpu.memory_space<vmem>>, vector<1x1x768xf32>
    %12 = vector.shape_cast %11 : vector<1x1x768xf32> to vector<1x768xf32>
    %c2_8 = arith.constant 2 : index
    %13 = memref.load %arg2[%c2_8] : memref<25xf32, #tpu.memory_space<smem>>
    %14 = vector.broadcast %13 : f32 to vector<1x768xf32>
    %15 = arith.mulf %12, %14 : vector<1x768xf32>
    %16 = arith.addf %10, %15 : vector<1x768xf32>
    %c0_9 = arith.constant 0 : index
    %c3 = arith.constant 3 : index
    %c0_10 = arith.constant 0 : index
    %17 = vector.load %arg4[%c0_9, %c3, %c0_10] : memref<1x25x768xf32, #tpu.memory_space<vmem>>, vector<1x1x768xf32>
    %18 = vector.shape_cast %17 : vector<1x1x768xf32> to vector<1x768xf32>
    %c3_11 = arith.constant 3 : index
    %19 = memref.load %arg2[%c3_11] : memref<25xf32, #tpu.memory_space<smem>>
    %20 = vector.broadcast %19 : f32 to vector<1x768xf32>
    %21 = arith.mulf %18, %20 : vector<1x768xf32>
    %22 = arith.addf %16, %21 : vector<1x768xf32>
    %c0_12 = arith.constant 0 : index
    %c4 = arith.constant 4 : index
    %c0_13 = arith.constant 0 : index
    %23 = vector.load %arg4[%c0_12, %c4, %c0_13] : memref<1x25x768xf32, #tpu.memory_space<vmem>>, vector<1x1x768xf32>
    %24 = vector.shape_cast %23 : vector<1x1x768xf32> to vector<1x768xf32>
    %c4_14 = arith.constant 4 : index
    %25 = memref.load %arg2[%c4_14] : memref<25xf32, #tpu.memory_space<smem>>
    %26 = vector.broadcast %25 : f32 to vector<1x768xf32>
    %27 = arith.mulf %24, %26 : vector<1x768xf32>
    %28 = arith.addf %22, %27 : vector<1x768xf32>
    %c0_15 = arith.constant 0 : index
    %c5 = arith.constant 5 : index
    %c0_16 = arith.constant 0 : index
    %29 = vector.load %arg4[%c0_15, %c5, %c0_16] : memref<1x25x768xf32, #tpu.memory_space<vmem>>, vector<1x1x768xf32>
    %30 = vector.shape_cast %29 : vector<1x1x768xf32> to vector<1x768xf32>
    %c5_17 = arith.constant 5 : index
    %31 = memref.load %arg2[%c5_17] : memref<25xf32, #tpu.memory_space<smem>>
    %32 = vector.broadcast %31 : f32 to vector<1x768xf32>
    %33 = arith.mulf %30, %32 : vector<1x768xf32>
    %34 = arith.addf %28, %33 : vector<1x768xf32>
    %c0_18 = arith.constant 0 : index
    %c6 = arith.constant 6 : index
    %c0_19 = arith.constant 0 : index
    %35 = vector.load %arg4[%c0_18, %c6, %c0_19] : memref<1x25x768xf32, #tpu.memory_space<vmem>>, vector<1x1x768xf32>
    %36 = vector.shape_cast %35 : vector<1x1x768xf32> to vector<1x768xf32>
    %c6_20 = arith.constant 6 : index
    %37 = memref.load %arg2[%c6_20] : memref<25xf32, #tpu.memory_space<smem>>
    %38 = vector.broadcast %37 : f32 to vector<1x768xf32>
    %39 = arith.mulf %36, %38 : vector<1x768xf32>
    %40 = arith.addf %34, %39 : vector<1x768xf32>
    %c0_21 = arith.constant 0 : index
    %c7 = arith.constant 7 : index
    %c0_22 = arith.constant 0 : index
    %41 = vector.load %arg4[%c0_21, %c7, %c0_22] : memref<1x25x768xf32, #tpu.memory_space<vmem>>, vector<1x1x768xf32>
    %42 = vector.shape_cast %41 : vector<1x1x768xf32> to vector<1x768xf32>
    %c7_23 = arith.constant 7 : index
    %43 = memref.load %arg2[%c7_23] : memref<25xf32, #tpu.memory_space<smem>>
    %44 = vector.broadcast %43 : f32 to vector<1x768xf32>
    %45 = arith.mulf %42, %44 : vector<1x768xf32>
    %46 = arith.addf %40, %45 : vector<1x768xf32>
    %c0_24 = arith.constant 0 : index
    %c8 = arith.constant 8 : index
    %c0_25 = arith.constant 0 : index
    %47 = vector.load %arg4[%c0_24, %c8, %c0_25] : memref<1x25x768xf32, #tpu.memory_space<vmem>>, vector<1x1x768xf32>
    %48 = vector.shape_cast %47 : vector<1x1x768xf32> to vector<1x768xf32>
    %c8_26 = arith.constant 8 : index
    %49 = memref.load %arg2[%c8_26] : memref<25xf32, #tpu.memory_space<smem>>
    %50 = vector.broadcast %49 : f32 to vector<1x768xf32>
    %51 = arith.mulf %48, %50 : vector<1x768xf32>
    %52 = arith.addf %46, %51 : vector<1x768xf32>
    %c0_27 = arith.constant 0 : index
    %c9 = arith.constant 9 : index
    %c0_28 = arith.constant 0 : index
    %53 = vector.load %arg4[%c0_27, %c9, %c0_28] : memref<1x25x768xf32, #tpu.memory_space<vmem>>, vector<1x1x768xf32>
    %54 = vector.shape_cast %53 : vector<1x1x768xf32> to vector<1x768xf32>
    %c9_29 = arith.constant 9 : index
    %55 = memref.load %arg2[%c9_29] : memref<25xf32, #tpu.memory_space<smem>>
    %56 = vector.broadcast %55 : f32 to vector<1x768xf32>
    %57 = arith.mulf %54, %56 : vector<1x768xf32>
    %58 = arith.addf %52, %57 : vector<1x768xf32>
    %c0_30 = arith.constant 0 : index
    %c10 = arith.constant 10 : index
    %c0_31 = arith.constant 0 : index
    %59 = vector.load %arg4[%c0_30, %c10, %c0_31] : memref<1x25x768xf32, #tpu.memory_space<vmem>>, vector<1x1x768xf32>
    %60 = vector.shape_cast %59 : vector<1x1x768xf32> to vector<1x768xf32>
    %c10_32 = arith.constant 10 : index
    %61 = memref.load %arg2[%c10_32] : memref<25xf32, #tpu.memory_space<smem>>
    %62 = vector.broadcast %61 : f32 to vector<1x768xf32>
    %63 = arith.mulf %60, %62 : vector<1x768xf32>
    %64 = arith.addf %58, %63 : vector<1x768xf32>
    %c0_33 = arith.constant 0 : index
    %c11 = arith.constant 11 : index
    %c0_34 = arith.constant 0 : index
    %65 = vector.load %arg4[%c0_33, %c11, %c0_34] : memref<1x25x768xf32, #tpu.memory_space<vmem>>, vector<1x1x768xf32>
    %66 = vector.shape_cast %65 : vector<1x1x768xf32> to vector<1x768xf32>
    %c11_35 = arith.constant 11 : index
    %67 = memref.load %arg2[%c11_35] : memref<25xf32, #tpu.memory_space<smem>>
    %68 = vector.broadcast %67 : f32 to vector<1x768xf32>
    %69 = arith.mulf %66, %68 : vector<1x768xf32>
    %70 = arith.addf %64, %69 : vector<1x768xf32>
    %c0_36 = arith.constant 0 : index
    %c12 = arith.constant 12 : index
    %c0_37 = arith.constant 0 : index
    %71 = vector.load %arg4[%c0_36, %c12, %c0_37] : memref<1x25x768xf32, #tpu.memory_space<vmem>>, vector<1x1x768xf32>
    %72 = vector.shape_cast %71 : vector<1x1x768xf32> to vector<1x768xf32>
    %c12_38 = arith.constant 12 : index
    %73 = memref.load %arg2[%c12_38] : memref<25xf32, #tpu.memory_space<smem>>
    %74 = vector.broadcast %73 : f32 to vector<1x768xf32>
    %75 = arith.mulf %72, %74 : vector<1x768xf32>
    %76 = arith.addf %70, %75 : vector<1x768xf32>
    %c0_39 = arith.constant 0 : index
    %c13 = arith.constant 13 : index
    %c0_40 = arith.constant 0 : index
    %77 = vector.load %arg4[%c0_39, %c13, %c0_40] : memref<1x25x768xf32, #tpu.memory_space<vmem>>, vector<1x1x768xf32>
    %78 = vector.shape_cast %77 : vector<1x1x768xf32> to vector<1x768xf32>
    %c13_41 = arith.constant 13 : index
    %79 = memref.load %arg2[%c13_41] : memref<25xf32, #tpu.memory_space<smem>>
    %80 = vector.broadcast %79 : f32 to vector<1x768xf32>
    %81 = arith.mulf %78, %80 : vector<1x768xf32>
    %82 = arith.addf %76, %81 : vector<1x768xf32>
    %c0_42 = arith.constant 0 : index
    %c14 = arith.constant 14 : index
    %c0_43 = arith.constant 0 : index
    %83 = vector.load %arg4[%c0_42, %c14, %c0_43] : memref<1x25x768xf32, #tpu.memory_space<vmem>>, vector<1x1x768xf32>
    %84 = vector.shape_cast %83 : vector<1x1x768xf32> to vector<1x768xf32>
    %c14_44 = arith.constant 14 : index
    %85 = memref.load %arg2[%c14_44] : memref<25xf32, #tpu.memory_space<smem>>
    %86 = vector.broadcast %85 : f32 to vector<1x768xf32>
    %87 = arith.mulf %84, %86 : vector<1x768xf32>
    %88 = arith.addf %82, %87 : vector<1x768xf32>
    %c0_45 = arith.constant 0 : index
    %c15 = arith.constant 15 : index
    %c0_46 = arith.constant 0 : index
    %89 = vector.load %arg4[%c0_45, %c15, %c0_46] : memref<1x25x768xf32, #tpu.memory_space<vmem>>, vector<1x1x768xf32>
    %90 = vector.shape_cast %89 : vector<1x1x768xf32> to vector<1x768xf32>
    %c15_47 = arith.constant 15 : index
    %91 = memref.load %arg2[%c15_47] : memref<25xf32, #tpu.memory_space<smem>>
    %92 = vector.broadcast %91 : f32 to vector<1x768xf32>
    %93 = arith.mulf %90, %92 : vector<1x768xf32>
    %94 = arith.addf %88, %93 : vector<1x768xf32>
    %c0_48 = arith.constant 0 : index
    %c16 = arith.constant 16 : index
    %c0_49 = arith.constant 0 : index
    %95 = vector.load %arg4[%c0_48, %c16, %c0_49] : memref<1x25x768xf32, #tpu.memory_space<vmem>>, vector<1x1x768xf32>
    %96 = vector.shape_cast %95 : vector<1x1x768xf32> to vector<1x768xf32>
    %c16_50 = arith.constant 16 : index
    %97 = memref.load %arg2[%c16_50] : memref<25xf32, #tpu.memory_space<smem>>
    %98 = vector.broadcast %97 : f32 to vector<1x768xf32>
    %99 = arith.mulf %96, %98 : vector<1x768xf32>
    %100 = arith.addf %94, %99 : vector<1x768xf32>
    %c0_51 = arith.constant 0 : index
    %c17 = arith.constant 17 : index
    %c0_52 = arith.constant 0 : index
    %101 = vector.load %arg4[%c0_51, %c17, %c0_52] : memref<1x25x768xf32, #tpu.memory_space<vmem>>, vector<1x1x768xf32>
    %102 = vector.shape_cast %101 : vector<1x1x768xf32> to vector<1x768xf32>
    %c17_53 = arith.constant 17 : index
    %103 = memref.load %arg2[%c17_53] : memref<25xf32, #tpu.memory_space<smem>>
    %104 = vector.broadcast %103 : f32 to vector<1x768xf32>
    %105 = arith.mulf %102, %104 : vector<1x768xf32>
    %106 = arith.addf %100, %105 : vector<1x768xf32>
    %c0_54 = arith.constant 0 : index
    %c18 = arith.constant 18 : index
    %c0_55 = arith.constant 0 : index
    %107 = vector.load %arg4[%c0_54, %c18, %c0_55] : memref<1x25x768xf32, #tpu.memory_space<vmem>>, vector<1x1x768xf32>
    %108 = vector.shape_cast %107 : vector<1x1x768xf32> to vector<1x768xf32>
    %c18_56 = arith.constant 18 : index
    %109 = memref.load %arg2[%c18_56] : memref<25xf32, #tpu.memory_space<smem>>
    %110 = vector.broadcast %109 : f32 to vector<1x768xf32>
    %111 = arith.mulf %108, %110 : vector<1x768xf32>
    %112 = arith.addf %106, %111 : vector<1x768xf32>
    %c0_57 = arith.constant 0 : index
    %c19 = arith.constant 19 : index
    %c0_58 = arith.constant 0 : index
    %113 = vector.load %arg4[%c0_57, %c19, %c0_58] : memref<1x25x768xf32, #tpu.memory_space<vmem>>, vector<1x1x768xf32>
    %114 = vector.shape_cast %113 : vector<1x1x768xf32> to vector<1x768xf32>
    %c19_59 = arith.constant 19 : index
    %115 = memref.load %arg2[%c19_59] : memref<25xf32, #tpu.memory_space<smem>>
    %116 = vector.broadcast %115 : f32 to vector<1x768xf32>
    %117 = arith.mulf %114, %116 : vector<1x768xf32>
    %118 = arith.addf %112, %117 : vector<1x768xf32>
    %c0_60 = arith.constant 0 : index
    %c20 = arith.constant 20 : index
    %c0_61 = arith.constant 0 : index
    %119 = vector.load %arg4[%c0_60, %c20, %c0_61] : memref<1x25x768xf32, #tpu.memory_space<vmem>>, vector<1x1x768xf32>
    %120 = vector.shape_cast %119 : vector<1x1x768xf32> to vector<1x768xf32>
    %c20_62 = arith.constant 20 : index
    %121 = memref.load %arg2[%c20_62] : memref<25xf32, #tpu.memory_space<smem>>
    %122 = vector.broadcast %121 : f32 to vector<1x768xf32>
    %123 = arith.mulf %120, %122 : vector<1x768xf32>
    %124 = arith.addf %118, %123 : vector<1x768xf32>
    %c0_63 = arith.constant 0 : index
    %c21 = arith.constant 21 : index
    %c0_64 = arith.constant 0 : index
    %125 = vector.load %arg4[%c0_63, %c21, %c0_64] : memref<1x25x768xf32, #tpu.memory_space<vmem>>, vector<1x1x768xf32>
    %126 = vector.shape_cast %125 : vector<1x1x768xf32> to vector<1x768xf32>
    %c21_65 = arith.constant 21 : index
    %127 = memref.load %arg2[%c21_65] : memref<25xf32, #tpu.memory_space<smem>>
    %128 = vector.broadcast %127 : f32 to vector<1x768xf32>
    %129 = arith.mulf %126, %128 : vector<1x768xf32>
    %130 = arith.addf %124, %129 : vector<1x768xf32>
    %c0_66 = arith.constant 0 : index
    %c22 = arith.constant 22 : index
    %c0_67 = arith.constant 0 : index
    %131 = vector.load %arg4[%c0_66, %c22, %c0_67] : memref<1x25x768xf32, #tpu.memory_space<vmem>>, vector<1x1x768xf32>
    %132 = vector.shape_cast %131 : vector<1x1x768xf32> to vector<1x768xf32>
    %c22_68 = arith.constant 22 : index
    %133 = memref.load %arg2[%c22_68] : memref<25xf32, #tpu.memory_space<smem>>
    %134 = vector.broadcast %133 : f32 to vector<1x768xf32>
    %135 = arith.mulf %132, %134 : vector<1x768xf32>
    %136 = arith.addf %130, %135 : vector<1x768xf32>
    %c0_69 = arith.constant 0 : index
    %c23 = arith.constant 23 : index
    %c0_70 = arith.constant 0 : index
    %137 = vector.load %arg4[%c0_69, %c23, %c0_70] : memref<1x25x768xf32, #tpu.memory_space<vmem>>, vector<1x1x768xf32>
    %138 = vector.shape_cast %137 : vector<1x1x768xf32> to vector<1x768xf32>
    %c23_71 = arith.constant 23 : index
    %139 = memref.load %arg2[%c23_71] : memref<25xf32, #tpu.memory_space<smem>>
    %140 = vector.broadcast %139 : f32 to vector<1x768xf32>
    %141 = arith.mulf %138, %140 : vector<1x768xf32>
    %142 = arith.addf %136, %141 : vector<1x768xf32>
    %c0_72 = arith.constant 0 : index
    %c24 = arith.constant 24 : index
    %c0_73 = arith.constant 0 : index
    %143 = vector.load %arg4[%c0_72, %c24, %c0_73] : memref<1x25x768xf32, #tpu.memory_space<vmem>>, vector<1x1x768xf32>
    %144 = vector.shape_cast %143 : vector<1x1x768xf32> to vector<1x768xf32>
    %c24_74 = arith.constant 24 : index
    %145 = memref.load %arg2[%c24_74] : memref<25xf32, #tpu.memory_space<smem>>
    %146 = vector.broadcast %145 : f32 to vector<1x768xf32>
    %147 = arith.mulf %144, %146 : vector<1x768xf32>
    %148 = arith.addf %142, %147 : vector<1x768xf32>
    %c0_75 = arith.constant 0 : index
    %149 = memref.load %arg3[%c0_75] : memref<1xf32, #tpu.memory_space<smem>>
    %150 = vector.broadcast %149 : f32 to vector<1x768xf32>
    %151 = arith.addf %148, %150 : vector<1x768xf32>
    %c0_76 = arith.constant 0 : index
    %c0_77 = arith.constant 0 : index
    %c0_78 = arith.constant 0 : index
    %152 = vector.load %arg5[%c0_76, %c0_77, %c0_78] : memref<1x1x768xf32, #tpu.memory_space<vmem>>, vector<1x1x768xf32>
    %153 = vector.shape_cast %152 : vector<1x1x768xf32> to vector<1x768xf32>
    %154 = vector.shape_cast %151 : vector<1x768xf32> to vector<1x1x768xf32>
    tpu.vector_store %arg5[%c0_76, %c0_77, %c0_78], %154 {strides = array<i32>} : memref<1x1x768xf32, #tpu.memory_space<vmem>>, vector<1x1x768xf32>,
    return
  }
  func.func @transform_0(%arg0: i32, %arg1: i32) -> i32 {
    %c0_i32 = arith.constant 0 : i32
    %c0_i32_0 = arith.constant 0 : i32
    return %c0_i32 : i32
  }
  func.func @transform_1(%arg0: i32, %arg1: i32) -> i32 {
    %c0_i32 = arith.constant 0 : i32
    %c0_i32_0 = arith.constant 0 : i32
    return %c0_i32 : i32
  }
  func.func @transform_2(%arg0: i32, %arg1: i32) -> (i32, i32, i32) {
    %c0_i32 = arith.constant 0 : i32
    %c0_i32_0 = arith.constant 0 : i32
    return %arg0, %c0_i32, %arg1 : i32, i32, i32
  }
  func.func @transform_3(%arg0: i32, %arg1: i32) -> (i32, i32, i32) {
    %c0_i32 = arith.constant 0 : i32
    %c0_i32_0 = arith.constant 0 : i32
    return %arg0, %c0_i32, %arg1 : i32, i32, i32
  }
}

module attributes {stable_mosaic.version = 11 : i64} {
  func.func @_mha_kernel(%arg0: i32, %arg1: i32, %arg2: memref<1x4x8x128xf32, #tpu.memory_space<vmem>>, %arg3: memref<1x4x8x128xf32, #tpu.memory_space<vmem>>, %arg4: memref<1x128x384xbf16, #tpu.memory_space<vmem>>, %arg5: memref<1x1x384xf32, #tpu.memory_space<vmem>>, %arg6: memref<1x128x128xbf16, #tpu.memory_space<vmem>>, %arg7: memref<1x1x128xf32, #tpu.memory_space<vmem>>, %arg8: memref<1x4x8x128xf32, #tpu.memory_space<vmem>>) attributes {dimension_semantics = [#tpu.dimension_semantics<parallel>, #tpu.dimension_semantics<parallel>], iteration_bounds = array<i64: 2, 1>, scalar_prefetch = 0 : i64, scratch_operands = 0 : i64, tpu.core_type = #tpu.core_type<tc>, window_params = [{transform_indices = @transform_0, window_bounds = array<i64: 1, 4, 8, 128>}, {transform_indices = @transform_1, window_bounds = array<i64: 1, 4, 8, 128>}, {transform_indices = @transform_2, window_bounds = array<i64: 1, 128, 384>}, {transform_indices = @transform_3, window_bounds = array<i64: 1, 1, 384>}, {transform_indices = @transform_4, window_bounds = array<i64: 1, 128, 128>}, {transform_indices = @transform_5, window_bounds = array<i64: 1, 1, 128>}, {transform_indices = @transform_6, window_bounds = array<i64: 1, 4, 8, 128>}]} {
    %c0 = arith.constant 0 : index
    %c0_0 = arith.constant 0 : index
    %c0_1 = arith.constant 0 : index
    %c0_2 = arith.constant 0 : index
    %0 = vector.load %arg2[%c0, %c0_0, %c0_1, %c0_2] : memref<1x4x8x128xf32, #tpu.memory_space<vmem>>, vector<1x4x8x128xf32>
    %1 = vector.shape_cast %0 : vector<1x4x8x128xf32> to vector<4x8x128xf32>
    %2 = vector.shape_cast %1 : vector<4x8x128xf32> to vector<32x128xf32>
    %c0_3 = arith.constant 0 : index
    %c0_4 = arith.constant 0 : index
    %c0_5 = arith.constant 0 : index
    %c0_6 = arith.constant 0 : index
    %3 = vector.load %arg3[%c0_3, %c0_4, %c0_5, %c0_6] : memref<1x4x8x128xf32, #tpu.memory_space<vmem>>, vector<1x4x8x128xf32>
    %4 = vector.shape_cast %3 : vector<1x4x8x128xf32> to vector<4x8x128xf32>
    %5 = vector.shape_cast %4 : vector<4x8x128xf32> to vector<32x128xf32>
    %6 = tpu.concatenate %2, %5 in 0 : vector<32x128xf32>, vector<32x128xf32> -> vector<64x128xf32>
    %7 = arith.truncf %6 : vector<64x128xf32> to vector<64x128xbf16>
    %c0_7 = arith.constant 0 : index
    %c0_8 = arith.constant 0 : index
    %c0_9 = arith.constant 0 : index
    %8 = vector.load %arg4[%c0_7, %c0_8, %c0_9] : memref<1x128x384xbf16, #tpu.memory_space<vmem>>, vector<1x128x384xbf16>
    %9 = vector.shape_cast %8 : vector<1x128x384xbf16> to vector<128x384xbf16>
    %cst = arith.constant dense<0.000000e+00> : vector<64x384xf32>
    %10 = tpu.matmul %7, %9, %cst {dimension_numbers = #tpu.dot_dimension_numbers<[1], [0], [0], [1], [0, 0, 1, 1], [], []>} : vector<64x128xbf16>, vector<128x384xbf16>, vector<64x384xf32> -> vector<64x384xf32>
    %c0_10 = arith.constant 0 : index
    %c0_11 = arith.constant 0 : index
    %c0_12 = arith.constant 0 : index
    %11 = vector.load %arg5[%c0_10, %c0_11, %c0_12] : memref<1x1x384xf32, #tpu.memory_space<vmem>>, vector<1x1x384xf32>
    %12 = vector.shape_cast %11 : vector<1x1x384xf32> to vector<1x384xf32>
    %13 = vector.broadcast %12 : vector<1x384xf32> to vector<64x384xf32>
    %14 = arith.addf %10, %13 : vector<64x384xf32>
    %15 = vector.extract_strided_slice %14 {offsets = [0, 0], sizes = [32, 128], strides = [1, 1]} : vector<64x384xf32> to vector<32x128xf32>
    %16 = vector.extract_strided_slice %14 {offsets = [32, 128], sizes = [32, 128], strides = [1, 1]} : vector<64x384xf32> to vector<32x128xf32>
    %17 = vector.extract_strided_slice %14 {offsets = [32, 256], sizes = [32, 128], strides = [1, 1]} : vector<64x384xf32> to vector<32x128xf32>
    %18 = vector.extract_strided_slice %15 {offsets = [0, 0], sizes = [32, 16], strides = [1, 1]} : vector<32x128xf32> to vector<32x16xf32>
    %19 = vector.shape_cast %18 : vector<32x16xf32> to vector<4x8x16xf32>
    %20 = vector.extract_strided_slice %15 {offsets = [0, 16], sizes = [32, 16], strides = [1, 1]} : vector<32x128xf32> to vector<32x16xf32>
    %21 = vector.shape_cast %20 : vector<32x16xf32> to vector<4x8x16xf32>
    %22 = vector.extract_strided_slice %15 {offsets = [0, 32], sizes = [32, 16], strides = [1, 1]} : vector<32x128xf32> to vector<32x16xf32>
    %23 = vector.shape_cast %22 : vector<32x16xf32> to vector<4x8x16xf32>
    %24 = vector.extract_strided_slice %15 {offsets = [0, 48], sizes = [32, 16], strides = [1, 1]} : vector<32x128xf32> to vector<32x16xf32>
    %25 = vector.shape_cast %24 : vector<32x16xf32> to vector<4x8x16xf32>
    %26 = vector.extract_strided_slice %15 {offsets = [0, 64], sizes = [32, 16], strides = [1, 1]} : vector<32x128xf32> to vector<32x16xf32>
    %27 = vector.shape_cast %26 : vector<32x16xf32> to vector<4x8x16xf32>
    %28 = vector.extract_strided_slice %15 {offsets = [0, 80], sizes = [32, 16], strides = [1, 1]} : vector<32x128xf32> to vector<32x16xf32>
    %29 = vector.shape_cast %28 : vector<32x16xf32> to vector<4x8x16xf32>
    %30 = vector.extract_strided_slice %15 {offsets = [0, 96], sizes = [32, 16], strides = [1, 1]} : vector<32x128xf32> to vector<32x16xf32>
    %31 = vector.shape_cast %30 : vector<32x16xf32> to vector<4x8x16xf32>
    %32 = vector.extract_strided_slice %15 {offsets = [0, 112], sizes = [32, 16], strides = [1, 1]} : vector<32x128xf32> to vector<32x16xf32>
    %33 = vector.shape_cast %32 : vector<32x16xf32> to vector<4x8x16xf32>
    %34 = tpu.concatenate %19, %21, %23, %25, %27, %29, %31, %33 in 0 : vector<4x8x16xf32>, vector<4x8x16xf32>, vector<4x8x16xf32>, vector<4x8x16xf32>, vector<4x8x16xf32>, vector<4x8x16xf32>, vector<4x8x16xf32>, vector<4x8x16xf32> -> vector<32x8x16xf32>
    %35 = arith.truncf %34 : vector<32x8x16xf32> to vector<32x8x16xbf16>
    %36 = vector.extract_strided_slice %16 {offsets = [0, 0], sizes = [32, 16], strides = [1, 1]} : vector<32x128xf32> to vector<32x16xf32>
    %37 = vector.shape_cast %36 : vector<32x16xf32> to vector<4x8x16xf32>
    %38 = vector.extract_strided_slice %16 {offsets = [0, 16], sizes = [32, 16], strides = [1, 1]} : vector<32x128xf32> to vector<32x16xf32>
    %39 = vector.shape_cast %38 : vector<32x16xf32> to vector<4x8x16xf32>
    %40 = vector.extract_strided_slice %16 {offsets = [0, 32], sizes = [32, 16], strides = [1, 1]} : vector<32x128xf32> to vector<32x16xf32>
    %41 = vector.shape_cast %40 : vector<32x16xf32> to vector<4x8x16xf32>
    %42 = vector.extract_strided_slice %16 {offsets = [0, 48], sizes = [32, 16], strides = [1, 1]} : vector<32x128xf32> to vector<32x16xf32>
    %43 = vector.shape_cast %42 : vector<32x16xf32> to vector<4x8x16xf32>
    %44 = vector.extract_strided_slice %16 {offsets = [0, 64], sizes = [32, 16], strides = [1, 1]} : vector<32x128xf32> to vector<32x16xf32>
    %45 = vector.shape_cast %44 : vector<32x16xf32> to vector<4x8x16xf32>
    %46 = vector.extract_strided_slice %16 {offsets = [0, 80], sizes = [32, 16], strides = [1, 1]} : vector<32x128xf32> to vector<32x16xf32>
    %47 = vector.shape_cast %46 : vector<32x16xf32> to vector<4x8x16xf32>
    %48 = vector.extract_strided_slice %16 {offsets = [0, 96], sizes = [32, 16], strides = [1, 1]} : vector<32x128xf32> to vector<32x16xf32>
    %49 = vector.shape_cast %48 : vector<32x16xf32> to vector<4x8x16xf32>
    %50 = vector.extract_strided_slice %16 {offsets = [0, 112], sizes = [32, 16], strides = [1, 1]} : vector<32x128xf32> to vector<32x16xf32>
    %51 = vector.shape_cast %50 : vector<32x16xf32> to vector<4x8x16xf32>
    %52 = tpu.concatenate %37, %39, %41, %43, %45, %47, %49, %51 in 0 : vector<4x8x16xf32>, vector<4x8x16xf32>, vector<4x8x16xf32>, vector<4x8x16xf32>, vector<4x8x16xf32>, vector<4x8x16xf32>, vector<4x8x16xf32>, vector<4x8x16xf32> -> vector<32x8x16xf32>
    %53 = arith.truncf %52 : vector<32x8x16xf32> to vector<32x8x16xbf16>
    %54 = vector.extract_strided_slice %17 {offsets = [0, 0], sizes = [32, 16], strides = [1, 1]} : vector<32x128xf32> to vector<32x16xf32>
    %55 = vector.shape_cast %54 : vector<32x16xf32> to vector<4x8x16xf32>
    %56 = vector.extract_strided_slice %17 {offsets = [0, 16], sizes = [32, 16], strides = [1, 1]} : vector<32x128xf32> to vector<32x16xf32>
    %57 = vector.shape_cast %56 : vector<32x16xf32> to vector<4x8x16xf32>
    %58 = vector.extract_strided_slice %17 {offsets = [0, 32], sizes = [32, 16], strides = [1, 1]} : vector<32x128xf32> to vector<32x16xf32>
    %59 = vector.shape_cast %58 : vector<32x16xf32> to vector<4x8x16xf32>
    %60 = vector.extract_strided_slice %17 {offsets = [0, 48], sizes = [32, 16], strides = [1, 1]} : vector<32x128xf32> to vector<32x16xf32>
    %61 = vector.shape_cast %60 : vector<32x16xf32> to vector<4x8x16xf32>
    %62 = vector.extract_strided_slice %17 {offsets = [0, 64], sizes = [32, 16], strides = [1, 1]} : vector<32x128xf32> to vector<32x16xf32>
    %63 = vector.shape_cast %62 : vector<32x16xf32> to vector<4x8x16xf32>
    %64 = vector.extract_strided_slice %17 {offsets = [0, 80], sizes = [32, 16], strides = [1, 1]} : vector<32x128xf32> to vector<32x16xf32>
    %65 = vector.shape_cast %64 : vector<32x16xf32> to vector<4x8x16xf32>
    %66 = vector.extract_strided_slice %17 {offsets = [0, 96], sizes = [32, 16], strides = [1, 1]} : vector<32x128xf32> to vector<32x16xf32>
    %67 = vector.shape_cast %66 : vector<32x16xf32> to vector<4x8x16xf32>
    %68 = vector.extract_strided_slice %17 {offsets = [0, 112], sizes = [32, 16], strides = [1, 1]} : vector<32x128xf32> to vector<32x16xf32>
    %69 = vector.shape_cast %68 : vector<32x16xf32> to vector<4x8x16xf32>
    %70 = tpu.concatenate %55, %57, %59, %61, %63, %65, %67, %69 in 0 : vector<4x8x16xf32>, vector<4x8x16xf32>, vector<4x8x16xf32>, vector<4x8x16xf32>, vector<4x8x16xf32>, vector<4x8x16xf32>, vector<4x8x16xf32>, vector<4x8x16xf32> -> vector<32x8x16xf32>
    %71 = arith.truncf %70 : vector<32x8x16xf32> to vector<32x8x16xbf16>
    "tpu.trace_start"() <{level = 10 : i32, message = "bqd,bkd->bqk"}> : () -> ()
    %cst_13 = arith.constant dense<0.000000e+00> : vector<32x8x8xf32>
    %72 = tpu.matmul %35, %53, %cst_13 {dimension_numbers = #tpu.dot_dimension_numbers<[2], [2], [1], [1], [0, 0, 0, 1, 1, 1], [0], [0]>} : vector<32x8x16xbf16>, vector<32x8x16xbf16>, vector<32x8x8xf32> -> vector<32x8x8xf32>
    "tpu.trace_stop"() : () -> ()
    %cst_14 = arith.constant dense<0xFF800000> : vector<32x8xf32>
    %73 = vector.multi_reduction <maximumf>, %72, %cst_14 [2] : vector<32x8x8xf32> to vector<32x8xf32>
    %74 = vector.shape_cast %73 : vector<32x8xf32> to vector<32x8x1xf32>
    %75 = vector.broadcast %74 : vector<32x8x1xf32> to vector<32x8x8xf32>
    %76 = arith.subf %72, %75 : vector<32x8x8xf32>
    %77 = math.exp %76 : vector<32x8x8xf32>
    %cst_15 = arith.constant dense<0.000000e+00> : vector<32x8xf32>
    %78 = vector.multi_reduction <add>, %77, %cst_15 [2] : vector<32x8x8xf32> to vector<32x8xf32>
    %79 = vector.shape_cast %78 : vector<32x8xf32> to vector<32x8x1xf32>
    %80 = tpu.reciprocal %79 {approx = true} : vector<32x8x1xf32> -> vector<32x8x1xf32>
    %81 = vector.broadcast %80 : vector<32x8x1xf32> to vector<32x8x8xf32>
    %82 = arith.mulf %77, %81 : vector<32x8x8xf32>
    %83 = arith.truncf %82 : vector<32x8x8xf32> to vector<32x8x8xbf16>
    "tpu.trace_start"() <{level = 10 : i32, message = "bqk,bkd->bqd"}> : () -> ()
    %cst_16 = arith.constant dense<0.000000e+00> : vector<32x8x16xf32>
    %84 = tpu.matmul %83, %71, %cst_16 {dimension_numbers = #tpu.dot_dimension_numbers<[2], [1], [1], [2], [0, 0, 0, 1, 1, 2], [0], [0]>} : vector<32x8x8xbf16>, vector<32x8x16xbf16>, vector<32x8x16xf32> -> vector<32x8x16xf32>
    "tpu.trace_stop"() : () -> ()
    %85 = vector.extract_strided_slice %84 {offsets = [0, 0, 0], sizes = [4, 8, 16], strides = [1, 1, 1]} : vector<32x8x16xf32> to vector<4x8x16xf32>
    %86 = vector.extract_strided_slice %84 {offsets = [4, 0, 0], sizes = [4, 8, 16], strides = [1, 1, 1]} : vector<32x8x16xf32> to vector<4x8x16xf32>
    %87 = vector.extract_strided_slice %84 {offsets = [8, 0, 0], sizes = [4, 8, 16], strides = [1, 1, 1]} : vector<32x8x16xf32> to vector<4x8x16xf32>
    %88 = vector.extract_strided_slice %84 {offsets = [12, 0, 0], sizes = [4, 8, 16], strides = [1, 1, 1]} : vector<32x8x16xf32> to vector<4x8x16xf32>
    %89 = vector.extract_strided_slice %84 {offsets = [16, 0, 0], sizes = [4, 8, 16], strides = [1, 1, 1]} : vector<32x8x16xf32> to vector<4x8x16xf32>
    %90 = vector.extract_strided_slice %84 {offsets = [20, 0, 0], sizes = [4, 8, 16], strides = [1, 1, 1]} : vector<32x8x16xf32> to vector<4x8x16xf32>
    %91 = vector.extract_strided_slice %84 {offsets = [24, 0, 0], sizes = [4, 8, 16], strides = [1, 1, 1]} : vector<32x8x16xf32> to vector<4x8x16xf32>
    %92 = vector.extract_strided_slice %84 {offsets = [28, 0, 0], sizes = [4, 8, 16], strides = [1, 1, 1]} : vector<32x8x16xf32> to vector<4x8x16xf32>
    %93 = tpu.concatenate %85, %86, %87, %88, %89, %90, %91, %92 in 2 : vector<4x8x16xf32>, vector<4x8x16xf32>, vector<4x8x16xf32>, vector<4x8x16xf32>, vector<4x8x16xf32>, vector<4x8x16xf32>, vector<4x8x16xf32>, vector<4x8x16xf32> -> vector<4x8x128xf32>
    %94 = vector.shape_cast %93 : vector<4x8x128xf32> to vector<32x128xf32>
    %95 = arith.truncf %94 : vector<32x128xf32> to vector<32x128xbf16>
    %c0_17 = arith.constant 0 : index
    %c0_18 = arith.constant 0 : index
    %c0_19 = arith.constant 0 : index
    %96 = vector.load %arg6[%c0_17, %c0_18, %c0_19] : memref<1x128x128xbf16, #tpu.memory_space<vmem>>, vector<1x128x128xbf16>
    %97 = vector.shape_cast %96 : vector<1x128x128xbf16> to vector<128x128xbf16>
    %cst_20 = arith.constant dense<0.000000e+00> : vector<32x128xf32>
    %98 = tpu.matmul %95, %97, %cst_20 {dimension_numbers = #tpu.dot_dimension_numbers<[1], [0], [0], [1], [0, 0, 1, 1], [], []>} : vector<32x128xbf16>, vector<128x128xbf16>, vector<32x128xf32> -> vector<32x128xf32>
    %c0_21 = arith.constant 0 : index
    %c0_22 = arith.constant 0 : index
    %c0_23 = arith.constant 0 : index
    %99 = vector.load %arg7[%c0_21, %c0_22, %c0_23] : memref<1x1x128xf32, #tpu.memory_space<vmem>>, vector<1x1x128xf32>
    %100 = vector.shape_cast %99 : vector<1x1x128xf32> to vector<1x128xf32>
    %101 = vector.broadcast %100 : vector<1x128xf32> to vector<32x128xf32>
    %102 = arith.addf %98, %101 : vector<32x128xf32>
    %103 = vector.shape_cast %102 : vector<32x128xf32> to vector<4x8x128xf32>
    %c0_24 = arith.constant 0 : index
    %c0_25 = arith.constant 0 : index
    %c0_26 = arith.constant 0 : index
    %c0_27 = arith.constant 0 : index
    %104 = vector.load %arg8[%c0_24, %c0_25, %c0_26, %c0_27] : memref<1x4x8x128xf32, #tpu.memory_space<vmem>>, vector<1x4x8x128xf32>
    %105 = vector.shape_cast %104 : vector<1x4x8x128xf32> to vector<4x8x128xf32>
    %106 = vector.shape_cast %103 : vector<4x8x128xf32> to vector<1x4x8x128xf32>
    tpu.vector_store %arg8[%c0_24, %c0_25, %c0_26, %c0_27], %106 {strides = array<i32>} : memref<1x4x8x128xf32, #tpu.memory_space<vmem>>, vector<1x4x8x128xf32>,
    return
  }
  func.func @transform_0(%arg0: i32, %arg1: i32) -> (i32, i32, i32, i32) {
    %c0_i32 = arith.constant 0 : i32
    %c0_i32_0 = arith.constant 0 : i32
    %c0_i32_1 = arith.constant 0 : i32
    return %arg0, %arg1, %c0_i32, %c0_i32_0 : i32, i32, i32, i32
  }
  func.func @transform_1(%arg0: i32, %arg1: i32) -> (i32, i32, i32, i32) {
    %c0_i32 = arith.constant 0 : i32
    %c0_i32_0 = arith.constant 0 : i32
    %c0_i32_1 = arith.constant 0 : i32
    return %arg0, %arg1, %c0_i32, %c0_i32_0 : i32, i32, i32, i32
  }
  func.func @transform_2(%arg0: i32, %arg1: i32) -> (i32, i32, i32) {
    %c0_i32 = arith.constant 0 : i32
    %c0_i32_0 = arith.constant 0 : i32
    %c0_i32_1 = arith.constant 0 : i32
    return %arg0, %c0_i32, %c0_i32_0 : i32, i32, i32
  }
  func.func @transform_3(%arg0: i32, %arg1: i32) -> (i32, i32, i32) {
    %c0_i32 = arith.constant 0 : i32
    %c0_i32_0 = arith.constant 0 : i32
    %c0_i32_1 = arith.constant 0 : i32
    return %arg0, %c0_i32, %c0_i32_0 : i32, i32, i32
  }
  func.func @transform_4(%arg0: i32, %arg1: i32) -> (i32, i32, i32) {
    %c0_i32 = arith.constant 0 : i32
    %c0_i32_0 = arith.constant 0 : i32
    %c0_i32_1 = arith.constant 0 : i32
    return %arg0, %c0_i32, %c0_i32_0 : i32, i32, i32
  }
  func.func @transform_5(%arg0: i32, %arg1: i32) -> (i32, i32, i32) {
    %c0_i32 = arith.constant 0 : i32
    %c0_i32_0 = arith.constant 0 : i32
    %c0_i32_1 = arith.constant 0 : i32
    return %arg0, %c0_i32, %c0_i32_0 : i32, i32, i32
  }
  func.func @transform_6(%arg0: i32, %arg1: i32) -> (i32, i32, i32, i32) {
    %c0_i32 = arith.constant 0 : i32
    %c0_i32_0 = arith.constant 0 : i32
    %c0_i32_1 = arith.constant 0 : i32
    return %arg0, %arg1, %c0_i32, %c0_i32_0 : i32, i32, i32, i32
  }
}

</mosaic_0001>

<bundles_post_ra>
// kernel: mgc_forward.2
= control target key start
LH: loop header
LB: loop body
LE: loop exit
PB: predicated region body
PF: predicated region fallthrough
CT: control target
= control target key end

     0   :  { %s837_s0 = inlined_call_operand.vmem [shape: f32[25], index: 0, kind: input, shape index: {}]   ;;  %s838_s1 = inlined_call_operand.<no memory space> [shape: f32[1], index: 1, kind: input, shape index: {}]   ;;  %s839_s2 = inlined_call_operand.vmem [shape: f32[2,25,768], index: 2, kind: input, shape index: {}]   ;;  %s840_s3 = inlined_call_operand.vmem [shape: f32[2,1,768], index: 3, kind: output, shape index: {}]  }
   0x1   :  { %8 = sst [smem:[#allocation2]] %s838_s1 }
   0x2   :  { %9 = vsyncpa [#allocation4], 0  ;;  %s708_s14 = smov 0   ;;  %s710_s15 = smov 0  }
   0x3   :  { %s712_s16 = smov 0  }
   0x4 LB: > { %s522_s1 = sadd.s32 4294967295, %s682_s16   ;;  %s27_s17 = sadd.s32 1, %s678_s15  ;;  %s682_s16 = sphi %s712_s16, %s15_s16   ;;  %s678_s15 = sphi %s710_s15, %s842_s15   ;;  %s674_s14 = sphi %s708_s14, %s841_s14  }
   0x5   : > { %p29_p0 = scmp.ge.s32.totalorder %s27_s17, 2  ;;  %p524_p1 = scmp.ge.s32.totalorder %s682_s16, 1 }
   0x6   : > { %p130_p2 = scmp.lt.s32.totalorder %s682_s16, 3  ;;  %p614_p4 = scmp.eq.s32.totalorder %s522_s1, 0 }
   0x7   : > { %s844_s17 = smov (%p29_p0, %s27_s17), 0  ;;  %s142_s20 = sshll.u32 %s837_s0, 4  ;;  %s143_s20 = int_to_ptr.vmem [resolvable:$true] %s142_s20 }
   0x8   : > { %p131_p3 = pnand %p524_p1, %p130_p2  ;;  %s684_s21 = smov [#allocation3]  }
   0xa   : > { %p610_p5 = pneg %p131_p3  ;;  %171 = sbr.rel (%p131_p3) target bundleno = 81 (0x51), region = 32 }
   0xc   : > { %p611_p6 = pnand %p614_p4, %p610_p5 }
   0xe   : > { %613 = dma.vmem_to_smem (!%p611_p6), %s143_s20, 16, %s684_s21, [#allocation4]  }
   0xf   : > { %669 = dma.done.wait (%p614_p4), [#allocation4], 16  }
  0x10   : > { %671 = vsyncadd (%p614_p4), [#allocation4], 4294967280 }
  0x11   : > { %178 = sfence }
  0x12   : > { %p205_p7 = scmp.lt.s32.totalorder %s674_s14, 1  ;;  %s226_s22 = sld [smem:[#allocation3]] }
  0x13   : > { %s532_s23 = sld [smem:[#allocation3 + $0x1]] }
  0x14   : > { %s846_s14 = smov (!%p205_p7, %s674_s14), 1  ;;  %s535_s24 = sld [smem:[#allocation3 + $0x2]] }
  0x15   : > { %s604_s25 = smul.u32 192, %s846_s14  ;;  %s538_s26 = sld [smem:[#allocation3 + $0x3]] }
  0x16   : > { %s733_s27 = sld [smem:[#allocation3 + $0x4]]  ;;  %s605_s28 = smul.u32 6, %s846_s14 }
  0x17   : > { %s738_s30 = scalar_lea.vmem %s839_s2, %s604_s25  ;;  %s740_s4 = sld [smem:[#allocation3 + $0x5]] }
  0x18   : > { %v223_v0 = vld [vmem:[%s738_s30] ss:$8 sm:$0xf]  ;;  %v227_v2 = vstv %s226_s22  ;;  %v530_v4 = vld [vmem:[%s738_s30 + $0x1] ss:$8 sm:$0xf] }
  0x19   : > { %v224_v1 = vld [vmem:[%s738_s30] ss:$8 sm:$0x30]  ;;  %v531_v5 = vld [vmem:[%s738_s30 + $0x1] ss:$8 sm:$0x30]  ;;  %v234_v6 = vstv %s532_s23 }
  0x1a   : > { %v225_v3 = vor.u32 %v224_v1, %v223_v0  ;;  %v232_v7 = vor.u32 %v531_v5, %v530_v4  ;;  %v533_v8 = vld [vmem:[%s738_s30 + $0x2] ss:$8 sm:$0xf]  ;;  %v242_v10 = vstv %s535_s24  ;;  %v536_v13 = vld [vmem:[%s738_s30 + $0x3] ss:$8 sm:$0xf] }
  0x1b   : > { %v534_v9 = vld [vmem:[%s738_s30 + $0x2] ss:$8 sm:$0x30]  ;;  %v537_v14 = vld [vmem:[%s738_s30 + $0x3] ss:$8 sm:$0x30]  ;;  %v250_v15 = vstv %s538_s26 }
  0x1c   : > { %v228_v11 = vmul.f32 %v227_v2, %v225_v3  ;;  %v240_v12 = vor.u32 %v534_v9, %v533_v8  ;;  %v235_v16 = vmul.f32 %v234_v6, %v232_v7  ;;  %v248_v17 = vor.u32 %v537_v14, %v536_v13  ;;  %v539_v18 = vld [vmem:[%s738_s30 + $0x4] ss:$8 sm:$0xf]  ;;  %v542_v23 = vld [vmem:[%s738_s30 + $0x5] ss:$8 sm:$0xf] }
  0x1d   : > { %v540_v19 = vld [vmem:[%s738_s30 + $0x4] ss:$8 sm:$0x30]  ;;  %v258_v22 = vstv %s733_s27  ;;  %v543_v24 = vld [vmem:[%s738_s30 + $0x5] ss:$8 sm:$0x30]  ;;  %v266_v30 = vstv %s740_s4  ;;  %s221_s4 = scalar_lea.vmem %s840_s3, %s605_s28 }
  0x1e   : > { %v243_v20 = vmul.f32 %v242_v10, %v240_v12  ;;  %v256_v21 = vor.u32 %v540_v19, %v539_v18  ;;  %v236_v25 = vadd.f32 %v235_v16, %v228_v11  ;;  %v251_v26 = vmul.f32 %v250_v15, %v248_v17  ;;  %v545_v28 = vld [vmem:[%s738_s30 + $0x6] ss:$8 sm:$0xf]  ;;  %s547_s5 = sld [smem:[#allocation3 + $0x6]] }
  0x1f   : > { %v264_v27 = vor.u32 %v543_v24, %v542_v23  ;;  %v546_v29 = vld [vmem:[%s738_s30 + $0x6] ss:$8 sm:$0x30]  ;;  %v548_v31 = vld [vmem:[%s738_s30 + $0x7] ss:$8 sm:$0xf] }
  0x20   : > { %v244_v32 = vadd.f32 %v243_v20, %v236_v25  ;;  %v259_v33 = vmul.f32 %v258_v22, %v256_v21  ;;  %v549_v34 = vld [vmem:[%s738_s30 + $0x7] ss:$8 sm:$0x30]  ;;  %s550_s6 = sld [smem:[#allocation3 + $0x7]]  ;;  %v272_v39 = vor.u32 %v546_v29, %v545_v28 }
  0x21   : > { %v551_v35 = vld [vmem:[%s738_s30 + $0x30] ss:$8 sm:$0xf]  ;;  %v267_v38 = vmul.f32 %v266_v30, %v264_v27  ;;  %s553_s7 = sld [smem:[#allocation3 + $0x8]]  ;;  %v280_v41 = vor.u32 %v549_v34, %v548_v31 }
  0x22   : > { %v552_v36 = vld [vmem:[%s738_s30 + $0x30] ss:$8 sm:$0x30]  ;;  %v252_v37 = vadd.f32 %v251_v26, %v244_v32  ;;  %v554_v40 = vld [vmem:[%s738_s30 + $0x31] ss:$8 sm:$0xf] }
  0x23   : > { %v555_v42 = vld [vmem:[%s738_s30 + $0x31] ss:$8 sm:$0x30]  ;;  %s556_s8 = sld [smem:[#allocation3 + $0x9]]  ;;  %v288_v46 = vor.u32 %v552_v36, %v551_v35 }
  0x24   : > { %v260_v43 = vadd.f32 %v259_v33, %v252_v37  ;;  %v557_v44 = vld [vmem:[%s738_s30 + $0x32] ss:$8 sm:$0xf]  ;;  %v274_v45 = vstv %s547_s5  ;;  %s559_s9 = sld [smem:[#allocation3 + $0xa]]  ;;  %v296_v51 = vor.u32 %v555_v42, %v554_v40 }
  0x25   : > { %v558_v47 = vld [vmem:[%s738_s30 + $0x32] ss:$8 sm:$0x30]  ;;  %v275_v49 = vmul.f32 %v274_v45, %v272_v39  ;;  %s562_s10 = sld [smem:[#allocation3 + $0xb]] }
  0x26   : > { %v268_v48 = vadd.f32 %v267_v38, %v260_v43  ;;  %v282_v50 = vstv %s550_s6  ;;  %v560_v53 = vld [vmem:[%s738_s30 + $0x33] ss:$8 sm:$0xf]  ;;  %v304_v57 = vor.u32 %v558_v47, %v557_v44  ;;  %v563_v58 = vld [vmem:[%s738_s30 + $0x34] ss:$8 sm:$0xf] }
  0x27   : > { %v283_v52 = vmul.f32 %v282_v50, %v280_v41  ;;  %v561_v54 = vld [vmem:[%s738_s30 + $0x33] ss:$8 sm:$0x30]  ;;  %v290_v56 = vstv %s553_s7  ;;  %s565_s11 = sld [smem:[#allocation3 + $0xc]] }
  0x28   : > { %v276_v55 = vadd.f32 %v275_v49, %v268_v48  ;;  %v291_v59 = vmul.f32 %v290_v56, %v288_v46  ;;  %v564_v61 = vld [vmem:[%s738_s30 + $0x34] ss:$8 sm:$0x30]  ;;  %s770_s12 = sld [smem:[#allocation3 + $0xd]]  ;;  %v312_v0 = vor.u32 %v561_v54, %v560_v53 }
  0x29   : > { %v298_v60 = vstv %s556_s8  ;;  %v566_v1 = vld [vmem:[%s738_s30 + $0x35] ss:$8 sm:$0xf]  ;;  %s774_s13 = sld [smem:[#allocation3 + $0xe]]  ;;  %v320_v7 = vor.u32 %v564_v61, %v563_v58 }
  0x2a   : > { %v284_v62 = vadd.f32 %v283_v52, %v276_v55  ;;  %v299_v63 = vmul.f32 %v298_v60, %v296_v51  ;;  %v306_v2 = vstv %s559_s9  ;;  %v567_v3 = vld [vmem:[%s738_s30 + $0x35] ss:$8 sm:$0x30]  ;;  %s776_s1 = sld [smem:[#allocation3 + $0xf]] }
  0x2b   : > { %v307_v5 = vmul.f32 %v306_v2, %v304_v57  ;;  %v314_v6 = vstv %s562_s10  ;;  %v569_v8 = vld [vmem:[%s738_s30 + $0x36] ss:$8 sm:$0xf]  ;;  %v328_v13 = vor.u32 %v567_v3, %v566_v1  ;;  %v572_v14 = vld [vmem:[%s738_s30 + $0x37] ss:$8 sm:$0xf] }
  0x2c   : > { %v292_v4 = vadd.f32 %v291_v59, %v284_v62  ;;  %v570_v9 = vld [vmem:[%s738_s30 + $0x36] ss:$8 sm:$0x30]  ;;  %v315_v11 = vmul.f32 %v314_v6, %v312_v0  ;;  %s781_s18 = sld [smem:[#allocation3 + $0x10]] }
  0x2d   : > { %v322_v12 = vstv %s565_s11  ;;  %v573_v16 = vld [vmem:[%s738_s30 + $0x37] ss:$8 sm:$0x30]  ;;  %s785_s19 = sld [smem:[#allocation3 + $0x11]]  ;;  %v336_v19 = vor.u32 %v570_v9, %v569_v8 }
  0x2e   : > { %v300_v10 = vadd.f32 %v299_v63, %v292_v4  ;;  %v330_v15 = vstv %s770_s12  ;;  %v323_v18 = vmul.f32 %v322_v12, %v320_v7  ;;  %v575_v20 = vld [vmem:[%s738_s30 + $0x60] ss:$8 sm:$0xf]  ;;  %s790_s20 = sld [smem:[#allocation3 + $0x12]]  ;;  %v344_v25 = vor.u32 %v573_v16, %v572_v14 }
  0x2f   : > { %v338_v21 = vstv %s774_s13  ;;  %v576_v22 = vld [vmem:[%s738_s30 + $0x60] ss:$8 sm:$0x30]  ;;  %v331_v24 = vmul.f32 %v330_v15, %v328_v13  ;;  %v578_v26 = vld [vmem:[%s738_s30 + $0x61] ss:$8 sm:$0xf] }
  0x30   : > { %v308_v17 = vadd.f32 %v307_v5, %v300_v10  ;;  %v346_v27 = vstv %s776_s1  ;;  %v579_v28 = vld [vmem:[%s738_s30 + $0x61] ss:$8 sm:$0x30]  ;;  %s795_s21 = sld [smem:[#allocation3 + $0x13]]  ;;  %v339_v30 = vmul.f32 %v338_v21, %v336_v19  ;;  %v352_v31 = vor.u32 %v576_v22, %v575_v20 }
  0x31   : > { %v581_v32 = vld [vmem:[%s738_s30 + $0x62] ss:$8 sm:$0xf]  ;;  %s800_s22 = sld [smem:[#allocation3 + $0x14]]  ;;  %v347_v36 = vmul.f32 %v346_v27, %v344_v25  ;;  %v360_v37 = vor.u32 %v579_v28, %v578_v26  ;;  %v424_v19 = vlaneseq }
  0x32   : > { %v316_v23 = vadd.f32 %v315_v11, %v308_v17  ;;  %v354_v33 = vstv %s781_s18  ;;  %v582_v34 = vld [vmem:[%s738_s30 + $0x62] ss:$8 sm:$0x30]  ;;  %v584_v38 = vld [vmem:[%s738_s30 + $0x63] ss:$8 sm:$0xf] }
  0x33   : > { %v362_v39 = vstv %s785_s19  ;;  %v585_v40 = vld [vmem:[%s738_s30 + $0x63] ss:$8 sm:$0x30]  ;;  %s805_s23 = sld [smem:[#allocation3 + $0x15]]  ;;  %v355_v42 = vmul.f32 %v354_v33, %v352_v31  ;;  %v368_v43 = vor.u32 %v582_v34, %v581_v32  ;;  %vm426_vm0 = vcmp.lt.s32.totalorder %v424_v19, 768 }
  0x34   : > { %v324_v29 = vadd.f32 %v323_v18, %v316_v23  ;;  %v587_v44 = vld [vmem:[%s738_s30 + $0x64] ss:$8 sm:$0xf]  ;;  %v370_v45 = vstv %s790_s20  ;;  %s810_s24 = sld [smem:[#allocation3 + $0x16]]  ;;  %v363_v48 = vmul.f32 %v362_v39, %v360_v37  ;;  %v376_v49 = vor.u32 %v585_v40, %v584_v38 }
  0x35   : > { %v588_v46 = vld [vmem:[%s738_s30 + $0x64] ss:$8 sm:$0x30]  ;;  %v590_v50 = vld [vmem:[%s738_s30 + $0x65] ss:$8 sm:$0xf]  ;;  %v371_v54 = vmul.f32 %v370_v45, %v368_v43 }
  0x36   : > { %v332_v35 = vadd.f32 %v331_v24, %v324_v29  ;;  %v378_v51 = vstv %s795_s21  ;;  %v591_v52 = vld [vmem:[%s738_s30 + $0x65] ss:$8 sm:$0x30]  ;;  %s598_s25 = sld [smem:[#allocation3 + $0x17]]  ;;  %v384_v55 = vor.u32 %v588_v46, %v587_v44 }
  0x37   : > { %v593_v56 = vld [vmem:[%s738_s30 + $0x66] ss:$8 sm:$0xf]  ;;  %v386_v57 = vstv %s800_s22  ;;  %s601_s26 = sld [smem:[#allocation3 + $0x18]]  ;;  %v379_v60 = vmul.f32 %v378_v51, %v376_v49  ;;  %v392_v61 = vor.u32 %v591_v52, %v590_v50 }
  0x38   : > { %v340_v41 = vadd.f32 %v339_v30, %v332_v35  ;;  %v594_v58 = vld [vmem:[%s738_s30 + $0x66] ss:$8 sm:$0x30]  ;;  %v596_v63 = vld [vmem:[%s738_s30 + $0x67] ss:$8 sm:$0xf]  ;;  %v387_v2 = vmul.f32 %v386_v57, %v384_v55 }
  0x39   : > { %v394_v62 = vstv %s805_s23  ;;  %v597_v0 = vld [vmem:[%s738_s30 + $0x67] ss:$8 sm:$0x30]  ;;  %v400_v3 = vor.u32 %v594_v58, %v593_v56  ;;  %v599_v5 = vld [vmem:[%s738_s30 + $0x90] ss:$8 sm:$0xf] }
  0x3a   : > { %v348_v47 = vadd.f32 %v347_v36, %v340_v41  ;;  %v402_v4 = vstv %s810_s24  ;;  %v600_v6 = vld [vmem:[%s738_s30 + $0x90] ss:$8 sm:$0x30]  ;;  %v395_v8 = vmul.f32 %v394_v62, %v392_v61  ;;  %v408_v9 = vor.u32 %v597_v0, %v596_v63  ;;  %s421_s27 = sld [smem:[#allocation2]] }
  0x3b   : > { %v403_v12 = vmul.f32 %v402_v4, %v400_v3  ;;  %v416_v13 = vor.u32 %v600_v6, %v599_v5 }
  0x3c   : > { %v356_v53 = vadd.f32 %v355_v42, %v348_v47  ;;  %v410_v10 = vstv %s598_s25 }
  0x3d   : > { %v418_v14 = vstv %s601_s26  ;;  %v411_v16 = vmul.f32 %v410_v10, %v408_v9 }
  0x3e   : > { %v364_v59 = vadd.f32 %v363_v48, %v356_v53  ;;  %v419_v18 = vmul.f32 %v418_v14, %v416_v13 }
  0x40   : > { %v372_v1 = vadd.f32 %v371_v54, %v364_v59  ;;  %v422_v21 = vstv %s421_s27 }
  0x42   : > { %v380_v7 = vadd.f32 %v379_v60, %v372_v1 }
  0x44   : > { %v388_v11 = vadd.f32 %v387_v2, %v380_v7 }
  0x46   : > { %v396_v15 = vadd.f32 %v395_v8, %v388_v11 }
  0x48   : > { %v404_v17 = vadd.f32 %v403_v12, %v396_v15 }
  0x4a   : > { %v412_v20 = vadd.f32 %v411_v16, %v404_v17 }
  0x4c   : > { %v420_v22 = vadd.f32 %v419_v18, %v412_v20 }
  0x4e   : > { %v423_v23 = vadd.f32 %v422_v21, %v420_v22 }
  0x50   : > { %428 = vst.msk [vmem:[%s221_s4] sm:$0x3f] %vm426_vm0, %v423_v23 }
  0x51 PF: > { %s15_s16 = sadd.s32 1, %s682_s16   ;;  %s841_s14 = smov %s678_s15 }
  0x52   : > { %p12_p8 = scmp.ge.s32.totalorder %s15_s16, 4   ;;  %s842_s15 = smov %s844_s17 }
  0x54   :  { %14 = sbr.rel (!%p12_p8) target bundleno = 4 (0x4), region = 91 }
  0x59   :  { %457 = vsyncpa [#allocation4], 1 }
  0x5a   :  { %459 = vsyncpa [#allocation4 + $0x1], 1 }

// kernel: mgc_forward.3
= control target key start
LH: loop header
LB: loop body
LE: loop exit
PB: predicated region body
PF: predicated region fallthrough
CT: control target
= control target key end

     0   :  { %s3758_s21 = smov 0   ;;  %s3760_s22 = smov 0   ;;  %s4637_s0 = inlined_call_operand.vmem [shape: f32[2,4,8,128], index: 0, kind: input, shape index: {}]   ;;  %s4638_s1 = inlined_call_operand.vmem [shape: f32[2,4,8,128], index: 1, kind: input, shape index: {}]   ;;  %s4639_s2 = inlined_call_operand.vmem [shape: bf16[2,128,384], index: 2, kind: input, shape index: {}]   ;;  %s4640_s3 = inlined_call_operand.vmem [shape: f32[2,1,384], index: 3, kind: input, shape index: {}]   ;;  %s4641_s4 = inlined_call_operand.vmem [shape: bf16[2,128,128], index: 4, kind: input, shape index: {}]   ;;  %s4642_s5 = inlined_call_operand.vmem [shape: f32[2,1,128], index: 5, kind: input, shape index: {}]   ;;  %s4643_s6 = inlined_call_operand.vmem [shape: f32[2,4,8,128], index: 6, kind: output, shape index: {}]  }
   0x1   :  { %s3762_s23 = smov 0  }
   0x2 LB: > { %s28_s24 = sadd.s32 1, %s3710_s22  ;;  %p3010_p0 = scmp.ge.s32.totalorder %s3714_s23, 1  ;;  %s3714_s23 = sphi %s3762_s23, %s16_s23   ;;  %s3710_s22 = sphi %s3760_s22, %s4645_s22   ;;  %s3706_s21 = sphi %s3758_s21, %s4644_s21  }
   0x3   : > { %p30_p1 = scmp.ge.s32.totalorder %s28_s24, 2  ;;  %p287_p2 = scmp.lt.s32.totalorder %s3714_s23, 3 }
   0x5   : > { %s4647_s24 = smov (%p30_p1, %s28_s24), 0  ;;  %p288_p3 = pnand %p3010_p0, %p287_p2 }
   0x6   : > { %p352_p4 = scmp.lt.s32.totalorder (!%p288_p3), %s3706_s21, 1  ;;  %s3716_s16 = smov (!%p288_p3), 64  }
   0x7   : > { %291 = sbr.rel (%p288_p3) target bundleno = 1342 (0x53e), region = 44  ;;  %s3717_s17 = smov (!%p288_p3), 80  }
   0x8   : > { %s3718_s18 = smov (!%p288_p3), 96   ;;  %s3719_s19 = smov (!%p288_p3), 112  }
   0x9   : > { %s3720_s20 = smov (!%p288_p3), 32   ;;  %s3722_s26 = smov (!%p288_p3), 16  }
   0xc   : > { %s4649_s21 = smov (!%p352_p4, %s3706_s21), 1  ;;  %vm1014_vm0 = vcmask 130048   ;;  %vm1623_vm1 = vcmask 64512   ;;  %vm2011_vm2 = vcmask 1043456   ;;  %vm2733_vm3 = vcmask 261120  }
   0xd   : > { %s3250_s25 = smul.u32 192, %s4649_s21  ;;  %s3821_s29 = sshll.u32 %s4649_s21, 5  ;;  %vm2738_vm4 = vcmask 392192   ;;  %vm2743_vm5 = vcmask 523264   ;;  %vm2748_vm6 = vcmask 654336   ;;  %vm2753_vm7 = vcmask 785408  }
   0xe   : > { %s359_s8 = scalar_lea.vmem %s4637_s0, %s3821_s29  ;;  %s369_s11 = scalar_lea.vmem %s4638_s1, %s3821_s29  ;;  %vm2758_vm8 = vcmask 916480  }
   0xf   : > { %s3782_s28 = scalar_lea.vmem %s4639_s2, %s3250_s25  ;;  %s3251_s12 = smul.u32 3, %s4649_s21 }
  0x10   : > { %v3106_v0 = vld [vmem:[%s3782_s28 + $0xa8] sm:$0xf]  ;;  %v3240_v1 = vld [vmem:[%s3782_s28 + $0xb0] sm:$0xf0]  ;;  %v3239_v2 = vld [vmem:[%s3782_s28 + $0xac] sm:$0xf]  ;;  %s387_s30 = scalar_lea.vmem %s4642_s5, %s4649_s21 }
  0x11   : > { %v3107_v3 = vor.u32 %v3240_v1, %v3106_v0  ;;  %v3108_v4 = vld [vmem:[%s3782_s28 + $0xb4] sm:$0xf0]  ;;  %v3094_v5 = vld [vmem:[%s3782_s28 + $0x90] sm:$0xf]  ;;  %v3237_v6 = vld [vmem:[%s3782_s28 + $0x98] sm:$0xf0]  ;;  %s379_s15 = scalar_lea.vmem %s4640_s3, %s3251_s12 }
  0x12   : > { %v3111_v7 = vor.u32 %v3239_v2, %v3108_v4  ;;  %v3236_v8 = vld [vmem:[%s3782_s28 + $0x94] sm:$0xf]  ;;  %v3096_v9 = vld [vmem:[%s3782_s28 + $0x9c] sm:$0xf0]  ;;  %v3095_v10 = vor.u32 %v3237_v6, %v3094_v5  ;;  %v3082_v12 = vld [vmem:[%s3782_s28 + $0x78] sm:$0xf] }
  0x13   : > { %579 = vmatpush.bf16.msra.mxu0 %v3107_v3  ;;  %v3099_v11 = vor.u32 %v3236_v8, %v3096_v9  ;;  %v3234_v13 = vld [vmem:[%s3782_s28 + $0x80] sm:$0xf0]  ;;  %v3233_v14 = vld [vmem:[%s3782_s28 + $0x7c] sm:$0xf]  ;;  %v3084_v15 = vld [vmem:[%s3782_s28 + $0x84] sm:$0xf0] }
  0x14   : > { %604 = vmatpush.bf16.msra.mxu1 %v3111_v7  ;;  %v3083_v16 = vor.u32 %v3234_v13, %v3082_v12  ;;  %v3087_v17 = vor.u32 %v3233_v14, %v3084_v15  ;;  %v3070_v18 = vld [vmem:[%s3782_s28 + $0x60] sm:$0xf]  ;;  %v3231_v19 = vld [vmem:[%s3782_s28 + $0x68] sm:$0xf0]  ;;  %v3230_v20 = vld [vmem:[%s3782_s28 + $0x64] sm:$0xf] }
  0x15   : > { %v3072_v21 = vld [vmem:[%s3782_s28 + $0x6c] sm:$0xf0]  ;;  %v3071_v22 = vor.u32 %v3231_v19, %v3070_v18  ;;  %v3058_v23 = vld [vmem:[%s3782_s28 + $0x48] sm:$0xf]  ;;  %v3241_v25 = vld [vmem:[%s3782_s28 + $0xb8] sm:$0xf0] }
  0x16   : > { %v3114_v24 = vld [vmem:[%s3782_s28 + $0xb0] sm:$0xf]  ;;  %v3075_v26 = vor.u32 %v3230_v20, %v3072_v21  ;;  %v3228_v27 = vld [vmem:[%s3782_s28 + $0x50] sm:$0xf0]  ;;  %v3102_v29 = vld [vmem:[%s3782_s28 + $0x98] sm:$0xf] }
  0x17   : > { %580 = vmatpush.bf16.msra.mxu0 %v3095_v10  ;;  %v3115_v28 = vor.u32 %v3241_v25, %v3114_v24  ;;  %v3238_v30 = vld [vmem:[%s3782_s28 + $0xa0] sm:$0xf0]  ;;  %v3227_v31 = vld [vmem:[%s3782_s28 + $0x4c] sm:$0xf]  ;;  %v3060_v32 = vld [vmem:[%s3782_s28 + $0x54] sm:$0xf0]  ;;  %v3059_v34 = vor.u32 %v3228_v27, %v3058_v23 }
  0x18   : > { %605 = vmatpush.bf16.msra.mxu1 %v3099_v11  ;;  %v3103_v33 = vor.u32 %v3238_v30, %v3102_v29  ;;  %v3090_v35 = vld [vmem:[%s3782_s28 + $0x80] sm:$0xf]  ;;  %v3235_v36 = vld [vmem:[%s3782_s28 + $0x88] sm:$0xf0]  ;;  %v3063_v37 = vor.u32 %v3227_v31, %v3060_v32  ;;  %v3046_v38 = vld [vmem:[%s3782_s28 + $0x30] sm:$0xf] }
  0x19   : > { %629 = vmatpush.bf16.msra.mxu2 %v3115_v28  ;;  %v3225_v39 = vld [vmem:[%s3782_s28 + $0x38] sm:$0xf0]  ;;  %v3224_v40 = vld [vmem:[%s3782_s28 + $0x34] sm:$0xf]  ;;  %v3048_v41 = vld [vmem:[%s3782_s28 + $0x3c] sm:$0xf0]  ;;  %v3091_v42 = vor.u32 %v3235_v36, %v3090_v35 }
  0x1a   : > { %v3047_v43 = vor.u32 %v3225_v39, %v3046_v38  ;;  %v3078_v44 = vld [vmem:[%s3782_s28 + $0x68] sm:$0xf]  ;;  %v3232_v45 = vld [vmem:[%s3782_s28 + $0x70] sm:$0xf0]  ;;  %v3051_v46 = vor.u32 %v3224_v40, %v3048_v41  ;;  %v3034_v47 = vld [vmem:[%s3782_s28 + $0x18] sm:$0xf] }
  0x1b   : > { %581 = vmatpush.bf16.msra.mxu0 %v3083_v16  ;;  %v3222_v48 = vld [vmem:[%s3782_s28 + $0x20] sm:$0xf0]  ;;  %v3221_v49 = vld [vmem:[%s3782_s28 + $0x1c] sm:$0xf]  ;;  %v3036_v50 = vld [vmem:[%s3782_s28 + $0x24] sm:$0xf0]  ;;  %v3079_v51 = vor.u32 %v3232_v45, %v3078_v44 }
  0x1c   : > { %606 = vmatpush.bf16.msra.mxu1 %v3087_v17  ;;  %v3035_v52 = vor.u32 %v3222_v48, %v3034_v47  ;;  %v3066_v53 = vld [vmem:[%s3782_s28 + $0x50] sm:$0xf]  ;;  %v3229_v54 = vld [vmem:[%s3782_s28 + $0x58] sm:$0xf0]  ;;  %v3039_v55 = vor.u32 %v3221_v49, %v3036_v50  ;;  %v3022_v56 = vld [vmem:[%s3782_s28] sm:$0xf] }
  0x1d   : > { %630 = vmatpush.bf16.msra.mxu2 %v3103_v33  ;;  %v3219_v57 = vld [vmem:[%s3782_s28 + $0x8] sm:$0xf0]  ;;  %v3218_v58 = vld [vmem:[%s3782_s28 + $0x4] sm:$0xf]  ;;  %v3024_v59 = vld [vmem:[%s3782_s28 + $0xc] sm:$0xf0]  ;;  %v3067_v60 = vor.u32 %v3229_v54, %v3066_v53 }
  0x1e   : > { %v3023_v61 = vor.u32 %v3219_v57, %v3022_v56  ;;  %v3054_v62 = vld [vmem:[%s3782_s28 + $0x38] sm:$0xf]  ;;  %v3226_v63 = vld [vmem:[%s3782_s28 + $0x40] sm:$0xf0]  ;;  %v3027_v0 = vor.u32 %v3218_v58, %v3024_v59  ;;  %v400_v2 = vld [vmem:[%s359_s8 + $0x8] sm:$0xff]  ;;  %s3721_s25 = smov 48  }
  0x1f   : > { %582 = vmatpush.bf16.msra.mxu0 %v3071_v22  ;;  %v399_v1 = vld [vmem:[%s359_s8] sm:$0xff]  ;;  %v3055_v3 = vor.u32 %v3226_v63, %v3054_v62  ;;  %v3223_v6 = vld [vmem:[%s3782_s28 + $0x28] sm:$0xf0]  ;;  %v3030_v8 = vld [vmem:[%s3782_s28 + $0x8] sm:$0xf]  ;;  %s3216_s7 = sshll.u32 %s4649_s21, 6 }
  0x20   : > { %607 = vmatpush.bf16.msra.mxu1 %v3075_v26  ;;  %v407_v4 = vpack.c.bf16 %v400_v2, %v399_v1  ;;  %v3042_v5 = vld [vmem:[%s3782_s28 + $0x20] sm:$0xf]  ;;  %v3220_v9 = vld [vmem:[%s3782_s28 + $0x10] sm:$0xf0]  ;;  %v402_v12 = vld [vmem:[%s359_s8 + $0x18] sm:$0xff]  ;;  %s384_s10 = scalar_lea.vmem %s4641_s4, %s3216_s7 }
  0x21   : > { %631 = vmatpush.bf16.msra.mxu2 %v3091_v42  ;;  %v3043_v7 = vor.u32 %v3223_v6, %v3042_v5  ;;  %v3031_v10 = vor.u32 %v3220_v9, %v3030_v8  ;;  %v401_v11 = vld [vmem:[%s359_s8 + $0x10] sm:$0xff]  ;;  %v403_v14 = vld [vmem:[%s369_s11] sm:$0xff]  ;;  %v404_v15 = vld [vmem:[%s369_s11 + $0x8] sm:$0xff] }
  0x22   : > { %v408_v13 = vpack.c.bf16 %v402_v12, %v401_v11  ;;  %v409_v16 = vpack.c.bf16 %v404_v15, %v403_v14  ;;  %v405_v17 = vld [vmem:[%s369_s11 + $0x10] sm:$0xff]  ;;  %v406_v18 = vld [vmem:[%s369_s11 + $0x18] sm:$0xff]  ;;  %v3847_v20 = vld [vmem:[%s379_s15] sm:$0x7]  ;;  %s396_s15 = scalar_lea.vmem %s4643_s6, %s3821_s29 }
  0x23   : > { %583 = vmatpush.bf16.msra.mxu0 %v3059_v34  ;;  %v410_v19 = vpack.c.bf16 %v406_v18, %v405_v17  ;;  %v445_v23 = vperm.slane %v3847_v20, 0  ;;  %v446_v38 = vperm.slane %v3847_v20, 1 }
  0x24   : > { %608 = vmatpush.bf16.msra.mxu1 %v3063_v37 }
  0x25   : > { %632 = vmatpush.bf16.msra.mxu2 %v3079_v51 }
  0x27   : > { %584 = vmatpush.bf16.msra.mxu0 %v3047_v43 }
  0x28   : > { %609 = vmatpush.bf16.msra.mxu1 %v3051_v46 }
  0x29   : > { %633 = vmatpush.bf16.msra.mxu2 %v3067_v60 }
  0x2b   : > { %585 = vmatpush.bf16.msra.mxu0 %v3035_v52 }
  0x2c   : > { %610 = vmatpush.bf16.msra.mxu1 %v3039_v55 }
  0x2d   : > { %634 = vmatpush.bf16.msra.mxu2 %v3055_v3 }
  0x2f   : > { %586 = vmatpush.bf16.msra.mxu0 %v3023_v61 }
  0x30   : > { %611 = vmatpush.bf16.msra.mxu1 %v3027_v0 }
  0x31   : > { %635 = vmatpush.bf16.msra.mxu2 %v3043_v7 }
  0x32   : > { %587 = vmatmul.bf16.vlgmr.msra.gmra.mxu0 %v407_v4 }
  0x33   : > { %612 = vmatmul.bf16.vlgmr.msra.gmra.mxu1 %v407_v4 }
  0x35   : > { %636 = vmatpush.bf16.msra.mxu2 %v3031_v10 }
  0x38   : > { %637 = vmatmul.bf16.vlgmr.msra.gmra.mxu2 %v407_v4  ;;  %v447_v4 = vperm.slane %v3847_v20, 2 }
  0x42   : > { %592 = vmatmul.bf16.gmra.mxu0 %v408_v13 }
  0x43   : > { %615 = vmatmul.bf16.gmra.mxu1 %v408_v13 }
  0x48   : > { %640 = vmatmul.bf16.gmra.mxu2 %v408_v13 }
  0x52   : > { %597 = vmatmul.bf16.gmra.mxu0 %v409_v16 }
  0x53   : > { %618 = vmatmul.bf16.gmra.mxu1 %v409_v16 }
  0x58   : > { %643 = vmatmul.bf16.gmra.mxu2 %v409_v16 }
  0x62   : > { %600 = vmatmul.bf16.gmra.mxu0 %v410_v19 }
  0x63   : > { %623 = vmatmul.bf16.gmra.mxu1 %v410_v19 }
  0x68   : > { %648 = vmatmul.bf16.gmra.mxu2 %v410_v19 }
  0xaf   : > { %v588_v21 = vpop.f32.mrf.mxu0 }
  0xb0   : > { %v613_v22 = vpop.f32.mrf.mxu1  ;;  %v589_v24 = vadd.f32 %v588_v21, %v445_v23 }
  0xb2   : > { %v742_v53 = vpack.c.bf16 %v589_v24, %v589_v24 }
  0xb7   : > { %v590_v25 = vpop.f32.mrf.mxu0 }
  0xb8   : > { %v3850_v26 = vadd.f32 %v590_v25, %v445_v23  ;;  %v614_v27 = vpop.f32.mrf.mxu1 }
  0xba   : > { %v3853_v28 = vpack.i.bf16 %v3850_v26, %v589_v24  ;;  %v743_v1 = vpack.c.bf16 %v3850_v26, %v3850_v26 }
  0xbb   : > { %v638_v31 = vpop.f32.mrf.mxu2 }
  0xbc   : > { %3319 = vrot.lane.b32.xlu2 %v3853_v28, %s3716_s16 }
  0xbf   : > { %v593_v29 = vpop.f32.mrf.mxu0 }
  0xc0   : > { %v616_v30 = vpop.f32.mrf.mxu1  ;;  %v3857_v32 = vadd.f32 %v593_v29, %v445_v23 }
  0xc2   : > { %v744_v6 = vpack.c.bf16 %v3857_v32, %v3857_v32 }
  0xc3   : > { %v639_v36 = vpop.f32.mrf.mxu2 }
  0xc7   : > { %v595_v33 = vpop.f32.mrf.mxu0 }
  0xc8   : > { %v3859_v34 = vadd.f32 %v595_v33, %v445_v23  ;;  %v617_v35 = vpop.f32.mrf.mxu1 }
  0xca   : > { %v3863_v37 = vpack.i.bf16 %v3859_v34, %v3857_v32  ;;  %v745_v10 = vpack.c.bf16 %v3859_v34, %v3859_v34 }
  0xcb   : > { %v641_v41 = vpop.f32.mrf.mxu2 }
  0xcc   : > { %3324 = vrot.lane.b32.xlu2 %v3863_v37, %s3717_s17 }
  0xcf   : > { %v598_v39 = vpop.f32.mrf.mxu0 }
  0xd0   : > { %v619_v40 = vpop.f32.mrf.mxu1 }
  0xd1   : > { %v620_v42 = vadd.f32 %v619_v40, %v446_v38 }
  0xd3   : > { %v3293_v43 = vpack.i.bf16 %v589_v24, %v620_v42  ;;  %v862_v44 = vpack.c.bf16 %v620_v42, %v620_v42  ;;  %v642_v48 = vpop.f32.mrf.mxu2 }
  0xd5   : > { %3294 = vrot.lane.b32.xlu1 %v3293_v43, %s3718_s18  ;;  %3284 = vrot.lane.b32.xlu0 %v3293_v43, %s3719_s19  ;;  %v1019_v45 = vsel %vm1014_vm0, %v862_v44, 0 }
  0xd6   : > { %1028 = vmatpush.bf16.xpose.msra.mxu3 %v1019_v45 }
  0xd7   : > { %v599_v46 = vpop.f32.mrf.mxu0 }
  0xd8   : > { %v621_v47 = vpop.f32.mrf.mxu1 }
  0xd9   : > { %v622_v49 = vadd.f32 %v621_v47, %v446_v38 }
  0xdb   : > { %v3343_v50 = vpack.i.bf16 %v622_v49, %v620_v42  ;;  %v3303_v51 = vpack.i.bf16 %v3850_v26, %v622_v49  ;;  %v863_v52 = vpack.c.bf16 %v622_v49, %v622_v49  ;;  %v644_v3 = vpop.f32.mrf.mxu2 }
  0xdc   : > { %v3900_v7 = vadd.f32 %v644_v3, %v447_v4 }
  0xdd   : > { %3344 = vrot.lane.b32.xlu2 %v3343_v50, %s3717_s17  ;;  %3304 = vrot.lane.b32.xlu1 %v3303_v51, %s3718_s18  ;;  %v1038_v54 = vsel %vm1014_vm0, %v863_v52, 0 }
  0xde   : > { %3289 = vrot.lane.b32.xlu0 %v3303_v51, %s3719_s19  ;;  %3116 = vmatmul.msk.bf16.vlgmr.msra.gmra.mxu3 %vm1014_vm0, %v742_v53 }
  0xdf   : > { %1047 = vmatpush.bf16.xpose.msrb.mxu3 %v1038_v54  ;;  %v601_v55 = vpop.f32.mrf.mxu0 }
  0xe0   : > { %v624_v56 = vpop.f32.mrf.mxu1 }
  0xe1   : > { %v625_v57 = vadd.f32 %v624_v56, %v446_v38 }
  0xe3   : > { %v864_v58 = vpack.c.bf16 %v625_v57, %v625_v57  ;;  %v646_v5 = vpop.f32.mrf.mxu2 }
  0xe4   : > { %v3905_v8 = vadd.f32 %v646_v5, %v447_v4 }
  0xe5   : > { %3359 = vrot.lane.b32.xlu2 %v3343_v50, %s3720_s20  ;;  %3309 = vrot.lane.b32.xlu1 %v3853_v28, %s3717_s17  ;;  %v1057_v59 = vsel %vm1014_vm0, %v864_v58, 0 }
  0xe6   : > { %3299 = vrot.lane.b32.xlu0 %v3863_v37, %s3719_s19  ;;  %v3911_v9 = vpack.i.bf16 %v3905_v8, %v3900_v7 }
  0xe7   : > { %1066 = vmatpush.bf16.xpose.msra.mxu3 %v1057_v59  ;;  %v602_v60 = vpop.f32.mrf.mxu0 }
  0xe8   : > { %v626_v61 = vpop.f32.mrf.mxu1 }
  0xe9   : > { %v627_v62 = vadd.f32 %v626_v61, %v446_v38 }
  0xeb   : > { %v3363_v63 = vpack.i.bf16 %v627_v62, %v625_v57  ;;  %v865_v0 = vpack.c.bf16 %v627_v62, %v627_v62  ;;  %v649_v11 = vpop.f32.mrf.mxu2 }
  0xec   : > { %v3929_v13 = vadd.f32 %v649_v11, %v447_v4 }
  0xed   : > { %3364 = vrot.lane.b32.xlu2 %v3363_v63, %s3719_s19  ;;  %3314 = vrot.lane.b32.xlu1 %v3863_v37, %s3718_s18  ;;  %v1076_v2 = vsel %vm1014_vm0, %v865_v0, 0 }
  0xee   : > { %3329 = vrot.lane.b32.xlu0 %v3853_v28, %s3721_s25  ;;  %3117 = vmatmul.msk.bf16.vlgmr.msrb.gmra.mxu3 %vm1014_vm0, %v743_v1 }
  0xef   : > { %1085 = vmatpush.bf16.xpose.msrb.mxu3 %v1076_v2 }
  0xf3   : > { %v651_v12 = vpop.f32.mrf.mxu2 }
  0xf4   : > { %v3933_v14 = vadd.f32 %v651_v12, %v447_v4 }
  0xf5   : > { %3369 = vrot.lane.b32.xlu2 %v3363_v63, %s3718_s18  ;;  %3339 = vrot.lane.b32.xlu1 %v3853_v28, %s3720_s20 }
  0xf6   : > { %3334 = vrot.lane.b32.xlu0 %v3863_v37, %s3716_s16  ;;  %v3939_v15 = vpack.i.bf16 %v3933_v14, %v3929_v13 }
  0xfd   : > { %3389 = vrot.lane.b32.xlu2 %v3853_v28, %s3722_s26  ;;  %3354 = vrot.lane.b32.xlu1 %v3343_v50, %s3721_s25 }
  0xfe   : > { %3349 = vrot.lane.b32.xlu0 %v3343_v50, %s3716_s16  ;;  %3118 = vmatmul.msk.bf16.vlgmr.msra.gmra.mxu3 %vm1014_vm0, %v744_v6 }
 0x105   : > { %3419 = vrot.lane.b32.xlu2 %v3911_v9, %s3717_s17  ;;  %3384 = vrot.lane.b32.xlu1 %v3863_v37, %s3721_s25 }
 0x106   : > { %3374 = vrot.lane.b32.xlu0 %v3363_v63, %s3717_s17 }
 0x10d   : > { %3429 = vrot.lane.b32.xlu2 %v3363_v63, %s3721_s25  ;;  %3394 = vrot.lane.b32.xlu1 %v3863_v37, %s3720_s20 }
 0x10e   : > { %3379 = vrot.lane.b32.xlu0 %v3343_v50, %s3722_s26  ;;  %3119 = vmatmul.msk.bf16.vlgmr.msrb.gmra.mxu3 %vm1014_vm0, %v745_v10 }
 0x115   : > { %3439 = vrot.lane.b32.xlu2 %v3363_v63, %s3722_s26  ;;  %3404 = vrot.lane.b32.xlu1 %v3363_v63, %s3716_s16 }
 0x116   : > { %3399 = vrot.lane.b32.xlu0 %v3863_v37, %s3722_s26  ;;  %v3941_v16 = vpop.permute.xlu2 %3319 }
 0x11d   : > { %3409 = vrot.lane.b32.xlu1 %v3911_v9, %s3719_s19 }
 0x11e   : > { %3414 = vrot.lane.b32.xlu0 %v3911_v9, %s3718_s18 }
 0x125   : > { %3449 = vrot.lane.b32.xlu1 %v3939_v15, %s3718_s18 }
 0x126   : > { %3424 = vrot.lane.b32.xlu0 %v3911_v9, %s3716_s16  ;;  %v3947_v17 = vpop.permute.xlu2 %3324 }
 0x12e   : > { %3434 = vrot.lane.b32.xlu0 %v3363_v63, %s3720_s20 }
 0x136   : > { %3444 = vrot.lane.b32.xlu0 %v3939_v15, %s3719_s19 }
 0x137   : > { %v3950_v18 = vpop.permute.xlu2 %3344 }
 0x138   : > { %v3346_v19 = vunpack.i.l.bf16 %v3950_v18 }
 0x13a   : > { %v874_v20 = vpack.c.bf16 %v3346_v19, %v3346_v19 }
 0x13c   : > { %v1247_v21 = vsel %vm1014_vm0, %v874_v20, 0 }
 0x13d   : > { %1256 = vmatpush.bf16.xpose.msrb.mxu2 %v1247_v21  ;;  %v3347_v21 = vunpack.i.h.bf16 %v3950_v18 }
 0x13e   : > { %3454 = vrot.lane.b32.xlu0 %v3939_v15, %s3717_s17 }
 0x13f   : > { %v3956_v22 = vpop.permute.xlu2 %3359 }
 0x147   : > { %v3365_v23 = vpop.permute.xlu2 %3364  ;;  %v3960_v24 = vpop.permute.xlu1 %3294 }
 0x148   : > { %v3367_v25 = vunpack.i.h.bf16 %v3365_v23  ;;  %v3366_v26 = vunpack.i.l.bf16 %v3365_v23  ;;  %v3285_v27 = vpop.permute.xlu0 %3284  ;;  %v3296_v35 = vunpack.i.l.bf16 %v3960_v24  ;;  %v3297_v23 = vunpack.i.h.bf16 %v3960_v24 }
 0x149   : > { %v3286_v28 = vunpack.i.l.bf16 %v3285_v27  ;;  %v3287_v36 = vunpack.i.h.bf16 %v3285_v27 }
 0x14a   : > { %v869_v29 = vpack.c.bf16 %v3367_v25, %v3367_v25  ;;  %v868_v30 = vpack.c.bf16 %v3366_v26, %v3366_v26  ;;  %v870_v43 = vpack.c.bf16 %v3296_v35, %v3296_v35 }
 0x14b   : > { %v866_v31 = vpack.c.bf16 %v3286_v28, %v3286_v28  ;;  %v746_v46 = vpack.c.bf16 %v3287_v36, %v3287_v36 }
 0x14c   : > { %v1133_v32 = vsel %vm1014_vm0, %v868_v30, 0  ;;  %v1152_v33 = vsel %vm1014_vm0, %v869_v29, 0  ;;  %v1171_v51 = vsel %vm1014_vm0, %v870_v43, 0  ;;  %v875_v29 = vpack.c.bf16 %v3347_v21, %v3347_v21 }
 0x14d   : > { %v1095_v34 = vsel %vm1014_vm0, %v866_v31, 0  ;;  %1142 = vmatpush.bf16.xpose.msrb.mxu0 %v1133_v32  ;;  %1161 = vmatpush.bf16.xpose.msrb.mxu1 %v1152_v33  ;;  %v750_v33 = vpack.c.bf16 %v3297_v23, %v3297_v23 }
 0x14e   : > { %1104 = vmatpush.bf16.xpose.msra.mxu3 %v1095_v34  ;;  %v1266_v35 = vsel %vm1014_vm0, %v875_v29, 0 }
 0x14f   : > { %v3370_v37 = vpop.permute.xlu2 %3369  ;;  %v3966_v38 = vpop.permute.xlu1 %3304 }
 0x150   : > { %v3372_v39 = vunpack.i.h.bf16 %v3370_v37  ;;  %v3371_v40 = vunpack.i.l.bf16 %v3370_v37  ;;  %v3290_v41 = vpop.permute.xlu0 %3289  ;;  %v3306_v60 = vunpack.i.l.bf16 %v3966_v38  ;;  %v3361_v37 = vunpack.i.l.bf16 %v3956_v22 }
 0x151   : > { %v3291_v42 = vunpack.i.l.bf16 %v3290_v41  ;;  %v3292_v61 = vunpack.i.h.bf16 %v3290_v41 }
 0x152   : > { %v873_v44 = vpack.c.bf16 %v3372_v39, %v3372_v39  ;;  %v872_v45 = vpack.c.bf16 %v3371_v40, %v3371_v40  ;;  %v871_v0 = vpack.c.bf16 %v3306_v60, %v3306_v60  ;;  %v3321_v39 = vunpack.i.l.bf16 %v3941_v16 }
 0x153   : > { %v867_v47 = vpack.c.bf16 %v3291_v42, %v3291_v42  ;;  %v747_v2 = vpack.c.bf16 %v3292_v61, %v3292_v61 }
 0x154   : > { %v1209_v48 = vsel %vm1014_vm0, %v872_v45, 0  ;;  %v1228_v49 = vsel %vm1014_vm0, %v873_v44, 0  ;;  %v1190_v4 = vsel %vm1014_vm0, %v871_v0, 0 }
 0x155   : > { %3120 = vmatmul.msk.bf16.vlgmr.msra.gmra.mxu3 %vm1014_vm0, %v746_v46  ;;  %v1114_v50 = vsel %vm1014_vm0, %v867_v47, 0  ;;  %1218 = vmatpush.bf16.xpose.msra.mxu0 %v1209_v48  ;;  %v886_v46 = vpack.c.bf16 %v3361_v37, %v3361_v37  ;;  %v758_v47 = vpack.c.bf16 %v3321_v39, %v3321_v39 }
 0x156   : > { %1123 = vmatpush.bf16.xpose.msrb.mxu3 %v1114_v50  ;;  %1237 = vmatpush.bf16.xpose.msra.mxu1 %v1228_v49 }
 0x157   : > { %v3973_v52 = vpop.permute.xlu1 %3309  ;;  %v3996_v25 = vpop.permute.xlu2 %3389 }
 0x158   : > { %v3311_v53 = vunpack.i.l.bf16 %v3973_v52  ;;  %v3300_v54 = vpop.permute.xlu0 %3299 }
 0x159   : > { %v3302_v55 = vunpack.i.h.bf16 %v3300_v54  ;;  %v3301_v56 = vunpack.i.l.bf16 %v3300_v54  ;;  %v1475_v54 = vsel %vm1014_vm0, %v886_v46, 0 }
 0x15a   : > { %v754_v57 = vpack.c.bf16 %v3311_v53, %v3311_v53 }
 0x15b   : > { %v749_v58 = vpack.c.bf16 %v3302_v55, %v3302_v55  ;;  %v748_v59 = vpack.c.bf16 %v3301_v56, %v3301_v56  ;;  %v3326_v55 = vunpack.i.l.bf16 %v3947_v17  ;;  %v3307_v56 = vunpack.i.h.bf16 %v3966_v38 }
 0x15c   : > { %3128 = vmatmul.msk.bf16.vlgmr.msrb.gmra.mxu2 %vm1014_vm0, %v754_v57 }
 0x15d   : > { %3122 = vmatmul.msk.bf16.vlgmr.msrb.gmra.mxu0 %vm1014_vm0, %v748_v59  ;;  %3123 = vmatmul.msk.bf16.vlgmr.msrb.gmra.mxu1 %vm1014_vm0, %v749_v58  ;;  %v3327_v58 = vunpack.i.h.bf16 %v3947_v17  ;;  %v756_v0 = vpack.c.bf16 %v3326_v55, %v3326_v55 }
 0x15e   : > { %1180 = vmatpush.bf16.xpose.msra.mxu3 %v1171_v51 }
 0x15f   : > { %v3315_v62 = vpop.permute.xlu1 %3314  ;;  %v4013_v42 = vpop.permute.xlu2 %3419 }
 0x160   : > { %v3980_v63 = vpop.permute.xlu0 %3329  ;;  %v3317_v5 = vunpack.i.h.bf16 %v3315_v62  ;;  %v3316_v6 = vunpack.i.l.bf16 %v3315_v62 }
 0x161   : > { %v3982_v1 = vpop.f32.mrf.mxu3 }
 0x162   : > { %v1624_v3 = vsel %vm1623_vm1, %v3982_v1, -inf  ;;  %v753_v19 = vpack.c.bf16 %v3317_v5, %v3317_v5  ;;  %v752_v20 = vpack.c.bf16 %v3316_v6, %v3316_v6 }
 0x163   : > { %1625 = vmax.xlane.f32.xlu1 %v1624_v3 }
 0x165   : > { %3121 = vmatmul.msk.bf16.vlgmr.msrb.gmra.mxu3 %vm1014_vm0, %v747_v2  ;;  %v751_v2 = vpack.c.bf16 %v3307_v56, %v3307_v56 }
 0x166   : > { %1199 = vmatpush.bf16.xpose.msrb.mxu3 %v1190_v4  ;;  %v757_v4 = vpack.c.bf16 %v3327_v58, %v3327_v58  ;;  %v3362_v58 = vunpack.i.h.bf16 %v3956_v22 }
 0x167   : > { %v3988_v10 = vpop.permute.xlu1 %3339  ;;  %v3430_v3 = vpop.permute.xlu2 %3429 }
 0x168   : > { %v3990_v11 = vpop.permute.xlu0 %3334  ;;  %v3432_v5 = vunpack.i.h.bf16 %v3430_v3  ;;  %v3431_v6 = vunpack.i.l.bf16 %v3430_v3 }
 0x169   : > { %v1032_v12 = vpop.f32.mrf.mxu3 }
 0x16a   : > { %v3331_v12 = vunpack.i.l.bf16 %v3980_v63  ;;  %v885_v29 = vpack.c.bf16 %v3432_v5, %v3432_v5 }
 0x16c   : > { %v1456_v39 = vsel %vm1014_vm0, %v885_v29, 0 }
 0x16d   : > { %3126 = vmatmul.msk.bf16.vlgmr.msra.gmra.mxu0 %vm1014_vm0, %v752_v20  ;;  %3127 = vmatmul.msk.bf16.vlgmr.msra.gmra.mxu1 %vm1014_vm0, %v753_v19 }
 0x16f   : > { %v3998_v26 = vpop.permute.xlu1 %3354  ;;  %v3440_v56 = vpop.permute.xlu2 %3439 }
 0x170   : > { %v3356_v27 = vunpack.i.l.bf16 %v3998_v26  ;;  %v3350_v28 = vpop.permute.xlu0 %3349 }
 0x171   : > { %v3351_v30 = vunpack.i.l.bf16 %v3350_v28  ;;  %v4001_v31 = vpop.f32.mrf.mxu3  ;;  %v3352_v50 = vunpack.i.h.bf16 %v3350_v28 }
 0x172   : > { %v882_v32 = vpack.c.bf16 %v3356_v27, %v3356_v27  ;;  %v1627_v34 = vsel %vm1623_vm1, %v4001_v31, -inf }
 0x173   : > { %v878_v18 = vpack.c.bf16 %v3351_v30, %v3351_v30  ;;  %1628 = vmax.xlane.f32.xlu2 %v1627_v34  ;;  %v879_v60 = vpack.c.bf16 %v3352_v50, %v3352_v50  ;;  %v884_v30 = vpack.c.bf16 %v3431_v6, %v3431_v6 }
 0x174   : > { %v1399_v24 = vsel %vm1014_vm0, %v882_v32, 0 }
 0x175   : > { %3124 = vmatmul.msk.bf16.vlgmr.msra.gmra.mxu3 %vm1014_vm0, %v750_v33  ;;  %v1323_v36 = vsel %vm1014_vm0, %v878_v18, 0  ;;  %v1342_v17 = vsel %vm1014_vm0, %v879_v60, 0  ;;  %v762_v18 = vpack.c.bf16 %v3331_v12, %v3331_v12  ;;  %v1437_v37 = vsel %vm1014_vm0, %v884_v30, 0 }
 0x176   : > { %1275 = vmatpush.bf16.xpose.msra.mxu3 %v1266_v35  ;;  %1332 = vmatpush.bf16.xpose.msra.mxu2 %v1323_v36  ;;  %v3357_v35 = vunpack.i.h.bf16 %v3998_v26 }
 0x177   : > { %v4011_v40 = vpop.permute.xlu1 %3384 }
 0x178   : > { %v3375_v41 = vpop.permute.xlu0 %3374  ;;  %v3386_v3 = vunpack.i.l.bf16 %v4011_v40 }
 0x179   : > { %v3377_v43 = vunpack.i.h.bf16 %v3375_v41  ;;  %v3376_v44 = vunpack.i.l.bf16 %v3375_v41  ;;  %v1051_v45 = vpop.f32.mrf.mxu3  ;;  %v3312_v41 = vunpack.i.h.bf16 %v3973_v52 }
 0x17a   : > { %v883_v45 = vpack.c.bf16 %v3357_v35, %v3357_v35 }
 0x17b   : > { %v877_v48 = vpack.c.bf16 %v3377_v43, %v3377_v43  ;;  %v876_v49 = vpack.c.bf16 %v3376_v44, %v3376_v44  ;;  %v3336_v43 = vunpack.i.l.bf16 %v3990_v11  ;;  %v3337_v44 = vunpack.i.h.bf16 %v3990_v11 }
 0x17c   : > { %v1418_v52 = vsel %vm1014_vm0, %v883_v45, 0  ;;  %v3341_v11 = vunpack.i.l.bf16 %v3988_v10  ;;  %v985_v45 = vpack.c.bf16 %v3933_v14, %v3933_v14 }
 0x17d   : > { %3132 = vmatmul.msk.bf16.vlgmr.msra.gmra.mxu2 %vm1014_vm0, %v758_v47  ;;  %v1285_v51 = vsel %vm1014_vm0, %v876_v49, 0  ;;  %v1304_v53 = vsel %vm1014_vm0, %v877_v48, 0  ;;  %v755_v48 = vpack.c.bf16 %v3312_v41, %v3312_v41  ;;  %v760_v49 = vpack.c.bf16 %v3336_v43, %v3336_v43 }
 0x17e   : > { %1408 = vmatpush.bf16.xpose.msrb.mxu2 %v1399_v24  ;;  %1294 = vmatpush.bf16.xpose.msrb.mxu0 %v1285_v51  ;;  %v761_v50 = vpack.c.bf16 %v3337_v44, %v3337_v44  ;;  %v766_v55 = vpack.c.bf16 %v3341_v11, %v3341_v11  ;;  %v984_v44 = vpack.c.bf16 %v3929_v13, %v3929_v13 }
 0x17f   : > { %1313 = vmatpush.bf16.xpose.msrb.mxu1 %v1304_v53  ;;  %v4021_v57 = vpop.permute.xlu1 %3394 }
 0x180   : > { %v4024_v59 = vpop.permute.xlu0 %3379  ;;  %v3397_v41 = vunpack.i.h.bf16 %v4021_v57 }
 0x181   : > { %v4026_v61 = vpop.f32.mrf.mxu3  ;;  %v3381_v38 = vunpack.i.l.bf16 %v4024_v59 }
 0x182   : > { %v1630_v62 = vsel %vm1623_vm1, %v4026_v61, -inf }
 0x183   : > { %1631 = vmax.xlane.f32.xlu1 %v1630_v62  ;;  %v890_v27 = vpack.c.bf16 %v3381_v38, %v3381_v38  ;;  %v3322_v62 = vunpack.i.h.bf16 %v3941_v16 }
 0x185   : > { %3125 = vmatmul.msk.bf16.vlgmr.msrb.gmra.mxu3 %vm1014_vm0, %v751_v2  ;;  %3130 = vmatmul.msk.bf16.vlgmr.msrb.gmra.mxu0 %vm1014_vm0, %v756_v0  ;;  %v1551_v36 = vsel %vm1014_vm0, %v890_v27, 0  ;;  %v3442_v0 = vunpack.i.h.bf16 %v3440_v56  ;;  %v3441_v2 = vunpack.i.l.bf16 %v3440_v56  ;;  %v759_v22 = vpack.c.bf16 %v3322_v62, %v3322_v62 }
 0x186   : > { %1484 = vmatpush.bf16.xpose.msra.mxu2 %v1475_v54  ;;  %3131 = vmatmul.msk.bf16.vlgmr.msrb.gmra.mxu1 %vm1014_vm0, %v757_v4  ;;  %v982_v54 = vpack.c.bf16 %v3900_v7, %v3900_v7  ;;  %v3387_v4 = vunpack.i.h.bf16 %v4011_v40  ;;  %v983_v56 = vpack.c.bf16 %v3905_v8, %v3905_v8 }
 0x187   : > { %1351 = vmatpush.bf16.xpose.msrb.mxu3 %v1342_v17  ;;  %v3405_v19 = vpop.permute.xlu1 %3404  ;;  %v887_v17 = vpack.c.bf16 %v3362_v58, %v3362_v58  ;;  %v893_v12 = vpack.c.bf16 %v3442_v0, %v3442_v0 }
 0x188   : > { %v3407_v20 = vunpack.i.h.bf16 %v3405_v19  ;;  %v3406_v21 = vunpack.i.l.bf16 %v3405_v19  ;;  %v4036_v23 = vpop.permute.xlu0 %3399  ;;  %v2013_v60 = vsel %vm2011_vm2, %v982_v54, 0  ;;  %v892_v19 = vpack.c.bf16 %v3441_v2, %v3441_v2 }
 0x189   : > { %v1070_v28 = vpop.f32.mrf.mxu3  ;;  %v1494_v40 = vsel %vm1014_vm0, %v887_v17, 0  ;;  %v3401_v11 = vunpack.i.l.bf16 %v4036_v23 }
 0x18a   : > { %v881_v32 = vpack.c.bf16 %v3407_v20, %v3407_v20  ;;  %v880_v33 = vpack.c.bf16 %v3406_v21, %v3406_v21  ;;  %v764_v20 = vpack.c.bf16 %v3386_v3, %v3386_v3  ;;  %v765_v28 = vpack.c.bf16 %v3387_v4, %v3387_v4 }
 0x18b   : > { %v3392_v3 = vunpack.i.h.bf16 %v3996_v25 }
 0x18c   : > { %v1361_v34 = vsel %vm1014_vm0, %v880_v33, 0  ;;  %v1380_v24 = vsel %vm1014_vm0, %v881_v32, 0  ;;  %v3391_v32 = vunpack.i.l.bf16 %v3996_v25  ;;  %v1589_v33 = vsel %vm1014_vm0, %v892_v19, 0 }
 0x18d   : > { %3136 = vmatmul.msk.bf16.vlgmr.msrb.gmra.mxu2 %vm1014_vm0, %v762_v18  ;;  %1370 = vmatpush.bf16.xpose.msra.mxu0 %v1361_v34  ;;  %v1608_v18 = vsel %vm1014_vm0, %v893_v12, 0 }
 0x18e   : > { %1560 = vmatpush.bf16.xpose.msrb.mxu2 %v1551_v36  ;;  %1389 = vmatpush.bf16.xpose.msra.mxu1 %v1380_v24  ;;  %v770_v24 = vpack.c.bf16 %v3391_v32, %v3391_v32  ;;  %v3382_v36 = vunpack.i.h.bf16 %v4024_v59  ;;  %v2070_v59 = vsel %vm2011_vm2, %v985_v45, 0 }
 0x18f   : > { %v4069_v7 = vpop.permute.xlu1 %3409 }
 0x190   : > { %v4048_v26 = vpop.permute.xlu0 %3414  ;;  %v3411_v16 = vunpack.i.l.bf16 %v4069_v7  ;;  %v891_v43 = vpack.c.bf16 %v3382_v36, %v3382_v36  ;;  %v3412_v8 = vunpack.i.h.bf16 %v4069_v7 }
 0x191   : > { %v4050_v46 = vpop.f32.mrf.mxu3 }
 0x192   : > { %v1633_v47 = vsel %vm1623_vm1, %v4050_v46, -inf  ;;  %v986_v34 = vpack.c.bf16 %v3411_v16, %v3411_v16  ;;  %v987_v4 = vpack.c.bf16 %v3412_v8, %v3412_v8 }
 0x193   : > { %1634 = vmax.xlane.f32.xlu2 %v1633_v47 }
 0x194   : > { %v2089_v35 = vsel %vm2011_vm2, %v986_v34, 0  ;;  %v2108_v17 = vsel %vm2011_vm2, %v987_v4, 0 }
 0x195   : > { %1446 = vmatpush.bf16.xpose.msrb.mxu0 %v1437_v37  ;;  %3129 = vmatmul.msk.bf16.vlgmr.msra.gmra.mxu3 %vm1014_vm0, %v755_v48  ;;  %v3332_v37 = vunpack.i.h.bf16 %v3980_v63  ;;  %v1570_v63 = vsel %vm1014_vm0, %v891_v43, 0 }
 0x196   : > { %1465 = vmatpush.bf16.xpose.msrb.mxu1 %v1456_v39  ;;  %3134 = vmatmul.msk.bf16.vlgmr.msra.gmra.mxu0 %vm1014_vm0, %v760_v49  ;;  %v3396_v39 = vunpack.i.l.bf16 %v4021_v57  ;;  %v769_v49 = vpack.c.bf16 %v3397_v41, %v3397_v41  ;;  %v2051_v57 = vsel %vm2011_vm2, %v984_v44, 0 }
 0x197   : > { %3135 = vmatmul.msk.bf16.vlgmr.msra.gmra.mxu1 %vm1014_vm0, %v761_v50  ;;  %1427 = vmatpush.bf16.xpose.msra.mxu3 %v1418_v52  ;;  %v763_v47 = vpack.c.bf16 %v3332_v37, %v3332_v37  ;;  %v3342_v52 = vunpack.i.h.bf16 %v3988_v10  ;;  %v2032_v10 = vsel %vm2011_vm2, %v983_v56, 0 }
 0x198   : > { %v4059_v51 = vpop.permute.xlu0 %3424  ;;  %v768_v48 = vpack.c.bf16 %v3396_v39, %v3396_v39 }
 0x199   : > { %v1089_v53 = vpop.f32.mrf.mxu3  ;;  %v767_v58 = vpack.c.bf16 %v3342_v52, %v3342_v52 }
 0x19a   : > { %v3402_v53 = vunpack.i.h.bf16 %v4036_v23  ;;  %v4109_v23 = vpop.permute.xlu1 %3449 }
 0x19c   : > { %v773_v62 = vpack.c.bf16 %v3402_v53, %v3402_v53 }
 0x19d   : > { %3140 = vmatmul.msk.bf16.vlgmr.msra.gmra.mxu2 %vm1014_vm0, %v766_v55 }
 0x19e   : > { %2022 = vmatpush.bf16.msra.mxu2 %v2013_v60  ;;  %v772_v60 = vpack.c.bf16 %v3401_v11, %v3401_v11 }
 0x1a0   : > { %v3435_v38 = vpop.permute.xlu0 %3434 }
 0x1a1   : > { %v3437_v5 = vunpack.i.h.bf16 %v3435_v38  ;;  %v3436_v6 = vunpack.i.l.bf16 %v3435_v38  ;;  %v771_v38 = vpack.c.bf16 %v3392_v3, %v3392_v3 }
 0x1a3   : > { %v889_v21 = vpack.c.bf16 %v3437_v5, %v3437_v5  ;;  %v888_v27 = vpack.c.bf16 %v3436_v6, %v3436_v6 }
 0x1a5   : > { %3133 = vmatmul.msk.bf16.vlgmr.msrb.gmra.mxu3 %vm1014_vm0, %v759_v22  ;;  %v1513_v29 = vsel %vm1014_vm0, %v888_v27, 0  ;;  %v1532_v30 = vsel %vm1014_vm0, %v889_v21, 0 }
 0x1a6   : > { %3138 = vmatmul.msk.bf16.vlgmr.msrb.gmra.mxu0 %vm1014_vm0, %v764_v20  ;;  %1503 = vmatpush.bf16.xpose.msrb.mxu3 %v1494_v40 }
 0x1a7   : > { %3139 = vmatmul.msk.bf16.vlgmr.msrb.gmra.mxu1 %vm1014_vm0, %v765_v28  ;;  %1522 = vmatpush.bf16.xpose.msra.mxu0 %v1513_v29 }
 0x1a8   : > { %1541 = vmatpush.bf16.xpose.msra.mxu1 %v1532_v30  ;;  %v3445_v13 = vpop.permute.xlu0 %3444 }
 0x1a9   : > { %v3447_v14 = vunpack.i.h.bf16 %v3445_v13  ;;  %v3446_v50 = vunpack.i.l.bf16 %v3445_v13 }
 0x1ab   : > { %v989_v54 = vpack.c.bf16 %v3447_v14, %v3447_v14  ;;  %v988_v55 = vpack.c.bf16 %v3446_v50, %v3446_v50 }
 0x1ad   : > { %3144 = vmatmul.msk.bf16.vlgmr.msrb.gmra.mxu2 %vm1014_vm0, %v770_v24  ;;  %v2127_v0 = vsel %vm2011_vm2, %v988_v55, 0  ;;  %v2146_v2 = vsel %vm2011_vm2, %v989_v54, 0 }
 0x1ae   : > { %2098 = vmatpush.bf16.msrb.mxu2 %v2089_v35 }
 0x1af   : > { %1598 = vmatpush.bf16.xpose.msrb.mxu0 %v1589_v33 }
 0x1b0   : > { %1617 = vmatpush.bf16.xpose.msrb.mxu1 %v1608_v18 }
 0x1b5   : > { %3137 = vmatmul.msk.bf16.vlgmr.msra.gmra.mxu3 %vm1014_vm0, %v763_v47 }
 0x1b6   : > { %3142 = vmatmul.msk.bf16.vlgmr.msra.gmra.mxu0 %vm1014_vm0, %v768_v48  ;;  %1579 = vmatpush.bf16.xpose.msra.mxu3 %v1570_v63 }
 0x1b7   : > { %3143 = vmatmul.msk.bf16.vlgmr.msra.gmra.mxu1 %vm1014_vm0, %v769_v49  ;;  %2060 = vmatpush.bf16.msra.mxu0 %v2051_v57 }
 0x1b8   : > { %2079 = vmatpush.bf16.msra.mxu1 %v2070_v59 }
 0x1c5   : > { %3141 = vmatmul.msk.bf16.vlgmr.msrb.gmra.mxu3 %vm1014_vm0, %v767_v58 }
 0x1c6   : > { %3146 = vmatmul.msk.bf16.vlgmr.msrb.gmra.mxu0 %vm1014_vm0, %v772_v60  ;;  %2041 = vmatpush.bf16.msrb.mxu3 %v2032_v10 }
 0x1c7   : > { %3147 = vmatmul.msk.bf16.vlgmr.msrb.gmra.mxu1 %vm1014_vm0, %v773_v62  ;;  %2136 = vmatpush.bf16.msrb.mxu0 %v2127_v0 }
 0x1c8   : > { %2155 = vmatpush.bf16.msrb.mxu1 %v2146_v2 }
 0x1d5   : > { %3145 = vmatmul.msk.bf16.vlgmr.msra.gmra.mxu3 %vm1014_vm0, %v771_v38 }
 0x1d6   : > { %2117 = vmatpush.bf16.msra.mxu3 %v2108_v17  ;;  %v1626_v5 = vpop.xlane.xlu1 %1625 }
 0x1d7   : > { %v1720_v6 = vsub.f32 %v3982_v1, %v1626_v5 }
 0x1d8   : > { %v4115_v22 = vpop.f32.mrf.mxu3 }
 0x1d9   : > { %v1636_v12 = vsel %vm1623_vm1, %v4115_v22, -inf  ;;  %v1752_v7 = vmul.f32 1.442695, %v1720_v6 }
 0x1da   : > { %v4119_v19 = vpop.f32.mrf.mxu0  ;;  %v4121_v20 = vpop.f32.mrf.mxu1  ;;  %1637 = vmax.xlane.f32.xlu0 %v1636_v12 }
 0x1db   : > { %v1642_v25 = vsel %vm1623_vm1, %v4119_v19, -inf  ;;  %3564 = vpow2.f32 %v1752_v7  ;;  %v1645_v24 = vsel %vm1623_vm1, %v4121_v20, -inf }
 0x1dc   : > { %1643 = vmax.xlane.f32.xlu2 %v1642_v25 }
 0x1df   : > { %v4125_v21 = vpop.f32.mrf.mxu2 }
 0x1e0   : > { %v1108_v27 = vpop.f32.mrf.mxu3  ;;  %v1660_v1 = vsel %vm1623_vm1, %v4125_v21, -inf }
 0x1e1   : > { %1661 = vmax.xlane.f32.xlu1 %v1660_v1  ;;  %v4129_v16 = vpop.eup %3564 }
 0x1e2   : > { %v1146_v28 = vpop.f32.mrf.mxu0  ;;  %v1165_v40 = vpop.f32.mrf.mxu1  ;;  %v1816_v29 = vsel %vm1623_vm1, %v4129_v16, 0.0 }
 0x1e3   : > { %1817 = vadd.xlane.f32.xlu0 %v1816_v29 }
 0x1e6   : > { %v1629_v41 = vpop.xlane.xlu2 %1628 }
 0x1e7   : > { %v1260_v30 = vpop.f32.mrf.mxu2  ;;  %v1721_v43 = vsub.f32 %v4001_v31, %v1629_v41 }
 0x1e8   : > { %v4133_v32 = vpop.f32.mrf.mxu3 }
 0x1e9   : > { %v1639_v33 = vsel %vm1623_vm1, %v4133_v32, -inf  ;;  %v1754_v47 = vmul.f32 1.442695, %v1721_v43 }
 0x1ea   : > { %v4137_v18 = vpop.f32.mrf.mxu0  ;;  %v4139_v34 = vpop.f32.mrf.mxu1  ;;  %1640 = vmax.xlane.f32.xlu2 %v1639_v33 }
 0x1eb   : > { %1646 = vmax.xlane.f32.xlu0 %v1645_v24  ;;  %v1654_v36 = vsel %vm1623_vm1, %v4137_v18, -inf  ;;  %3566 = vpow2.f32 %v1754_v47  ;;  %v1657_v57 = vsel %vm1623_vm1, %v4139_v34, -inf }
 0x1f0   : > { %v1127_v35 = vpop.f32.mrf.mxu3 }
 0x1f1   : > { %v4160_v13 = vpop.eup %3566 }
 0x1f2   : > { %v1222_v37 = vpop.f32.mrf.mxu0  ;;  %v1241_v39 = vpop.f32.mrf.mxu1  ;;  %1655 = vmax.xlane.f32.xlu2 %v1654_v36  ;;  %v1819_v54 = vsel %vm1623_vm1, %v4160_v13, 0.0 }
 0x1f6   : > { %v1632_v60 = vpop.xlane.xlu1 %1631 }
 0x1f7   : > { %v1722_v62 = vsub.f32 %v4026_v61, %v1632_v60 }
 0x1f8   : > { %v4146_v44 = vpop.f32.mrf.mxu3 }
 0x1f9   : > { %v1648_v45 = vsel %vm1623_vm1, %v4146_v44, -inf  ;;  %v1756_v61 = vmul.f32 1.442695, %v1722_v62 }
 0x1fa   : > { %1649 = vmax.xlane.f32.xlu0 %v1648_v45 }
 0x200   : > { %v1184_v48 = vpop.f32.mrf.mxu3  ;;  %v4150_v49 = vpop.f32.mrf.mxu2 }
 0x201   : > { %v1672_v63 = vsel %vm1623_vm1, %v4150_v49, -inf }
 0x202   : > { %v4156_v59 = vpop.f32.mrf.mxu0  ;;  %1673 = vmax.xlane.f32.xlu1 %v1672_v63  ;;  %1658 = vmax.xlane.f32.xlu0 %v1657_v57 }
 0x203   : > { %v4158_v31 = vpop.f32.mrf.mxu1  ;;  %v1666_v6 = vsel %vm1623_vm1, %v4156_v59, -inf }
 0x204   : > { %v1669_v55 = vsel %vm1623_vm1, %v4158_v31, -inf }
 0x206   : > { %v1635_v14 = vpop.xlane.xlu2 %1634 }
 0x207   : > { %v1723_v50 = vsub.f32 %v4050_v46, %v1635_v14 }
 0x208   : > { %v4163_v52 = vpop.f32.mrf.mxu3  ;;  %v1336_v11 = vpop.f32.mrf.mxu2 }
 0x209   : > { %v1758_v53 = vmul.f32 1.442695, %v1723_v50  ;;  %v1651_v8 = vsel %vm1623_vm1, %v4163_v52, -inf }
 0x20a   : > { %v1298_v56 = vpop.f32.mrf.mxu0  ;;  %1820 = vadd.xlane.f32.xlu1 %v1819_v54  ;;  %1670 = vmax.xlane.f32.xlu0 %v1669_v55 }
 0x20b   : > { %3568 = vpow2.f32 %v1758_v53  ;;  %v1317_v58 = vpop.f32.mrf.mxu1 }
 0x20c   : > { %3570 = vpow2.f32 %v1756_v61 }
 0x210   : > { %v1203_v0 = vpop.f32.mrf.mxu3  ;;  %v4170_v46 = vpop.f32.mrf.mxu2 }
 0x211   : > { %v4172_v2 = vpop.eup %3568  ;;  %v1684_v10 = vsel %vm1623_vm1, %v4170_v46, -inf }
 0x212   : > { %1685 = vmax.xlane.f32.xlu2 %v1684_v10  ;;  %1652 = vmax.xlane.f32.xlu1 %v1651_v8  ;;  %v1825_v4 = vsel %vm1623_vm1, %v4172_v2, 0.0  ;;  %v4190_v27 = vpop.eup %3570  ;;  %v4234_v8 = vpop.permute.xlu0 %3454 }
 0x213   : > { %v4178_v3 = vpop.f32.mrf.mxu0  ;;  %1826 = vadd.xlane.f32.xlu0 %v1825_v4  ;;  %v1822_v40 = vsel %vm1623_vm1, %v4190_v27, 0.0 }
 0x214   : > { %v4182_v38 = vpop.f32.mrf.mxu1  ;;  %v1678_v12 = vsel %vm1623_vm1, %v4178_v3, -inf }
 0x215   : > { %v1681_v11 = vsel %vm1623_vm1, %v4182_v38, -inf }
 0x218   : > { %v4184_v17 = vpop.f32.mrf.mxu3  ;;  %v1412_v5 = vpop.f32.mrf.mxu2 }
 0x219   : > { %v1663_v47 = vsel %vm1623_vm1, %v4184_v17, -inf }
 0x21a   : > { %1667 = vmax.xlane.f32.xlu2 %v1666_v6  ;;  %1679 = vmax.xlane.f32.xlu1 %v1678_v12 }
 0x21b   : > { %v1374_v7 = vpop.f32.mrf.mxu0 }
 0x21c   : > { %v1393_v25 = vpop.f32.mrf.mxu1 }
 0x220   : > { %v1279_v1 = vpop.f32.mrf.mxu3  ;;  %v4192_v28 = vpop.f32.mrf.mxu2 }
 0x221   : > { %v1696_v36 = vsel %vm1623_vm1, %v4192_v28, -inf }
 0x222   : > { %1823 = vadd.xlane.f32.xlu2 %v1822_v40 }
 0x223   : > { %v4196_v29 = vpop.f32.mrf.mxu0 }
 0x224   : > { %v4198_v30 = vpop.f32.mrf.mxu1  ;;  %v1690_v58 = vsel %vm1623_vm1, %v4196_v29, -inf }
 0x225   : > { %v1693_v33 = vsel %vm1623_vm1, %v4198_v30, -inf }
 0x226   : > { %1694 = vmax.xlane.f32.xlu1 %v1693_v33 }
 0x228   : > { %v4202_v24 = vpop.f32.mrf.mxu3  ;;  %v1488_v35 = vpop.f32.mrf.mxu2 }
 0x229   : > { %v1675_v61 = vsel %vm1623_vm1, %v4202_v24, -inf }
 0x22a   : > { %1697 = vmax.xlane.f32.xlu2 %v1696_v36 }
 0x22b   : > { %v1450_v37 = vpop.f32.mrf.mxu0 }
 0x22c   : > { %v1469_v39 = vpop.f32.mrf.mxu1 }
 0x230   : > { %v1355_v41 = vpop.f32.mrf.mxu3  ;;  %v4206_v43 = vpop.f32.mrf.mxu2 }
 0x231   : > { %v1708_v45 = vsel %vm1623_vm1, %v4206_v43, -inf }
 0x232   : > { %1709 = vmax.xlane.f32.xlu0 %v1708_v45  ;;  %1664 = vmax.xlane.f32.xlu2 %v1663_v47 }
 0x233   : > { %v4212_v48 = vpop.f32.mrf.mxu0 }
 0x234   : > { %v4214_v63 = vpop.f32.mrf.mxu1  ;;  %v1702_v57 = vsel %vm1623_vm1, %v4212_v48, -inf }
 0x235   : > { %1703 = vmax.xlane.f32.xlu1 %v1702_v57  ;;  %v1705_v60 = vsel %vm1623_vm1, %v4214_v63, -inf  ;;  %v3416_v57 = vunpack.i.l.bf16 %v4048_v26 }
 0x238   : > { %v4218_v14 = vpop.f32.mrf.mxu3  ;;  %v1564_v50 = vpop.f32.mrf.mxu2 }
 0x239   : > { %v1687_v53 = vsel %vm1623_vm1, %v4218_v14, -inf }
 0x23a   : > { %1682 = vmax.xlane.f32.xlu2 %v1681_v11  ;;  %1688 = vmax.xlane.f32.xlu0 %v1687_v53 }
 0x23b   : > { %v1526_v54 = vpop.f32.mrf.mxu0 }
 0x23c   : > { %v1545_v55 = vpop.f32.mrf.mxu1 }
 0x240   : > { %v1431_v56 = vpop.f32.mrf.mxu3 }
 0x242   : > { %1691 = vmax.xlane.f32.xlu2 %v1690_v58  ;;  %1706 = vmax.xlane.f32.xlu0 %v1705_v60 }
 0x243   : > { %v4228_v62 = vpop.f32.mrf.mxu0 }
 0x244   : > { %v4230_v0 = vpop.f32.mrf.mxu1  ;;  %v1714_v10 = vsel %vm1623_vm1, %v4228_v62, -inf }
 0x245   : > { %1715 = vmax.xlane.f32.xlu1 %v1714_v10  ;;  %v1717_v33 = vsel %vm1623_vm1, %v4230_v0, -inf }
 0x248   : > { %v4236_v4 = vpop.f32.mrf.mxu3 }
 0x249   : > { %v1699_v5 = vsel %vm1623_vm1, %v4236_v4, -inf }
 0x24a   : > { %1676 = vmax.xlane.f32.xlu2 %v1675_v61  ;;  %1700 = vmax.xlane.f32.xlu0 %v1699_v5 }
 0x24b   : > { %v1602_v6 = vpop.f32.mrf.mxu0 }
 0x24c   : > { %v1621_v12 = vpop.f32.mrf.mxu1 }
 0x24d   : > { %v1638_v7 = vpop.xlane.xlu0 %1637 }
 0x24e   : > { %v1724_v25 = vsub.f32 %v4115_v22, %v1638_v7 }
 0x24f   : > { %v1644_v36 = vpop.xlane.xlu2 %1643 }
 0x250   : > { %v1760_v1 = vmul.f32 1.442695, %v1724_v25  ;;  %v1507_v40 = vpop.f32.mrf.mxu3  ;;  %v1726_v55 = vsub.f32 %v4119_v19, %v1644_v36 }
 0x252   : > { %3572 = vpow2.f32 %v1760_v1  ;;  %1718 = vmax.xlane.f32.xlu2 %v1717_v33  ;;  %v1764_v5 = vmul.f32 1.442695, %v1726_v55 }
 0x254   : > { %v1662_v35 = vpop.xlane.xlu1 %1661 }
 0x255   : > { %v1732_v37 = vsub.f32 %v4125_v21, %v1662_v35  ;;  %v990_v21 = vpack.c.bf16 %v3416_v57, %v3416_v57 }
 0x256   : > { %v1818_v41 = vpop.xlane.xlu0 %1817 }
 0x257   : > { %v1776_v39 = vmul.f32 1.442695, %v1732_v37  ;;  %3574 = vrcp.f32 %v1818_v41 }
 0x258   : > { %v4246_v45 = vpop.eup %3572  ;;  %v4248_v47 = vpop.f32.mrf.mxu3 }
 0x259   : > { %3576 = vpow2.f32 %v1776_v39  ;;  %v1828_v22 = vsel %vm1623_vm1, %v4246_v45, 0.0  ;;  %v1711_v1 = vsel %vm1623_vm1, %v4248_v47, -inf }
 0x25a   : > { %1829 = vadd.xlane.f32.xlu0 %v1828_v22 }
 0x25d   : > { %v1641_v50 = vpop.xlane.xlu2 %1640  ;;  %v3575_v11 = vpop.eup %3574 }
 0x25e   : > { %v1725_v53 = vsub.f32 %v4133_v32, %v1641_v50  ;;  %v1944_v56 = vmul.f32 %v3575_v11, %v4129_v16  ;;  %v2165_v32 = vsel %vm2011_vm2, %v990_v21, 0  ;;  %v1647_v6 = vpop.xlane.xlu0 %1646 }
 0x25f   : > { %v4254_v54 = vpop.eup %3576  ;;  %v1727_v16 = vsub.f32 %v4121_v20, %v1647_v6 }
 0x260   : > { %v1762_v58 = vmul.f32 1.442695, %v1725_v53  ;;  %v1583_v60 = vpop.f32.mrf.mxu3  ;;  %v1852_v10 = vsel %vm1623_vm1, %v4254_v54, 0.0  ;;  %v1976_v61 = vpack.c.bf16 %v1944_v56, %v1944_v56 }
 0x261   : > { %1853 = vadd.xlane.f32.xlu2 %v1852_v10  ;;  %v1766_v33 = vmul.f32 1.442695, %v1727_v16 }
 0x262   : > { %3578 = vpow2.f32 %v1762_v58  ;;  %3148 = vmatmul.msk.bf16.vlgmr.msra.gmra.mxu2 %vm1623_vm1, %v1976_v61  ;;  %v3417_v61 = vunpack.i.h.bf16 %v4048_v26 }
 0x263   : > { %2174 = vmatpush.bf16.msra.mxu2 %v2165_v32  ;;  %3580 = vpow2.f32 %v1764_v5 }
 0x265   : > { %v1656_v12 = vpop.xlane.xlu2 %1655 }
 0x266   : > { %v1730_v19 = vsub.f32 %v4137_v18, %v1656_v12  ;;  %v991_v12 = vpack.c.bf16 %v3417_v61, %v3417_v61 }
 0x268   : > { %v4264_v7 = vpop.eup %3578  ;;  %v1772_v25 = vmul.f32 1.442695, %v1730_v19 }
 0x269   : > { %v1831_v40 = vsel %vm1623_vm1, %v4264_v7, 0.0  ;;  %1712 = vmax.xlane.f32.xlu2 %v1711_v1  ;;  %v4270_v35 = vpop.eup %3580 }
 0x26a   : > { %3582 = vpow2.f32 %v1772_v25  ;;  %1832 = vadd.xlane.f32.xlu1 %v1831_v40  ;;  %v1834_v37 = vsel %vm1623_vm1, %v4270_v35, 0.0 }
 0x26b   : > { %3584 = vpow2.f32 %v1766_v33 }
 0x26d   : > { %v1650_v36 = vpop.xlane.xlu0 %1649 }
 0x26e   : > { %v1728_v18 = vsub.f32 %v4146_v44, %v1650_v36 }
 0x270   : > { %v4273_v20 = vpop.eup %3582  ;;  %v1768_v41 = vmul.f32 1.442695, %v1728_v18 }
 0x271   : > { %v1846_v39 = vsel %vm1623_vm1, %v4273_v20, 0.0  ;;  %1835 = vadd.xlane.f32.xlu2 %v1834_v37  ;;  %v4279_v22 = vpop.eup %3584  ;;  %v2184_v37 = vsel %vm2011_vm2, %v991_v12, 0 }
 0x272   : > { %1847 = vadd.xlane.f32.xlu1 %v1846_v39  ;;  %3586 = vpow2.f32 %v1768_v41  ;;  %v1837_v55 = vsel %vm1623_vm1, %v4279_v22, 0.0  ;;  %v3452_v39 = vunpack.i.h.bf16 %v4109_v23 }
 0x275   : > { %v1674_v57 = vpop.xlane.xlu1 %1673  ;;  %v1659_v50 = vpop.xlane.xlu0 %1658 }
 0x276   : > { %v1736_v11 = vsub.f32 %v4150_v49, %v1674_v57  ;;  %v1731_v53 = vsub.f32 %v4139_v34, %v1659_v50  ;;  %v993_v57 = vpack.c.bf16 %v3452_v39, %v3452_v39 }
 0x278   : > { %v1784_v44 = vmul.f32 1.442695, %v1736_v11  ;;  %v1774_v21 = vmul.f32 1.442695, %v1731_v53  ;;  %v4285_v56 = vpop.eup %3586 }
 0x279   : > { %1838 = vadd.xlane.f32.xlu2 %v1837_v55  ;;  %v1840_v49 = vsel %vm1623_vm1, %v4285_v56, 0.0 }
 0x27a   : > { %3588 = vpow2.f32 %v1784_v44 }
 0x27b   : > { %3590 = vpow2.f32 %v1774_v21 }
 0x27d   : > { %v1821_v58 = vpop.xlane.xlu1 %1820  ;;  %v1671_v60 = vpop.xlane.xlu0 %1670 }
 0x27e   : > { %3592 = vrcp.f32 %v1821_v58  ;;  %v1735_v11 = vsub.f32 %v4158_v31, %v1671_v60  ;;  %v2222_v58 = vsel %vm2011_vm2, %v993_v57, 0 }
 0x280   : > { %v4287_v10 = vpop.eup %3588 }
 0x281   : > { %v4291_v34 = vpop.eup %3590  ;;  %v1864_v5 = vsel %vm1623_vm1, %v4287_v10, 0.0  ;;  %1841 = vadd.xlane.f32.xlu2 %v1840_v49 }
 0x282   : > { %v1849_v32 = vsel %vm1623_vm1, %v4291_v34, 0.0  ;;  %1865 = vadd.xlane.f32.xlu0 %v1864_v5  ;;  %v3451_v5 = vunpack.i.l.bf16 %v4109_v23 }
 0x283   : > { %1850 = vadd.xlane.f32.xlu1 %v1849_v32 }
 0x284   : > { %v3593_v6 = vpop.eup %3592 }
 0x285   : > { %v1945_v19 = vmul.f32 %v3593_v6, %v4160_v13  ;;  %v1686_v16 = vpop.xlane.xlu2 %1685  ;;  %v1653_v25 = vpop.xlane.xlu1 %1652 }
 0x286   : > { %v1740_v1 = vsub.f32 %v4170_v46, %v1686_v16  ;;  %v1729_v40 = vsub.f32 %v4163_v52, %v1653_v25  ;;  %v1827_v26 = vpop.xlane.xlu0 %1826 }
 0x287   : > { %v1977_v33 = vpack.c.bf16 %v1945_v19, %v1945_v19  ;;  %3594 = vrcp.f32 %v1827_v26  ;;  %v992_v19 = vpack.c.bf16 %v3451_v5, %v3451_v5  ;;  %v3421_v5 = vunpack.i.l.bf16 %v4013_v42 }
 0x288   : > { %v1792_v36 = vmul.f32 1.442695, %v1740_v1  ;;  %v1770_v18 = vmul.f32 1.442695, %v1729_v40 }
 0x289   : > { %3149 = vmatmul.msk.bf16.vlgmr.msrb.gmra.mxu3 %vm1623_vm1, %v1977_v33 }
 0x28a   : > { %3596 = vpow2.f32 %v1792_v36  ;;  %2193 = vmatpush.bf16.msrb.mxu3 %v2184_v37 }
 0x28b   : > { %3598 = vpow2.f32 %v1770_v18 }
 0x28d   : > { %v3595_v13 = vpop.eup %3594  ;;  %v1668_v41 = vpop.xlane.xlu2 %1667 }
 0x28e   : > { %v1947_v46 = vmul.f32 %v3595_v13, %v4172_v2  ;;  %v1734_v52 = vsub.f32 %v4156_v59, %v1668_v41  ;;  %v1782_v59 = vmul.f32 1.442695, %v1735_v11  ;;  %v1680_v31 = vpop.xlane.xlu1 %1679 }
 0x28f   : > { %v1738_v61 = vsub.f32 %v4178_v3, %v1680_v31  ;;  %v2203_v3 = vsel %vm2011_vm2, %v992_v19, 0  ;;  %v994_v19 = vpack.c.bf16 %v3421_v5, %v3421_v5 }
 0x290   : > { %v4306_v50 = vpop.eup %3596  ;;  %v1979_v53 = vpack.c.bf16 %v1947_v46, %v1947_v46  ;;  %v1780_v44 = vmul.f32 1.442695, %v1734_v52 }
 0x291   : > { %v4309_v21 = vpop.eup %3598  ;;  %v1876_v55 = vsel %vm1623_vm1, %v4306_v50, 0.0  ;;  %v1788_v12 = vmul.f32 1.442695, %v1738_v61 }
 0x292   : > { %3600 = vpow2.f32 %v1780_v44  ;;  %3151 = vmatmul.msk.bf16.vlgmr.msra.gmra.mxu1 %vm1623_vm1, %v1979_v53  ;;  %v1843_v2 = vsel %vm1623_vm1, %v4309_v21, 0.0  ;;  %1877 = vadd.xlane.f32.xlu2 %v1876_v55 }
 0x293   : > { %2231 = vmatpush.bf16.msra.mxu1 %v2222_v58  ;;  %1844 = vadd.xlane.f32.xlu0 %v1843_v2 }
 0x295   : > { %v1824_v60 = vpop.xlane.xlu2 %1823 }
 0x296   : > { %3602 = vrcp.f32 %v1824_v60 }
 0x297   : > { %3604 = vpow2.f32 %v1782_v59 }
 0x298   : > { %v4317_v49 = vpop.eup %3600  ;;  %3606 = vpow2.f32 %v1788_v12 }
 0x299   : > { %v1858_v32 = vsel %vm1623_vm1, %v4317_v49, 0.0  ;;  %v4349_v58 = vpop.xlane.xlu1 %1694 }
 0x29a   : > { %1859 = vadd.xlane.f32.xlu2 %v1858_v32 }
 0x29c   : > { %v3603_v6 = vpop.eup %3602 }
 0x29d   : > { %v1946_v16 = vmul.f32 %v3603_v6, %v4190_v27  ;;  %v4324_v25 = vpop.xlane.xlu2 %1697  ;;  %v4326_v1 = vpop.eup %3604 }
 0x29e   : > { %v1861_v23 = vsel %vm1623_vm1, %v4326_v1, 0.0  ;;  %v4332_v33 = vpop.eup %3606 }
 0x29f   : > { %v1978_v40 = vpack.c.bf16 %v1946_v16, %v1946_v16  ;;  %v1870_v37 = vsel %vm1623_vm1, %v4332_v33, 0.0 }
 0x2a1   : > { %3150 = vmatmul.msk.bf16.vlgmr.msra.gmra.mxu0 %vm1623_vm1, %v1978_v40 }
 0x2a2   : > { %2212 = vmatpush.bf16.msra.mxu0 %v2203_v3  ;;  %1862 = vadd.xlane.f32.xlu2 %v1861_v23 }
 0x2a5   : > { %v1665_v26 = vpop.xlane.xlu2 %1664  ;;  %v4335_v36 = vpop.xlane.xlu0 %1709 }
 0x2a6   : > { %v1733_v27 = vsub.f32 %v4184_v17, %v1665_v26  ;;  %v2241_v26 = vsel %vm2011_vm2, %v994_v19, 0 }
 0x2a8   : > { %v1778_v18 = vmul.f32 1.442695, %v1733_v27 }
 0x2aa   : > { %1871 = vadd.xlane.f32.xlu2 %v1870_v37  ;;  %3608 = vpow2.f32 %v1778_v18 }
 0x2ad   : > { %v1683_v39 = vpop.xlane.xlu2 %1682  ;;  %v1689_v41 = vpop.xlane.xlu0 %1688 }
 0x2ae   : > { %v1741_v53 = vsub.f32 %v4218_v14, %v1689_v41  ;;  %v4361_v14 = vpop.xlane.xlu1 %1703  ;;  %v1739_v23 = vsub.f32 %v4182_v38, %v1683_v39  ;;  %v3422_v41 = vunpack.i.h.bf16 %v4013_v42 }
 0x2b0   : > { %v4339_v13 = vpop.eup %3608  ;;  %v1794_v55 = vmul.f32 1.442695, %v1741_v53  ;;  %v1790_v18 = vmul.f32 1.442695, %v1739_v23  ;;  %v995_v38 = vpack.c.bf16 %v3422_v41, %v3422_v41 }
 0x2b1   : > { %v1855_v57 = vsel %vm1623_vm1, %v4339_v13, 0.0 }
 0x2b2   : > { %1856 = vadd.xlane.f32.xlu1 %v1855_v57 }
 0x2b5   : > { %v1692_v46 = vpop.xlane.xlu2 %1691  ;;  %v4343_v52 = vpop.xlane.xlu0 %1706 }
 0x2b6   : > { %v1742_v57 = vsub.f32 %v4196_v29, %v1692_v46  ;;  %v3456_v29 = vunpack.i.l.bf16 %v4234_v8 }
 0x2b8   : > { %v4370_v16 = vpop.xlane.xlu1 %1715  ;;  %v1796_v39 = vmul.f32 1.442695, %v1742_v57 }
 0x2bd   : > { %v1677_v17 = vpop.xlane.xlu2 %1676  ;;  %v4351_v2 = vpop.xlane.xlu0 %1700 }
 0x2be   : > { %v1737_v11 = vsub.f32 %v4202_v24, %v1677_v17 }
 0x2c0   : > { %v1786_v44 = vmul.f32 1.442695, %v1737_v11 }
 0x2c2   : > { %3610 = vpow2.f32 %v1786_v44  ;;  %3464 = vrot.lane.b32.xlu2 %v3939_v15, %s3716_s16 }
 0x2c3   : > { %3612 = vpow2.f32 %v1794_v55 }
 0x2c5   : > { %v4357_v24 = vpop.xlane.xlu2 %1718 }
 0x2c8   : > { %v4353_v59 = vpop.eup %3610 }
 0x2c9   : > { %v1867_v31 = vsel %vm1623_vm1, %v4353_v59, 0.0  ;;  %v4363_v61 = vpop.eup %3612 }
 0x2ca   : > { %1868 = vadd.xlane.f32.xlu0 %v1867_v31  ;;  %v1879_v32 = vsel %vm1623_vm1, %v4363_v61, 0.0 }
 0x2cb   : > { %3459 = vrot.lane.b32.xlu1 %v3911_v9, %s3721_s25 }
 0x2cd   : > { %v1830_v60 = vpop.xlane.xlu0 %1829 }
 0x2ce   : > { %3614 = vrcp.f32 %v1830_v60  ;;  %v996_v60 = vpack.c.bf16 %v3456_v29, %v3456_v29 }
 0x2d2   : > { %1880 = vadd.xlane.f32.xlu0 %v1879_v32 }
 0x2d4   : > { %v3615_v6 = vpop.eup %3614  ;;  %v4368_v12 = vpop.xlane.xlu2 %1853 }
 0x2d5   : > { %v1948_v40 = vmul.f32 %v3615_v6, %v4246_v45  ;;  %v1744_v45 = vsub.f32 %v4192_v28, %v4324_v25  ;;  %v1748_v28 = vsub.f32 %v4206_v43, %v4335_v36 }
 0x2d7   : > { %v1980_v3 = vpack.c.bf16 %v1948_v40, %v1948_v40  ;;  %v1800_v46 = vmul.f32 1.442695, %v1744_v45  ;;  %v1808_v5 = vmul.f32 1.442695, %v1748_v28 }
 0x2d9   : > { %3152 = vmatmul.msk.bf16.vlgmr.msrb.gmra.mxu2 %vm1623_vm1, %v1980_v3  ;;  %v3457_v3 = vunpack.i.h.bf16 %v4234_v8 }
 0x2da   : > { %2250 = vmatpush.bf16.msrb.mxu2 %v2241_v26  ;;  %v2279_v26 = vsel %vm2011_vm2, %v996_v60, 0 }
 0x2db   : > { %v997_v41 = vpack.c.bf16 %v3457_v3, %v3457_v3 }
 0x2dc   : > { %v1713_v27 = vpop.xlane.xlu2 %1712 }
 0x2dd   : > { %v1833_v37 = vpop.xlane.xlu1 %1832  ;;  %v1749_v23 = vsub.f32 %v4248_v47, %v1713_v27 }
 0x2de   : > { %3616 = vrcp.f32 %v1833_v37 }
 0x2df   : > { %3618 = vpow2.f32 %v1790_v18  ;;  %v1810_v57 = vmul.f32 1.442695, %v1749_v23  ;;  %v3427_v23 = vunpack.i.h.bf16 %v4059_v51 }
 0x2e4   : > { %v3617_v17 = vpop.eup %3616  ;;  %v1836_v11 = vpop.xlane.xlu2 %1835 }
 0x2e5   : > { %v1949_v53 = vmul.f32 %v3617_v17, %v4264_v7  ;;  %3620 = vrcp.f32 %v1836_v11  ;;  %v4381_v44 = vpop.f32.mrf.mxu2  ;;  %v4385_v55 = vpop.eup %3618  ;;  %v2260_v7 = vsel %vm2011_vm2, %v995_v38, 0 }
 0x2e6   : > { %3469 = vrot.lane.b32.xlu0 %v3911_v9, %s3720_s20  ;;  %3622 = vpow2.f32 %v1796_v39  ;;  %v1873_v25 = vsel %vm1623_vm1, %v4385_v55, 0.0  ;;  %v1848_v19 = vpop.xlane.xlu1 %1847  ;;  %v3426_v39 = vunpack.i.l.bf16 %v4059_v51 }
 0x2e7   : > { %v1981_v42 = vpack.c.bf16 %v1949_v53, %v1949_v53  ;;  %3624 = vpow2.f32 %v1800_v46  ;;  %v1746_v53 = vsub.f32 %v4212_v48, %v4361_v14  ;;  %v1745_v48 = vsub.f32 %v4236_v4, %v4351_v2 }
 0x2e8   : > { %v998_v28 = vpack.c.bf16 %v3426_v39, %v3426_v39 }
 0x2e9   : > { %3153 = vmatmul.msk.bf16.vlgmr.msra.gmra.mxu3 %vm1623_vm1, %v1981_v42 }
 0x2ea   : > { %2269 = vmatpush.bf16.msra.mxu3 %v2260_v7  ;;  %v1804_v7 = vmul.f32 1.442695, %v1746_v53 }
 0x2eb   : > { %v3621_v31 = vpop.eup %3620  ;;  %1874 = vadd.xlane.f32.xlu2 %v1873_v25 }
 0x2ec   : > { %v1950_v32 = vmul.f32 %v3621_v31, %v4270_v35  ;;  %v1839_v6 = vpop.xlane.xlu2 %1838  ;;  %v4395_v40 = vpop.eup %3622 }
 0x2ed   : > { %3626 = vrcp.f32 %v1839_v6  ;;  %v2026_v36 = vpop.f32.mrf.mxu2  ;;  %v4401_v18 = vpop.eup %3624  ;;  %v1882_v35 = vsel %vm1623_vm1, %v4395_v40, 0.0  ;;  %v1750_v6 = vsub.f32 %v4228_v62, %v4370_v16 }
 0x2ee   : > { %v1982_v43 = vpack.c.bf16 %v1950_v32, %v1950_v32  ;;  %3628 = vpow2.f32 %v1808_v5  ;;  %v1888_v47 = vsel %vm1623_vm1, %v4401_v18, 0.0 }
 0x2ef   : > { %3630 = vrcp.f32 %v1848_v19  ;;  %v1743_v19 = vsub.f32 %v4198_v30, %v4349_v58 }
 0x2f0   : > { %3154 = vmatmul.msk.bf16.vlgmr.msrb.gmra.mxu0 %vm1623_vm1, %v1982_v43  ;;  %v1812_v43 = vmul.f32 1.442695, %v1750_v6 }
 0x2f1   : > { %2288 = vmatpush.bf16.msrb.mxu0 %v2279_v26 }
 0x2f3   : > { %v3627_v37 = vpop.eup %3626  ;;  %1883 = vadd.xlane.f32.xlu2 %v1882_v35 }
 0x2f4   : > { %v1951_v8 = vmul.f32 %v3627_v37, %v4279_v22  ;;  %v1842_v17 = vpop.xlane.xlu2 %1841  ;;  %v4408_v27 = vpop.eup %3628  ;;  %v2298_v22 = vsel %vm2011_vm2, %v997_v41, 0  ;;  %v1747_v41 = vsub.f32 %v4214_v63, %v4343_v52 }
 0x2f5   : > { %3632 = vrcp.f32 %v1842_v17  ;;  %1889 = vadd.xlane.f32.xlu1 %v1888_v47  ;;  %v3631_v38 = vpop.eup %3630  ;;  %v1900_v29 = vsel %vm1623_vm1, %v4408_v27, 0.0  ;;  %v1866_v60 = vpop.xlane.xlu0 %1865 }
 0x2f6   : > { %v1983_v45 = vpack.c.bf16 %v1951_v8, %v1951_v8  ;;  %v1851_v11 = vpop.xlane.xlu1 %1850  ;;  %3634 = vpow2.f32 %v1810_v57  ;;  %v1954_v42 = vmul.f32 %v3631_v38, %v4273_v20  ;;  %v2317_v20 = vsel %vm2011_vm2, %v998_v28, 0 }
 0x2f7   : > { %3636 = vrcp.f32 %v1851_v11  ;;  %v999_v8 = vpack.c.bf16 %v3427_v23, %v3427_v23  ;;  %v1806_v63 = vmul.f32 1.442695, %v1747_v41 }
 0x2f8   : > { %3155 = vmatmul.msk.bf16.vlgmr.msrb.gmra.mxu1 %vm1623_vm1, %v1983_v45  ;;  %v1986_v14 = vpack.c.bf16 %v1954_v42, %v1954_v42  ;;  %3638 = vpow2.f32 %v1804_v7 }
 0x2f9   : > { %2307 = vmatpush.bf16.msrb.mxu1 %v2298_v22  ;;  %3640 = vrcp.f32 %v4368_v12 }
 0x2fb   : > { %v3633_v46 = vpop.eup %3632  ;;  %1901 = vadd.xlane.f32.xlu2 %v1900_v29  ;;  %v1751_v29 = vsub.f32 %v4230_v0, %v4357_v24 }
 0x2fc   : > { %v1952_v25 = vmul.f32 %v3633_v46, %v4285_v56  ;;  %v4419_v31 = vpop.eup %3634  ;;  %v1802_v56 = vmul.f32 1.442695, %v1745_v48 }
 0x2fd   : > { %v3637_v32 = vpop.eup %3636  ;;  %v1903_v2 = vsel %vm1623_vm1, %v4419_v31, 0.0  ;;  %v1814_v48 = vmul.f32 1.442695, %v1751_v29 }
 0x2fe   : > { %v1984_v5 = vpack.c.bf16 %v1952_v25, %v1952_v25  ;;  %v1955_v4 = vmul.f32 %v3637_v32, %v4291_v34  ;;  %v4436_v3 = vpop.eup %3638  ;;  %3642 = vpow2.f32 %v1802_v56  ;;  %v1798_v34 = vmul.f32 1.442695, %v1743_v19 }
 0x2ff   : > { %v3641_v12 = vpop.eup %3640  ;;  %v1894_v30 = vsel %vm1623_vm1, %v4436_v3, 0.0 }
 0x300   : > { %3156 = vmatmul.msk.bf16.vlgmr.msra.gmra.mxu2 %vm1623_vm1, %v1984_v5  ;;  %3158 = vmatmul.msk.bf16.vlgmr.msra.gmra.mxu0 %vm1623_vm1, %v1986_v14  ;;  %v1987_v62 = vpack.c.bf16 %v1955_v4, %v1955_v4  ;;  %v1956_v26 = vmul.f32 %v3641_v12, %v4254_v54 }
 0x301   : > { %2326 = vmatpush.bf16.msra.mxu2 %v2317_v20 }
 0x302   : > { %v1988_v17 = vpack.c.bf16 %v1956_v26, %v1956_v26 }
 0x303   : > { %1904 = vadd.xlane.f32.xlu2 %v1903_v2 }
 0x304   : > { %v4443_v58 = vpop.eup %3642 }
 0x305   : > { %v4434_v36 = vpop.xlane.xlu2 %1877  ;;  %v1891_v45 = vsel %vm1623_vm1, %v4443_v58, 0.0 }
 0x306   : > { %v1845_v16 = vpop.xlane.xlu0 %1844 }
 0x307   : > { %3644 = vrcp.f32 %v1845_v16 }
 0x308   : > { %3159 = vmatmul.msk.bf16.vlgmr.msra.gmra.mxu1 %vm1623_vm1, %v1987_v62  ;;  %3646 = vpow2.f32 %v1812_v43 }
 0x309   : > { %3648 = vpow2.f32 %v1798_v34 }
 0x30b   : > { %1895 = vadd.xlane.f32.xlu2 %v1894_v30 }
 0x30c   : > { %v4445_v35 = vpop.f32.mrf.mxu3 }
 0x30d   : > { %v3645_v37 = vpop.eup %3644  ;;  %v1860_v57 = vpop.xlane.xlu2 %1859 }
 0x30e   : > { %v1953_v51 = vmul.f32 %v3645_v37, %v4309_v21  ;;  %3650 = vrcp.f32 %v1860_v57  ;;  %v4450_v54 = vpop.eup %3646  ;;  %3474 = vrot.lane.b32.xlu1 %v3939_v15, %s3721_s25  ;;  %v2336_v21 = vsel %vm2011_vm2, %v999_v8, 0 }
 0x30f   : > { %v4454_v47 = vpop.f32.mrf.mxu1  ;;  %3652 = vrcp.f32 %v1866_v60  ;;  %v1906_v52 = vsel %vm1623_vm1, %v4450_v54, 0.0  ;;  %v4463_v38 = vpop.eup %3648 }
 0x310   : > { %v1985_v11 = vpack.c.bf16 %v1953_v51, %v1953_v51  ;;  %1892 = vadd.xlane.f32.xlu0 %v1891_v45  ;;  %3160 = vmatmul.msk.bf16.vlgmr.msrb.gmra.mxu2 %vm1623_vm1, %v1988_v17  ;;  %3654 = vpow2.f32 %v1806_v63  ;;  %v1885_v25 = vsel %vm1623_vm1, %v4463_v38, 0.0 }
 0x312   : > { %3157 = vmatmul.msk.bf16.vlgmr.msrb.gmra.mxu3 %vm1623_vm1, %v1985_v11 }
 0x313   : > { %2345 = vmatpush.bf16.msrb.mxu3 %v2336_v21  ;;  %1907 = vadd.xlane.f32.xlu2 %v1906_v52 }
 0x314   : > { %v3651_v39 = vpop.eup %3650  ;;  %v2045_v53 = vpop.f32.mrf.mxu3 }
 0x315   : > { %v1958_v22 = vmul.f32 %v3651_v39, %v4317_v49  ;;  %v1863_v42 = vpop.xlane.xlu2 %1862  ;;  %v3653_v46 = vpop.eup %3652 }
 0x316   : > { %3656 = vrcp.f32 %v1863_v42  ;;  %3479 = vrot.lane.b32.xlu1 %v3911_v9, %s3722_s26  ;;  %v1960_v49 = vmul.f32 %v3653_v46, %v4287_v10  ;;  %v4474_v14 = vpop.eup %3654 }
 0x317   : > { %v1990_v28 = vpack.c.bf16 %v1958_v22, %v1958_v22  ;;  %v2083_v7 = vpop.f32.mrf.mxu1  ;;  %3658 = vpow2.f32 %v1814_v48  ;;  %v1897_v20 = vsel %vm1623_vm1, %v4474_v14, 0.0 }
 0x318   : > { %1886 = vadd.xlane.f32.xlu0 %v1885_v25  ;;  %v1992_v5 = vpack.c.bf16 %v1960_v49, %v1960_v49 }
 0x319   : > { %3162 = vmatmul.msk.bf16.vlgmr.msrb.gmra.mxu0 %vm1623_vm1, %v1990_v28 }
 0x31c   : > { %v3657_v60 = vpop.eup %3656 }
 0x31d   : > { %v1959_v0 = vmul.f32 %v3657_v60, %v4326_v1  ;;  %v1872_v24 = vpop.xlane.xlu2 %1871  ;;  %v4485_v10 = vpop.eup %3658 }
 0x31e   : > { %v4477_v32 = vpop.f32.mrf.mxu0  ;;  %3660 = vrcp.f32 %v1872_v24  ;;  %3484 = vrot.lane.b32.xlu1 %v3939_v15, %s3720_s20  ;;  %v1909_v43 = vsel %vm1623_vm1, %v4485_v10, 0.0 }
 0x31f   : > { %v1991_v9 = vpack.c.bf16 %v1959_v0, %v1959_v0 }
 0x320   : > { %1898 = vadd.xlane.f32.xlu0 %v1897_v20  ;;  %3164 = vmatmul.msk.bf16.vlgmr.msra.gmra.mxu2 %vm1623_vm1, %v1992_v5 }
 0x321   : > { %3163 = vmatmul.msk.bf16.vlgmr.msrb.gmra.mxu1 %vm1623_vm1, %v1991_v9 }
 0x324   : > { %v3661_v1 = vpop.eup %3660 }
 0x325   : > { %v3465_v6 = vpop.permute.xlu2 %3464  ;;  %v1857_v56 = vpop.xlane.xlu1 %1856  ;;  %v1962_v62 = vmul.f32 %v3661_v1, %v4332_v33 }
 0x326   : > { %v3467_v4 = vunpack.i.h.bf16 %v3465_v6  ;;  %v3466_v2 = vunpack.i.l.bf16 %v3465_v6  ;;  %v2064_v19 = vpop.f32.mrf.mxu0  ;;  %3662 = vrcp.f32 %v1857_v56  ;;  %3489 = vrot.lane.b32.xlu1 %v3939_v15, %s3722_s26 }
 0x327   : > { %v1994_v26 = vpack.c.bf16 %v1962_v62, %v1962_v62  ;;  %3664 = vrcp.f32 %v4434_v36 }
 0x328   : > { %v1001_v16 = vpack.c.bf16 %v3467_v4, %v3467_v4  ;;  %v1000_v12 = vpack.c.bf16 %v3466_v2, %v3466_v2  ;;  %1910 = vadd.xlane.f32.xlu0 %v1909_v43 }
 0x32a   : > { %v2355_v34 = vsel %vm2011_vm2, %v1000_v12, 0  ;;  %v2374_v23 = vsel %vm2011_vm2, %v1001_v16, 0 }
 0x32b   : > { %2364 = vmatpush.bf16.msra.mxu0 %v2355_v34  ;;  %2383 = vmatpush.bf16.msra.mxu1 %v2374_v23 }
 0x32c   : > { %v3663_v30 = vpop.eup %3662 }
 0x32d   : > { %v1957_v37 = vmul.f32 %v3663_v30, %v4339_v13  ;;  %v3665_v41 = vpop.eup %3664 }
 0x32e   : > { %3166 = vmatmul.msk.bf16.vlgmr.msra.gmra.mxu0 %vm1623_vm1, %v1994_v26  ;;  %v1964_v51 = vmul.f32 %v3665_v41, %v4306_v50 }
 0x32f   : > { %v1989_v15 = vpack.c.bf16 %v1957_v37, %v1957_v37 }
 0x330   : > { %v1996_v52 = vpack.c.bf16 %v1964_v51, %v1964_v51 }
 0x331   : > { %3161 = vmatmul.msk.bf16.vlgmr.msra.gmra.mxu3 %vm1623_vm1, %v1989_v15 }
 0x33d   : > { %v1869_v33 = vpop.xlane.xlu0 %1868  ;;  %v3460_v57 = vpop.permute.xlu1 %3459 }
 0x33e   : > { %3666 = vrcp.f32 %v1869_v33  ;;  %v3462_v8 = vunpack.i.h.bf16 %v3460_v57  ;;  %v3461_v17 = vunpack.i.l.bf16 %v3460_v57 }
 0x340   : > { %v1003_v45 = vpack.c.bf16 %v3462_v8, %v3462_v8  ;;  %v1002_v11 = vpack.c.bf16 %v3461_v17, %v3461_v17 }
 0x342   : > { %v2393_v63 = vsel %vm2011_vm2, %v1002_v11, 0  ;;  %v2412_v13 = vsel %vm2011_vm2, %v1003_v45, 0 }
 0x343   : > { %2402 = vmatpush.bf16.msrb.mxu2 %v2393_v63  ;;  %2421 = vmatpush.bf16.msra.mxu3 %v2412_v13 }
 0x344   : > { %v3667_v21 = vpop.eup %3666 }
 0x345   : > { %v1961_v36 = vmul.f32 %v3667_v21, %v4353_v59  ;;  %v1881_v53 = vpop.xlane.xlu0 %1880 }
 0x346   : > { %3168 = vmatmul.msk.bf16.vlgmr.msrb.gmra.mxu2 %vm1623_vm1, %v1996_v52  ;;  %3668 = vrcp.f32 %v1881_v53 }
 0x347   : > { %v1993_v39 = vpack.c.bf16 %v1961_v36, %v1961_v36 }
 0x349   : > { %3165 = vmatmul.msk.bf16.vlgmr.msrb.gmra.mxu3 %vm1623_vm1, %v1993_v39 }
 0x34c   : > { %v3669_v50 = vpop.eup %3668 }
 0x34d   : > { %v1965_v22 = vmul.f32 %v3669_v50, %v4363_v61 }
 0x34f   : > { %v1997_v42 = vpack.c.bf16 %v1965_v22, %v1965_v22 }
 0x358   : > { %v3470_v29 = vpop.permute.xlu0 %3469 }
 0x359   : > { %v3472_v46 = vunpack.i.h.bf16 %v3470_v29  ;;  %v3471_v28 = vunpack.i.l.bf16 %v3470_v29  ;;  %3169 = vmatmul.msk.bf16.vlgmr.msra.gmra.mxu3 %vm1623_vm1, %v1997_v42 }
 0x35b   : > { %v1007_v7 = vpack.c.bf16 %v3472_v46, %v3472_v46  ;;  %v1006_v25 = vpack.c.bf16 %v3471_v28, %v3471_v28 }
 0x35c   : > { %v2100_v48 = vpop.f32.mrf.mxu2 }
 0x35d   : > { %v2469_v59 = vsel %vm2011_vm2, %v1006_v25, 0  ;;  %v2488_v49 = vsel %vm2011_vm2, %v1007_v7, 0 }
 0x35e   : > { %2478 = vmatpush.bf16.msra.mxu2 %v2469_v59  ;;  %2497 = vmatpush.bf16.msrb.mxu3 %v2488_v49  ;;  %v1875_v60 = vpop.xlane.xlu2 %1874 }
 0x35f   : > { %3670 = vrcp.f32 %v1875_v60 }
 0x364   : > { %v2102_v0 = vpop.f32.mrf.mxu2 }
 0x365   : > { %v3671_v24 = vpop.eup %3670 }
 0x366   : > { %v1963_v61 = vmul.f32 %v3671_v24, %v4385_v55  ;;  %v1884_v20 = vpop.xlane.xlu2 %1883 }
 0x368   : > { %v1995_v5 = vpack.c.bf16 %v1963_v61, %v1963_v61  ;;  %v1890_v9 = vpop.xlane.xlu1 %1889 }
 0x369   : > { %3672 = vrcp.f32 %v1890_v9 }
 0x36a   : > { %3167 = vmatmul.msk.bf16.vlgmr.msra.gmra.mxu1 %vm1623_vm1, %v1995_v5  ;;  %3674 = vrcp.f32 %v1884_v20 }
 0x36c   : > { %v2119_v1 = vpop.f32.mrf.mxu3 }
 0x36d   : > { %v3493_v6 = vpack.i.bf16 %v2119_v1, %v2100_v48  ;;  %v4510_v56 = vpop.f32.mrf.mxu0 }
 0x36e   : > { %v1902_v43 = vpop.xlane.xlu2 %1901 }
 0x36f   : > { %3494 = vrot.lane.b32.xlu2 %v3493_v6, %s3722_s26  ;;  %v3673_v4 = vpop.eup %3672  ;;  %3676 = vrcp.f32 %v1902_v43 }
 0x370   : > { %v1968_v2 = vmul.f32 %v3673_v4, %v4401_v18  ;;  %v3675_v30 = vpop.eup %3674 }
 0x371   : > { %v1966_v57 = vmul.f32 %v3675_v30, %v4395_v40 }
 0x372   : > { %v2000_v19 = vpack.c.bf16 %v1968_v2, %v1968_v2 }
 0x373   : > { %v1998_v21 = vpack.c.bf16 %v1966_v57, %v1966_v57 }
 0x374   : > { %v2121_v62 = vpop.f32.mrf.mxu3  ;;  %3172 = vmatmul.msk.bf16.vlgmr.msra.gmra.mxu2 %vm1623_vm1, %v2000_v19 }
 0x375   : > { %v2140_v55 = vpop.f32.mrf.mxu0  ;;  %v4515_v16 = vpop.f32.mrf.mxu1 }
 0x376   : > { %v3518_v12 = vpack.i.bf16 %v4515_v16, %v4510_v56  ;;  %v1905_v26 = vpop.xlane.xlu2 %1904  ;;  %v3677_v36 = vpop.eup %3676 }
 0x377   : > { %v1972_v46 = vmul.f32 %v3677_v36, %v4408_v27 }
 0x379   : > { %v2004_v60 = vpack.c.bf16 %v1972_v46, %v1972_v46 }
 0x37d   : > { %v2159_v34 = vpop.f32.mrf.mxu1  ;;  %v4519_v23 = vpop.f32.mrf.mxu0 }
 0x37e   : > { %v1896_v52 = vpop.xlane.xlu2 %1895 }
 0x380   : > { %v3475_v37 = vpop.permute.xlu1 %3474 }
 0x381   : > { %v3477_v15 = vunpack.i.h.bf16 %v3475_v37  ;;  %v3476_v18 = vunpack.i.l.bf16 %v3475_v37 }
 0x383   : > { %v1893_v33 = vpop.xlane.xlu0 %1892  ;;  %v2176_v41 = vpop.f32.mrf.mxu2  ;;  %v1005_v8 = vpack.c.bf16 %v3477_v15, %v3477_v15  ;;  %v1004_v17 = vpack.c.bf16 %v3476_v18, %v3476_v18 }
 0x384   : > { %3678 = vrcp.f32 %v1893_v33 }
 0x385   : > { %v2216_v51 = vpop.f32.mrf.mxu0  ;;  %v4522_v45 = vpop.f32.mrf.mxu1  ;;  %v2431_v63 = vsel %vm2011_vm2, %v1004_v17, 0  ;;  %v2450_v13 = vsel %vm2011_vm2, %v1005_v8, 0  ;;  %3680 = vrcp.f32 %v1896_v52 }
 0x386   : > { %v3528_v11 = vpack.i.bf16 %v4522_v45, %v4519_v23  ;;  %2440 = vmatpush.bf16.msrb.mxu0 %v2431_v63  ;;  %2459 = vmatpush.bf16.msrb.mxu1 %v2450_v13 }
 0x388   : > { %v3480_v39 = vpop.permute.xlu1 %3479 }
 0x389   : > { %v3482_v53 = vunpack.i.h.bf16 %v3480_v39  ;;  %v3481_v50 = vunpack.i.l.bf16 %v3480_v39  ;;  %3170 = vmatmul.msk.bf16.vlgmr.msrb.gmra.mxu0 %vm1623_vm1, %v1998_v21 }
 0x38a   : > { %v3679_v40 = vpop.eup %3678 }
 0x38b   : > { %v1969_v22 = vmul.f32 %v3679_v40, %v4443_v58  ;;  %v1887_v42 = vpop.xlane.xlu0 %1886  ;;  %v2178_v29 = vpop.f32.mrf.mxu2  ;;  %v1011_v28 = vpack.c.bf16 %v3482_v53, %v3482_v53  ;;  %v1010_v7 = vpack.c.bf16 %v3481_v50, %v3481_v50 }
 0x38c   : > { %3682 = vrcp.f32 %v1887_v42  ;;  %v3681_v0 = vpop.eup %3680 }
 0x38d   : > { %v2001_v25 = vpack.c.bf16 %v1969_v22, %v1969_v22  ;;  %v2235_v48 = vpop.f32.mrf.mxu1  ;;  %v2545_v59 = vsel %vm2011_vm2, %v1010_v7, 0  ;;  %v2564_v49 = vsel %vm2011_vm2, %v1011_v28, 0  ;;  %3684 = vrcp.f32 %v1905_v26 }
 0x38e   : > { %2554 = vmatpush.bf16.msrb.mxu2 %v2545_v59  ;;  %2573 = vmatpush.bf16.msra.mxu3 %v2564_v49  ;;  %v1970_v20 = vmul.f32 %v3681_v0, %v4436_v3 }
 0x38f   : > { %3173 = vmatmul.msk.bf16.vlgmr.msrb.gmra.mxu3 %vm1623_vm1, %v2001_v25 }
 0x390   : > { %v3485_v58 = vpop.permute.xlu1 %3484  ;;  %v2002_v30 = vpack.c.bf16 %v1970_v20, %v1970_v20 }
 0x391   : > { %v3487_v61 = vunpack.i.h.bf16 %v3485_v58  ;;  %v3486_v27 = vunpack.i.l.bf16 %v3485_v58  ;;  %3176 = vmatmul.msk.bf16.vlgmr.msrb.gmra.mxu2 %vm1623_vm1, %v2004_v60 }
 0x392   : > { %v3683_v24 = vpop.eup %3682 }
 0x393   : > { %v1967_v5 = vmul.f32 %v3683_v24, %v4463_v38  ;;  %v2252_v9 = vpop.f32.mrf.mxu2  ;;  %v1009_v1 = vpack.c.bf16 %v3487_v61, %v3487_v61  ;;  %v1008_v6 = vpack.c.bf16 %v3486_v27, %v3486_v27  ;;  %v1899_v19 = vpop.xlane.xlu0 %1898 }
 0x394   : > { %v3685_v26 = vpop.eup %3684  ;;  %v1908_v38 = vpop.xlane.xlu2 %1907  ;;  %3686 = vrcp.f32 %v1899_v19 }
 0x395   : > { %v1999_v4 = vpack.c.bf16 %v1967_v5, %v1967_v5  ;;  %v2195_v2 = vpop.f32.mrf.mxu3  ;;  %v2507_v55 = vsel %vm2011_vm2, %v1008_v6, 0  ;;  %v2526_v34 = vsel %vm2011_vm2, %v1009_v1, 0  ;;  %v1973_v37 = vmul.f32 %v3685_v26, %v4419_v31 }
 0x396   : > { %v3498_v43 = vpack.i.bf16 %v2195_v2, %v2176_v41  ;;  %v4537_v62 = vpop.f32.mrf.mxu0  ;;  %2516 = vmatpush.bf16.msra.mxu0 %v2507_v55  ;;  %2535 = vmatpush.bf16.msra.mxu1 %v2526_v34  ;;  %3688 = vrcp.f32 %v1908_v38 }
 0x397   : > { %3171 = vmatmul.msk.bf16.vlgmr.msrb.gmra.mxu1 %vm1623_vm1, %v1999_v4  ;;  %v2005_v17 = vpack.c.bf16 %v1973_v37, %v1973_v37 }
 0x398   : > { %3499 = vrot.lane.b32.xlu0 %v3498_v43, %s3720_s20  ;;  %v3490_v3 = vpop.permute.xlu1 %3489 }
 0x399   : > { %v3492_v15 = vunpack.i.h.bf16 %v3490_v3  ;;  %v3491_v18 = vunpack.i.l.bf16 %v3490_v3  ;;  %3174 = vmatmul.msk.bf16.vlgmr.msra.gmra.mxu0 %vm1623_vm1, %v2002_v30 }
 0x39a   : > { %v3687_v52 = vpop.eup %3686 }
 0x39b   : > { %v2254_v33 = vpop.f32.mrf.mxu2  ;;  %v1013_v41 = vpack.c.bf16 %v3492_v15, %v3492_v15  ;;  %v1012_v57 = vpack.c.bf16 %v3491_v18, %v3491_v18  ;;  %v1971_v39 = vmul.f32 %v3687_v52, %v4474_v14  ;;  %v1911_v22 = vpop.xlane.xlu0 %1910  ;;  %v3244_v52 = vld [vmem:[%s384_s10 + $0x10] sm:$0xff] }
 0x39c   : > { %v3689_v36 = vpop.eup %3688  ;;  %3690 = vrcp.f32 %v1911_v22 }
 0x39d   : > { %v2197_v8 = vpop.f32.mrf.mxu3  ;;  %v2583_v13 = vsel %vm2011_vm2, %v1012_v57, 0  ;;  %v2602_v21 = vsel %vm2011_vm2, %v1013_v41, 0  ;;  %v1974_v53 = vmul.f32 %v3689_v36, %v4450_v54  ;;  %v2003_v50 = vpack.c.bf16 %v1971_v39, %v1971_v39  ;;  %v3242_v36 = vld [vmem:[%s384_s10] sm:$0xff] }
 0x39e   : > { %v2292_v51 = vpop.f32.mrf.mxu0  ;;  %v4545_v63 = vpop.f32.mrf.mxu1  ;;  %2592 = vmatpush.bf16.msrb.mxu0 %v2583_v13  ;;  %2611 = vmatpush.bf16.msrb.mxu1 %v2602_v21  ;;  %v3246_v13 = vld [vmem:[%s384_s10 + $0x20] sm:$0xff]  ;;  %v3245_v21 = vld [vmem:[%s384_s10 + $0x18] sm:$0xff] }
 0x39f   : > { %v3538_v31 = vpack.i.bf16 %v4545_v63, %v4537_v62  ;;  %3177 = vmatmul.msk.bf16.vlgmr.msra.gmra.mxu3 %vm1623_vm1, %v2005_v17  ;;  %v2006_v29 = vpack.c.bf16 %v1974_v53, %v1974_v53  ;;  %v3249_v62 = vld [vmem:[%s384_s10 + $0x38] sm:$0xff]  ;;  %v3248_v51 = vld [vmem:[%s384_s10 + $0x30] sm:$0xff]  ;;  %v3247_v63 = vld [vmem:[%s384_s10 + $0x28] sm:$0xff] }
 0x3a0   : > { %2833 = vmatpush.bf16.msra.mxu2 %v3249_v62 }
 0x3a2   : > { %v3691_v7 = vpop.eup %3690 }
 0x3a3   : > { %v2328_v40 = vpop.f32.mrf.mxu2  ;;  %v1975_v25 = vmul.f32 %v3691_v7, %v4485_v10 }
 0x3a4   : > { %2834 = vmatpush.bf16.msra.mxu2 %v3248_v51 }
 0x3a5   : > { %v2007_v14 = vpack.c.bf16 %v1975_v25, %v1975_v25 }
 0x3a6   : > { %v2311_v42 = vpop.f32.mrf.mxu1 }
 0x3a7   : > { %3175 = vmatmul.msk.bf16.vlgmr.msra.gmra.mxu1 %vm1623_vm1, %v2003_v50 }
 0x3a8   : > { %2835 = vmatpush.bf16.msra.mxu2 %v3247_v63 }
 0x3a9   : > { %3178 = vmatmul.msk.bf16.vlgmr.msrb.gmra.mxu0 %vm1623_vm1, %v2006_v29 }
 0x3ab   : > { %v2366_v46 = vpop.f32.mrf.mxu0  ;;  %v2330_v28 = vpop.f32.mrf.mxu2 }
 0x3ac   : > { %2836 = vmatpush.bf16.msra.mxu2 %v3246_v13 }
 0x3b0   : > { %2837 = vmatpush.bf16.msra.mxu2 %v3245_v21 }
 0x3b3   : > { %v2368_v48 = vpop.f32.mrf.mxu0 }
 0x3b4   : > { %v2271_v59 = vpop.f32.mrf.mxu3  ;;  %2838 = vmatpush.bf16.msra.mxu2 %v3244_v52 }
 0x3b5   : > { %v3503_v49 = vpack.i.bf16 %v2271_v59, %v2252_v9 }
 0x3b7   : > { %3179 = vmatmul.msk.bf16.vlgmr.msrb.gmra.mxu1 %vm1623_vm1, %v2007_v14  ;;  %3504 = vrot.lane.b32.xlu1 %v3503_v49, %s3721_s25 }
 0x3bc   : > { %v2273_v54 = vpop.f32.mrf.mxu3 }
 0x3c9   : > { %v2404_v60 = vpop.f32.mrf.mxu2  ;;  %v3495_v53 = vpop.permute.xlu2 %3494 }
 0x3ca   : > { %v3497_v22 = vunpack.i.h.bf16 %v3495_v53  ;;  %v3496_v42 = vunpack.i.l.bf16 %v3495_v53 }
 0x3cc   : > { %v2347_v0 = vpop.f32.mrf.mxu3  ;;  %v2730_v59 = vsel %vm1014_vm0, %v4445_v35, %v3497_v22  ;;  %v2729_v49 = vsel %vm1014_vm0, %v4381_v44, %v3496_v42 }
 0x3cd   : > { %v3508_v58 = vpack.i.bf16 %v2347_v0, %v2328_v40 }
 0x3cf   : > { %3509 = vrot.lane.b32.xlu1 %v3508_v58, %s3716_s16 }
 0x3d1   : > { %v2406_v24 = vpop.f32.mrf.mxu2 }
 0x3d4   : > { %v2349_v61 = vpop.f32.mrf.mxu3 }
 0x3dc   : > { %v2423_v27 = vpop.f32.mrf.mxu3 }
 0x3dd   : > { %v3513_v5 = vpack.i.bf16 %v2423_v27, %v2404_v60 }
 0x3df   : > { %3514 = vrot.lane.b32.xlu1 %v3513_v5, %s3717_s17 }
 0x3e4   : > { %v2425_v10 = vpop.f32.mrf.mxu3 }
 0x3e7   : > { %v2385_v20 = vpop.f32.mrf.mxu1  ;;  %3519 = vrot.lane.b32.xlu1 %v3518_v12, %s3722_s26 }
 0x3e8   : > { %v3543_v9 = vpack.i.bf16 %v2385_v20, %v2366_v46 }
 0x3ef   : > { %v2387_v1 = vpop.f32.mrf.mxu1  ;;  %3544 = vrot.lane.b32.xlu1 %v3543_v9, %s3716_s16 }
 0x3f7   : > { %v2480_v6 = vpop.f32.mrf.mxu2 }
 0x3ff   : > { %v2482_v4 = vpop.f32.mrf.mxu2 }
 0x406   : > { %v2442_v2 = vpop.f32.mrf.mxu0 }
 0x40a   : > { %v3500_v50 = vpop.permute.xlu0 %3499 }
 0x40b   : > { %v3502_v29 = vunpack.i.h.bf16 %v3500_v50  ;;  %v3501_v46 = vunpack.i.l.bf16 %v3500_v50 }
 0x40d   : > { %v2735_v54 = vsel %vm2733_vm3, %v2730_v59, %v3502_v29  ;;  %v2734_v58 = vsel %vm2733_vm3, %v2729_v49, %v3501_v46 }
 0x40e   : > { %v2444_v19 = vpop.f32.mrf.mxu0 }
 0x412   : > { %v2499_v43 = vpop.f32.mrf.mxu3 }
 0x413   : > { %v3523_v55 = vpack.i.bf16 %v2499_v43, %v2480_v6 }
 0x414   : > { %v2461_v34 = vpop.f32.mrf.mxu1  ;;  %v2556_v26 = vpop.f32.mrf.mxu2 }
 0x415   : > { %3524 = vrot.lane.b32.xlu0 %v3523_v55, %s3718_s18  ;;  %v3548_v37 = vpack.i.bf16 %v2461_v34, %v2442_v2 }
 0x416   : > { %v2518_v30 = vpop.f32.mrf.mxu0 }
 0x41a   : > { %v2501_v38 = vpop.f32.mrf.mxu3 }
 0x41c   : > { %v2463_v3 = vpop.f32.mrf.mxu1  ;;  %v2558_v56 = vpop.f32.mrf.mxu2 }
 0x41d   : > { %3529 = vrot.lane.b32.xlu0 %v3528_v11, %s3720_s20 }
 0x41e   : > { %v2520_v16 = vpop.f32.mrf.mxu0 }
 0x422   : > { %v2575_v12 = vpop.f32.mrf.mxu3 }
 0x423   : > { %v3533_v15 = vpack.i.bf16 %v2575_v12, %v2556_v26 }
 0x424   : > { %v2537_v18 = vpop.f32.mrf.mxu1 }
 0x425   : > { %3549 = vrot.lane.b32.xlu0 %v3548_v37, %s3717_s17  ;;  %3534 = vrot.lane.b32.xlu2 %v3533_v15, %s3719_s19  ;;  %v3553_v45 = vpack.i.bf16 %v2537_v18, %v2518_v30 }
 0x426   : > { %v2594_v33 = vpop.f32.mrf.mxu0 }
 0x429   : > { %v3505_v39 = vpop.permute.xlu1 %3504 }
 0x42a   : > { %v2577_v41 = vpop.f32.mrf.mxu3  ;;  %v3507_v28 = vunpack.i.h.bf16 %v3505_v39  ;;  %v3506_v25 = vunpack.i.l.bf16 %v3505_v39 }
 0x42c   : > { %v2539_v57 = vpop.f32.mrf.mxu1  ;;  %v2740_v24 = vsel %vm2738_vm4, %v2735_v54, %v3507_v28  ;;  %v2739_v27 = vsel %vm2738_vm4, %v2734_v58, %v3506_v25  ;;  %v3563_v28 = vld [vmem:[%s387_s30] ss:$0 sm:$0xff] }
 0x42d   : > { %3539 = vrot.lane.b32.xlu2 %v3538_v31, %s3721_s25  ;;  %v3243_v31 = vld [vmem:[%s384_s10 + $0x8] sm:$0xff] }
 0x42e   : > { %v2596_v23 = vpop.f32.mrf.mxu0  ;;  %2839 = vmatpush.bf16.msra.mxu2 %v3243_v31 }
 0x432   : > { %2840 = vmatpush.bf16.msra.mxu2 %v3242_v36 }
 0x434   : > { %v2613_v11 = vpop.f32.mrf.mxu1 }
 0x435   : > { %v3558_v8 = vpack.i.bf16 %v2613_v11, %v2594_v33  ;;  %3554 = vrot.lane.b32.xlu2 %v3553_v45, %s3718_s18 }
 0x437   : > { %3559 = vrot.lane.b32.xlu1 %v3558_v8, %s3719_s19 }
 0x43c   : > { %v2615_v17 = vpop.f32.mrf.mxu1 }
 0x441   : > { %v3510_v40 = vpop.permute.xlu1 %3509 }
 0x442   : > { %v3512_v48 = vunpack.i.h.bf16 %v3510_v40  ;;  %v3511_v14 = vunpack.i.l.bf16 %v3510_v40 }
 0x444   : > { %v2745_v5 = vsel %vm2743_vm5, %v2740_v24, %v3512_v48  ;;  %v2744_v10 = vsel %vm2743_vm5, %v2739_v27, %v3511_v14 }
 0x451   : > { %v3515_v7 = vpop.permute.xlu1 %3514 }
 0x452   : > { %v3517_v60 = vunpack.i.h.bf16 %v3515_v7  ;;  %v3516_v0 = vunpack.i.l.bf16 %v3515_v7 }
 0x454   : > { %v2750_v9 = vsel %vm2748_vm6, %v2745_v5, %v3517_v60  ;;  %v2749_v1 = vsel %vm2748_vm6, %v2744_v10, %v3516_v0 }
 0x459   : > { %v3520_v26 = vpop.permute.xlu1 %3519 }
 0x45a   : > { %v3522_v38 = vunpack.i.h.bf16 %v3520_v26  ;;  %v3521_v3 = vunpack.i.l.bf16 %v3520_v26 }
 0x45c   : > { %v2732_v37 = vsel %vm1014_vm0, %v4454_v47, %v3522_v38  ;;  %v2731_v15 = vsel %vm1014_vm0, %v4477_v32, %v3521_v3 }
 0x461   : > { %v3545_v18 = vpop.permute.xlu1 %3544 }
 0x462   : > { %v3547_v51 = vunpack.i.h.bf16 %v3545_v18  ;;  %v3546_v63 = vunpack.i.l.bf16 %v3545_v18 }
 0x47f   : > { %v3535_v61 = vpop.permute.xlu2 %3534 }
 0x480   : > { %v3537_v6 = vunpack.i.h.bf16 %v3535_v61  ;;  %v3536_v4 = vunpack.i.l.bf16 %v3535_v61 }
 0x487   : > { %v3525_v35 = vpop.permute.xlu0 %3524  ;;  %v3540_v56 = vpop.permute.xlu2 %3539 }
 0x488   : > { %v3527_v44 = vunpack.i.h.bf16 %v3525_v35  ;;  %v3526_v20 = vunpack.i.l.bf16 %v3525_v35  ;;  %v3542_v23 = vunpack.i.h.bf16 %v3540_v56  ;;  %v3541_v45 = vunpack.i.l.bf16 %v3540_v56 }
 0x48a   : > { %v2755_v2 = vsel %vm2753_vm7, %v2750_v9, %v3527_v44  ;;  %v2754_v19 = vsel %vm2753_vm7, %v2749_v1, %v3526_v20 }
 0x48b   : > { %v2759_v43 = vsel %vm2758_vm8, %v2754_v19, %v3536_v4  ;;  %v2760_v55 = vsel %vm2758_vm8, %v2755_v2, %v3537_v6 }
 0x48c   : > { %v2763_v34 = vpack.c.bf16 %v2760_v55, %v2759_v43 }
 0x48e   : > { %2841 = vmatmul.bf16.vlgmr.msra.gmra.mxu2 %v2763_v34 }
 0x48f   : > { %v3530_v30 = vpop.permute.xlu0 %3529  ;;  %v3555_v47 = vpop.permute.xlu2 %3554 }
 0x490   : > { %v3532_v16 = vunpack.i.h.bf16 %v3530_v30  ;;  %v3531_v12 = vunpack.i.l.bf16 %v3530_v30  ;;  %v3557_v31 = vunpack.i.h.bf16 %v3555_v47  ;;  %v3556_v36 = vunpack.i.l.bf16 %v3555_v47 }
 0x492   : > { %v2737_v33 = vsel %vm2733_vm3, %v2732_v37, %v3532_v16  ;;  %v2736_v41 = vsel %vm2733_vm3, %v2731_v15, %v3531_v12 }
 0x493   : > { %v2741_v11 = vsel %vm2738_vm4, %v2736_v41, %v3541_v45  ;;  %v2742_v8 = vsel %vm2738_vm4, %v2737_v33, %v3542_v23 }
 0x494   : > { %v2746_v32 = vsel %vm2743_vm5, %v2741_v11, %v3546_v63  ;;  %v2747_v13 = vsel %vm2743_vm5, %v2742_v8, %v3547_v51 }
 0x497   : > { %v3550_v57 = vpop.permute.xlu0 %3549 }
 0x498   : > { %v3552_v17 = vunpack.i.h.bf16 %v3550_v57  ;;  %v3551_v62 = vunpack.i.l.bf16 %v3550_v57 }
 0x49a   : > { %v2751_v21 = vsel %vm2748_vm6, %v2746_v32, %v3551_v62  ;;  %v2752_v52 = vsel %vm2748_vm6, %v2747_v13, %v3552_v17 }
 0x49b   : > { %v2756_v50 = vsel %vm2753_vm7, %v2751_v21, %v3556_v36  ;;  %v2757_v22 = vsel %vm2753_vm7, %v2752_v52, %v3557_v31 }
 0x4a9   : > { %v3560_v39 = vpop.permute.xlu1 %3559 }
 0x4aa   : > { %v3562_v40 = vunpack.i.h.bf16 %v3560_v39  ;;  %v3561_v53 = vunpack.i.l.bf16 %v3560_v39 }
 0x4ac   : > { %v2761_v42 = vsel %vm2758_vm8, %v2756_v50, %v3561_v53  ;;  %v2762_v29 = vsel %vm2758_vm8, %v2757_v22, %v3562_v40 }
 0x4ad   : > { %v2764_v46 = vpack.c.bf16 %v2762_v29, %v2761_v42 }
 0x4af   : > { %2846 = vmatmul.bf16.gmra.mxu2 %v2764_v46 }
 0x511   : > { %v2842_v7 = vpop.f32.mrf.mxu2 }
 0x512   : > { %v2843_v25 = vadd.f32 %v3563_v28, %v2842_v7 }
 0x514   : > { %2852 = vst [vmem:[%s396_s15] sm:$0xff] %v2843_v25 }
 0x519   : > { %v2844_v48 = vpop.f32.mrf.mxu2 }
 0x51a   : > { %v2845_v59 = vadd.f32 %v3563_v28, %v2844_v48 }
 0x51c   : > { %2853 = vst [vmem:[%s396_s15 + $0x8] sm:$0xff] %v2845_v59 }
 0x532   : > { %v2847_v14 = vpop.f32.mrf.mxu2 }
 0x533   : > { %v2848_v49 = vadd.f32 %v3563_v28, %v2847_v14 }
 0x535   : > { %2854 = vst [vmem:[%s396_s15 + $0x10] sm:$0xff] %v2848_v49 }
 0x53a   : > { %v2849_v54 = vpop.f32.mrf.mxu2 }
 0x53b   : > { %v2850_v60 = vadd.f32 %v3563_v28, %v2849_v54 }
 0x53d   : > { %2855 = vst [vmem:[%s396_s15 + $0x18] sm:$0xff] %v2850_v60 }
 0x53e PF: > { %s16_s23 = sadd.s32 1, %s3714_s23   ;;  %s4644_s21 = smov %s3710_s22 }
 0x53f   : > { %p13_p5 = scmp.ge.s32.totalorder %s16_s23, 4   ;;  %s4645_s22 = smov %s4647_s24 }
 0x541   :  { %15 = sbr.rel (!%p13_p5) target bundleno = 2 (0x2), region = 89 }

</bundles_post_ra>
